<compile_context>
chip_gen: v6e
topology: v6e:2x2x1
jax: 0.10.0
libtpu: 0.0.40
codegen_flags: <defaults>
</compile_context>

<pallas_src>
import jax
import jax.numpy as jnp
from jax.experimental import pallas as pl
from jax.experimental.pallas import tpu as pltpu

D_PAIR = 32   # d_pair
C_HEAD = 32   # c  (per-head channel dim)
N_HEAD = 4    # n_head
EPS = 1e-5    # nn.LayerNorm default eps


def _triangle_attn_kernel(zt_ref, zn_ref, bias_ref, wqkvg_ref, gb_ref, wo_ref,
                          ob_ref, out_ref):
    # zt_ref   : (TM, N, D)   row tile of the transposed pair rep (residual), f32
    # zn_ref   : (TM, N, D)   same tile, layer-normed, in matmul compute dtype
    # bias_ref : (H, N, N)    precomputed triangle bias for this batch element, f32
    # wqkvg_ref: (D, 4*H*C)   fused [Q|K|V|G] projection weights, compute dtype
    # gb_ref   : (1, H*C)     gating bias, f32
    # wo_ref   : (H*C, D)     fused output projection (bias fused into ob), compute dtype
    # ob_ref   : (1, D)       fused out_bias, f32
    TM, N, D = zt_ref.shape
    H = bias_ref.shape[0]
    HC = wo_ref.shape[0]
    C = HC // H
    cdt = zn_ref.dtype                         # matmul compute dtype (bf16 or f32)
    scale = 1.0 / (C ** 0.5)

    z = zt_ref[...]                            # (TM, N, D) f32 residual
    zn2 = zn_ref[...].reshape(TM * N, D)       # (TM*N, D)

    # Fused [Q | K | V | G] projection: one lane-dense matmul, f32 accumulation.
    proj = jnp.dot(zn2, wqkvg_ref[...],
                   preferred_element_type=jnp.float32)            # (TM*N, 4*H*C)

    # Gating for all heads at once (lane-dense, sigmoid on the EUP, f32).
    gate = jax.nn.sigmoid(proj[:, 3 * HC:4 * HC] + gb_ref[...])   # (TM*N, H*C)

    o_parts = []
    for h in range(H):                         # static unroll, H is small
        q_h = proj[:, h * C:(h + 1) * C].reshape(TM, N, C).astype(cdt)
        k_h = proj[:, HC + h * C:HC + (h + 1) * C].reshape(TM, N, C).astype(cdt)
        v_h = proj[:, 2 * HC + h * C:2 * HC + (h + 1) * C].reshape(TM, N, C).astype(cdt)

        # attention over the second spatial axis; the row-tile axis is the batch dim
        logits = jnp.einsum('tqc,tkc->tqk', q_h, k_h,
                            preferred_element_type=jnp.float32) * scale
        logits = logits + bias_ref[h][None, :, :]                 # explicit broadcast

        m = jnp.max(logits, axis=-1, keepdims=True)
        p = jnp.exp(logits - m)
        s = jnp.sum(p, axis=-1, keepdims=True)
        attn = p * pl.reciprocal(s, approx=True)                  # EUP reciprocal

        o_h = jnp.einsum('tqk,tkc->tqc', attn.astype(cdt), v_h,
                         preferred_element_type=jnp.float32)      # (TM, N, C)
        o_parts.append(o_h.reshape(TM * N, C))

    # Lane-dense gated head outputs, then one fused output projection (K = H*C).
    o_all = jnp.concatenate(o_parts, axis=-1) * gate               # (TM*N, H*C)
    y = jnp.dot(o_all.astype(cdt), wo_ref[...],
                preferred_element_type=jnp.float32)                # (TM*N, D)

    # bias_dropout_add in eval mode: residual + attn_out + out_bias
    out_ref[...] = (z + y.reshape(TM, N, D) + ob_ref[...]).astype(out_ref.dtype)


def triangle_attention_ending_node(z_raw, params, p_drop=0.0, *,
                                   compute_dtype=jnp.bfloat16, row_tile=8):
    """Forward pass of TriangleAttentionEndingNode (eval mode)."""
    del p_drop  # TODO(synk): dropout is identity in eval mode (mask of ones).
    B, N1, N2, D = z_raw.shape
    assert N1 == N2, "triangle attention requires a square pair representation"
    H, _, C = params['wq'].shape
    HC = H * C

    TM = row_tile if (N1 % row_tile == 0) else N1
    NT = N1 // TM

    f32 = jnp.float32
    zt = jnp.swapaxes(z_raw, -2, -3).astype(f32)          # ending-node view (B,N,N,D)

    # ---- XLA pre-pass: LayerNorm + triangle bias (needs the full (N,N) rep). ----
    gamma = params['gamma'].astype(f32)
    beta = params['beta'].astype(f32)
    mu = jnp.mean(zt, axis=-1, keepdims=True)
    var = jnp.mean(jnp.square(zt - mu), axis=-1, keepdims=True)
    zn = (zt - mu) * jax.lax.rsqrt(var + EPS) * gamma + beta
    bias = jnp.einsum('bqkc,ch->bhqk', zn, params['wb'].astype(f32))   # (B,H,N,N)

    # ---- fused weights: one [Q|K|V|G] projection and one output projection. ----
    def head_major(w):   # (H, D, C) -> (D, H*C); head h occupies columns h*C:(h+1)*C
        return jnp.transpose(w.astype(f32), (1, 0, 2)).reshape(D, HC)

    w_qkvg = jnp.concatenate([head_major(params['wq']), head_major(params['wk']),
                              head_major(params['wv']), head_major(params['wg'])],
                             axis=-1)                                   # (D, 4*H*C)
    w_out = params['wo'].astype(f32).reshape(HC, D)                     # (H*C, D)
    gb = params['gb'].astype(f32).reshape(1, HC)
    ob = params['out_bias'].astype(f32).reshape(1, D)

    out_t = pl.pallas_call(
        _triangle_attn_kernel,
        out_shape=jax.ShapeDtypeStruct((B, N1, N2, D), jnp.float32),
        grid=(B, NT),
        in_specs=[
            pl.BlockSpec((None, TM, N2, D), lambda b, i: (b, i, 0, 0)),  # zt row tile (residual)
            pl.BlockSpec((None, TM, N2, D), lambda b, i: (b, i, 0, 0)),  # zn row tile
            pl.BlockSpec((None, H, N2, N2), lambda b, i: (b, 0, 0, 0)),  # bias: re-DMA only on b change
            pl.BlockSpec((D, 4 * HC), lambda b, i: (0, 0)),              # fused QKVG weights
            pl.BlockSpec((1, HC), lambda b, i: (0, 0)),                  # gating bias
            pl.BlockSpec((HC, D), lambda b, i: (0, 0)),                  # fused output weights
            pl.BlockSpec((1, D), lambda b, i: (0, 0)),                   # fused out_bias
        ],
        out_specs=pl.BlockSpec((None, TM, N2, D), lambda b, i: (b, i, 0, 0)),
        compiler_params=pltpu.CompilerParams(
            dimension_semantics=("parallel", "parallel"),
            vmem_limit_bytes=48 * 1024 * 1024),
    )(zt, zn.astype(compute_dtype), bias,
      w_qkvg.astype(compute_dtype), gb, w_out.astype(compute_dtype), ob)

    return jnp.swapaxes(out_t, -2, -3)


def reference(z_raw, params):
    """Pure-JAX reference matching the PyTorch forward (eval mode)."""
    C = params['wq'].shape[2]
    zt = jnp.swapaxes(z_raw, -2, -3)
    mu = jnp.mean(zt, -1, keepdims=True)
    var = jnp.mean((zt - mu) ** 2, -1, keepdims=True)
    zn = (zt - mu) / jnp.sqrt(var + EPS) * params['gamma'] + params['beta']
    bias = jnp.einsum('bqkc,ch->bhqk', zn, params['wb'])
    q = jnp.einsum('bijc,hcd->bihjd', zn, params['wq'])
    k = jnp.einsum('bijc,hcd->bihjd', zn, params['wk'])
    v = jnp.einsum('bijc,hcd->bihjd', zn, params['wv'])
    logits = jnp.einsum('bihjd,bihkd->bihjk', q, k) / jnp.sqrt(1.0 * C) + bias[:, None]
    attn = jax.nn.softmax(logits, -1)
    o = jnp.einsum('bihjk,bihkd->bihjd', attn, v)
    g = jax.nn.sigmoid(jnp.einsum('bijc,hcd->bihjd', zn, params['wg'])
                       + params['gb'][None, None, :, None, :])
    out = jnp.einsum('bihjd,hdo->bijo', o * g, params['wo'])
    zt_out = zt + out + params['out_bias']
    return jnp.swapaxes(zt_out, -2, -3)


if __name__ == "__main__":
    key = jax.random.PRNGKey(0)
    B, N, D, C, H = 2, 16, D_PAIR, C_HEAD, N_HEAD
    ks = jax.random.split(key, 10)

    z_raw = jax.random.normal(ks[0], (B, N, N, D), jnp.float32)

    params = {
        'gamma': 1.0 + 0.1 * jax.random.normal(ks[1], (D,), jnp.float32),
        'beta': 0.1 * jax.random.normal(ks[2], (D,), jnp.float32),
        'wb': jax.random.normal(ks[3], (D, H), jnp.float32) / jnp.sqrt(1.0 * D),
        'wq': jax.random.normal(ks[4], (H, D, C), jnp.float32) / jnp.sqrt(1.0 * D),
        'wk': jax.random.normal(ks[5], (H, D, C), jnp.float32) / jnp.sqrt(1.0 * D),
        'wv': jax.random.normal(ks[6], (H, D, C), jnp.float32) / jnp.sqrt(1.0 * D),
        'wg': 0.02 * jax.random.normal(ks[7], (H, D, C), jnp.float32),
        'gb': jnp.ones((H, C), jnp.float32),
        'wo': 0.02 * jax.random.normal(ks[8], (H, C, D), jnp.float32),
        'out_bias': 0.02 * jax.random.normal(ks[9], (D,), jnp.float32),
    }

    ref = reference(z_raw, params)

    # f32 matmul path: tight numerical check (the EUP approximate reciprocal is
    # the only deviation from the pure-f32 reference).
    out_f32 = jax.block_until_ready(
        triangle_attention_ending_node(z_raw, params, p_drop=0.25,
                                       compute_dtype=jnp.float32))
    assert out_f32.shape == z_raw.shape
    err32 = float(jnp.max(jnp.abs(out_f32 - ref)))
    if err32 > 5e-3:
        raise AssertionError(f"f32 kernel/reference mismatch: max abs err = {err32}")

    # bf16 matmul path (default, MXU-native): looser tolerance.
    out_bf16 = jax.block_until_ready(
        triangle_attention_ending_node(z_raw, params, p_drop=0.25))
    assert out_bf16.shape == z_raw.shape
    err16 = float(jnp.max(jnp.abs(out_bf16 - ref)))
    if err16 > 1e-1:
        raise AssertionError(f"bf16 kernel/reference mismatch: max abs err = {err16}")

    print("KERNEL_OK")
</pallas_src>

<mosaic_0001>
module attributes {stable_mosaic.version = 11 : i64} {
  func.func @_triangle_attn_kernel(%arg0: i32, %arg1: i32, %arg2: memref<1x8x16x32xf32, #tpu.memory_space<vmem>>, %arg3: memref<1x8x16x32xf32, #tpu.memory_space<vmem>>, %arg4: memref<1x4x16x16xf32, #tpu.memory_space<vmem>>, %arg5: memref<32x512xf32, #tpu.memory_space<vmem>>, %arg6: memref<1x128xf32, #tpu.memory_space<vmem>>, %arg7: memref<128x32xf32, #tpu.memory_space<vmem>>, %arg8: memref<1x32xf32, #tpu.memory_space<vmem>>, %arg9: memref<1x8x16x32xf32, #tpu.memory_space<vmem>>) attributes {dimension_semantics = [#tpu.dimension_semantics<parallel>, #tpu.dimension_semantics<parallel>], iteration_bounds = array<i64: 2, 2>, scalar_prefetch = 0 : i64, scratch_operands = 0 : i64, tpu.core_type = #tpu.core_type<tc>, window_params = [{transform_indices = @transform_0, window_bounds = array<i64: 1, 8, 16, 32>}, {transform_indices = @transform_1, window_bounds = array<i64: 1, 8, 16, 32>}, {transform_indices = @transform_2, window_bounds = array<i64: 1, 4, 16, 16>}, {pipeline_mode = #tpu.pipeline_mode<synchronous>, transform_indices = @transform_3, window_bounds = array<i64: 32, 512>}, {pipeline_mode = #tpu.pipeline_mode<synchronous>, transform_indices = @transform_4, window_bounds = array<i64: 1, 128>}, {pipeline_mode = #tpu.pipeline_mode<synchronous>, transform_indices = @transform_5, window_bounds = array<i64: 128, 32>}, {pipeline_mode = #tpu.pipeline_mode<synchronous>, transform_indices = @transform_6, window_bounds = array<i64: 1, 32>}, {transform_indices = @transform_7, window_bounds = array<i64: 1, 8, 16, 32>}]} {
    %c0 = arith.constant 0 : index
    %c0_0 = arith.constant 0 : index
    %c0_1 = arith.constant 0 : index
    %c0_2 = arith.constant 0 : index
    %0 = vector.load %arg2[%c0, %c0_0, %c0_1, %c0_2] : memref<1x8x16x32xf32, #tpu.memory_space<vmem>>, vector<1x8x16x32xf32>
    %1 = vector.shape_cast %0 : vector<1x8x16x32xf32> to vector<8x16x32xf32>
    %c0_3 = arith.constant 0 : index
    %c0_4 = arith.constant 0 : index
    %c0_5 = arith.constant 0 : index
    %c0_6 = arith.constant 0 : index
    %2 = vector.load %arg3[%c0_3, %c0_4, %c0_5, %c0_6] : memref<1x8x16x32xf32, #tpu.memory_space<vmem>>, vector<1x8x16x32xf32>
    %3 = vector.shape_cast %2 : vector<1x8x16x32xf32> to vector<8x16x32xf32>
    %4 = vector.shape_cast %3 : vector<8x16x32xf32> to vector<128x32xf32>
    %c0_7 = arith.constant 0 : index
    %c0_8 = arith.constant 0 : index
    %5 = vector.load %arg5[%c0_7, %c0_8] : memref<32x512xf32, #tpu.memory_space<vmem>>, vector<32x512xf32>
    %cst = arith.constant dense<0.000000e+00> : vector<128x512xf32>
    %6 = tpu.matmul %4, %5, %cst {dimension_numbers = #tpu.dot_dimension_numbers<[1], [0], [0], [1], [0, 0, 1, 1], [], []>} : vector<128x32xf32>, vector<32x512xf32>, vector<128x512xf32> -> vector<128x512xf32>
    %7 = vector.extract_strided_slice %6 {offsets = [0, 384], sizes = [128, 128], strides = [1, 1]} : vector<128x512xf32> to vector<128x128xf32>
    %c0_9 = arith.constant 0 : index
    %c0_10 = arith.constant 0 : index
    %8 = vector.load %arg6[%c0_9, %c0_10] : memref<1x128xf32, #tpu.memory_space<vmem>>, vector<1x128xf32>
    %9 = vector.broadcast %8 : vector<1x128xf32> to vector<128x128xf32>
    %10 = arith.addf %7, %9 : vector<128x128xf32>
    %11 = arith.negf %10 : vector<128x128xf32>
    %12 = math.exp %11 : vector<128x128xf32>
    %cst_11 = arith.constant 1.000000e+00 : f32
    %13 = vector.broadcast %cst_11 : f32 to vector<128x128xf32>
    %14 = arith.addf %13, %12 : vector<128x128xf32>
    %15 = arith.divf %13, %14 : vector<128x128xf32>
    %16 = vector.extract_strided_slice %6 {offsets = [0, 0], sizes = [128, 32], strides = [1, 1]} : vector<128x512xf32> to vector<128x32xf32>
    %17 = vector.shape_cast %16 : vector<128x32xf32> to vector<8x16x32xf32>
    %18 = vector.extract_strided_slice %6 {offsets = [0, 128], sizes = [128, 32], strides = [1, 1]} : vector<128x512xf32> to vector<128x32xf32>
    %19 = vector.shape_cast %18 : vector<128x32xf32> to vector<8x16x32xf32>
    %20 = vector.extract_strided_slice %6 {offsets = [0, 256], sizes = [128, 32], strides = [1, 1]} : vector<128x512xf32> to vector<128x32xf32>
    %21 = vector.shape_cast %20 : vector<128x32xf32> to vector<8x16x32xf32>
    "tpu.trace_start"() <{level = 10 : i32, message = "tqc,tkc->tqk"}> : () -> ()
    %cst_12 = arith.constant dense<0.000000e+00> : vector<8x16x16xf32>
    %22 = tpu.matmul %17, %19, %cst_12 {dimension_numbers = #tpu.dot_dimension_numbers<[2], [2], [1], [1], [0, 0, 0, 1, 1, 1], [0], [0]>} : vector<8x16x32xf32>, vector<8x16x32xf32>, vector<8x16x16xf32> -> vector<8x16x16xf32>
    "tpu.trace_stop"() : () -> ()
    %cst_13 = arith.constant 0.176776692 : f32
    %23 = vector.broadcast %cst_13 : f32 to vector<8x16x16xf32>
    %24 = arith.mulf %22, %23 : vector<8x16x16xf32>
    %c0_14 = arith.constant 0 : index
    %c0_15 = arith.constant 0 : index
    %c0_16 = arith.constant 0 : index
    %c0_17 = arith.constant 0 : index
    %25 = vector.load %arg4[%c0_14, %c0_15, %c0_16, %c0_17] : memref<1x4x16x16xf32, #tpu.memory_space<vmem>>, vector<1x1x16x16xf32>
    %26 = vector.shape_cast %25 : vector<1x1x16x16xf32> to vector<16x16xf32>
    %27 = vector.shape_cast %26 : vector<16x16xf32> to vector<1x16x16xf32>
    %28 = vector.broadcast %27 : vector<1x16x16xf32> to vector<8x16x16xf32>
    %29 = arith.addf %24, %28 : vector<8x16x16xf32>
    %cst_18 = arith.constant dense<0xFF800000> : vector<8x16xf32>
    %30 = vector.multi_reduction <maximumf>, %29, %cst_18 [2] : vector<8x16x16xf32> to vector<8x16xf32>
    %31 = vector.shape_cast %30 : vector<8x16xf32> to vector<8x16x1xf32>
    %32 = vector.broadcast %31 : vector<8x16x1xf32> to vector<8x16x16xf32>
    %33 = arith.subf %29, %32 : vector<8x16x16xf32>
    %34 = math.exp %33 : vector<8x16x16xf32>
    %cst_19 = arith.constant dense<0.000000e+00> : vector<8x16xf32>
    %35 = vector.multi_reduction <add>, %34, %cst_19 [2] : vector<8x16x16xf32> to vector<8x16xf32>
    %36 = vector.shape_cast %35 : vector<8x16xf32> to vector<8x16x1xf32>
    %37 = tpu.reciprocal %36 {approx = true} : vector<8x16x1xf32> -> vector<8x16x1xf32>
    %38 = vector.broadcast %37 : vector<8x16x1xf32> to vector<8x16x16xf32>
    %39 = arith.mulf %34, %38 : vector<8x16x16xf32>
    "tpu.trace_start"() <{level = 10 : i32, message = "tqk,tkc->tqc"}> : () -> ()
    %cst_20 = arith.constant dense<0.000000e+00> : vector<8x16x32xf32>
    %40 = tpu.matmul %39, %21, %cst_20 {dimension_numbers = #tpu.dot_dimension_numbers<[2], [1], [1], [2], [0, 0, 0, 1, 1, 2], [0], [0]>} : vector<8x16x16xf32>, vector<8x16x32xf32>, vector<8x16x32xf32> -> vector<8x16x32xf32>
    "tpu.trace_stop"() : () -> ()
    %41 = vector.shape_cast %40 : vector<8x16x32xf32> to vector<128x32xf32>
    %42 = vector.extract_strided_slice %6 {offsets = [0, 32], sizes = [128, 32], strides = [1, 1]} : vector<128x512xf32> to vector<128x32xf32>
    %43 = vector.shape_cast %42 : vector<128x32xf32> to vector<8x16x32xf32>
    %44 = vector.extract_strided_slice %6 {offsets = [0, 160], sizes = [128, 32], strides = [1, 1]} : vector<128x512xf32> to vector<128x32xf32>
    %45 = vector.shape_cast %44 : vector<128x32xf32> to vector<8x16x32xf32>
    %46 = vector.extract_strided_slice %6 {offsets = [0, 288], sizes = [128, 32], strides = [1, 1]} : vector<128x512xf32> to vector<128x32xf32>
    %47 = vector.shape_cast %46 : vector<128x32xf32> to vector<8x16x32xf32>
    "tpu.trace_start"() <{level = 10 : i32, message = "tqc,tkc->tqk"}> : () -> ()
    %cst_21 = arith.constant dense<0.000000e+00> : vector<8x16x16xf32>
    %48 = tpu.matmul %43, %45, %cst_21 {dimension_numbers = #tpu.dot_dimension_numbers<[2], [2], [1], [1], [0, 0, 0, 1, 1, 1], [0], [0]>} : vector<8x16x32xf32>, vector<8x16x32xf32>, vector<8x16x16xf32> -> vector<8x16x16xf32>
    "tpu.trace_stop"() : () -> ()
    %cst_22 = arith.constant 0.176776692 : f32
    %49 = vector.broadcast %cst_22 : f32 to vector<8x16x16xf32>
    %50 = arith.mulf %48, %49 : vector<8x16x16xf32>
    %c0_23 = arith.constant 0 : index
    %c1 = arith.constant 1 : index
    %c0_24 = arith.constant 0 : index
    %c0_25 = arith.constant 0 : index
    %51 = vector.load %arg4[%c0_23, %c1, %c0_24, %c0_25] : memref<1x4x16x16xf32, #tpu.memory_space<vmem>>, vector<1x1x16x16xf32>
    %52 = vector.shape_cast %51 : vector<1x1x16x16xf32> to vector<16x16xf32>
    %53 = vector.shape_cast %52 : vector<16x16xf32> to vector<1x16x16xf32>
    %54 = vector.broadcast %53 : vector<1x16x16xf32> to vector<8x16x16xf32>
    %55 = arith.addf %50, %54 : vector<8x16x16xf32>
    %cst_26 = arith.constant dense<0xFF800000> : vector<8x16xf32>
    %56 = vector.multi_reduction <maximumf>, %55, %cst_26 [2] : vector<8x16x16xf32> to vector<8x16xf32>
    %57 = vector.shape_cast %56 : vector<8x16xf32> to vector<8x16x1xf32>
    %58 = vector.broadcast %57 : vector<8x16x1xf32> to vector<8x16x16xf32>
    %59 = arith.subf %55, %58 : vector<8x16x16xf32>
    %60 = math.exp %59 : vector<8x16x16xf32>
    %cst_27 = arith.constant dense<0.000000e+00> : vector<8x16xf32>
    %61 = vector.multi_reduction <add>, %60, %cst_27 [2] : vector<8x16x16xf32> to vector<8x16xf32>
    %62 = vector.shape_cast %61 : vector<8x16xf32> to vector<8x16x1xf32>
    %63 = tpu.reciprocal %62 {approx = true} : vector<8x16x1xf32> -> vector<8x16x1xf32>
    %64 = vector.broadcast %63 : vector<8x16x1xf32> to vector<8x16x16xf32>
    %65 = arith.mulf %60, %64 : vector<8x16x16xf32>
    "tpu.trace_start"() <{level = 10 : i32, message = "tqk,tkc->tqc"}> : () -> ()
    %cst_28 = arith.constant dense<0.000000e+00> : vector<8x16x32xf32>
    %66 = tpu.matmul %65, %47, %cst_28 {dimension_numbers = #tpu.dot_dimension_numbers<[2], [1], [1], [2], [0, 0, 0, 1, 1, 2], [0], [0]>} : vector<8x16x16xf32>, vector<8x16x32xf32>, vector<8x16x32xf32> -> vector<8x16x32xf32>
    "tpu.trace_stop"() : () -> ()
    %67 = vector.shape_cast %66 : vector<8x16x32xf32> to vector<128x32xf32>
    %68 = vector.extract_strided_slice %6 {offsets = [0, 64], sizes = [128, 32], strides = [1, 1]} : vector<128x512xf32> to vector<128x32xf32>
    %69 = vector.shape_cast %68 : vector<128x32xf32> to vector<8x16x32xf32>
    %70 = vector.extract_strided_slice %6 {offsets = [0, 192], sizes = [128, 32], strides = [1, 1]} : vector<128x512xf32> to vector<128x32xf32>
    %71 = vector.shape_cast %70 : vector<128x32xf32> to vector<8x16x32xf32>
    %72 = vector.extract_strided_slice %6 {offsets = [0, 320], sizes = [128, 32], strides = [1, 1]} : vector<128x512xf32> to vector<128x32xf32>
    %73 = vector.shape_cast %72 : vector<128x32xf32> to vector<8x16x32xf32>
    "tpu.trace_start"() <{level = 10 : i32, message = "tqc,tkc->tqk"}> : () -> ()
    %cst_29 = arith.constant dense<0.000000e+00> : vector<8x16x16xf32>
    %74 = tpu.matmul %69, %71, %cst_29 {dimension_numbers = #tpu.dot_dimension_numbers<[2], [2], [1], [1], [0, 0, 0, 1, 1, 1], [0], [0]>} : vector<8x16x32xf32>, vector<8x16x32xf32>, vector<8x16x16xf32> -> vector<8x16x16xf32>
    "tpu.trace_stop"() : () -> ()
    %cst_30 = arith.constant 0.176776692 : f32
    %75 = vector.broadcast %cst_30 : f32 to vector<8x16x16xf32>
    %76 = arith.mulf %74, %75 : vector<8x16x16xf32>
    %c0_31 = arith.constant 0 : index
    %c2 = arith.constant 2 : index
    %c0_32 = arith.constant 0 : index
    %c0_33 = arith.constant 0 : index
    %77 = vector.load %arg4[%c0_31, %c2, %c0_32, %c0_33] : memref<1x4x16x16xf32, #tpu.memory_space<vmem>>, vector<1x1x16x16xf32>
    %78 = vector.shape_cast %77 : vector<1x1x16x16xf32> to vector<16x16xf32>
    %79 = vector.shape_cast %78 : vector<16x16xf32> to vector<1x16x16xf32>
    %80 = vector.broadcast %79 : vector<1x16x16xf32> to vector<8x16x16xf32>
    %81 = arith.addf %76, %80 : vector<8x16x16xf32>
    %cst_34 = arith.constant dense<0xFF800000> : vector<8x16xf32>
    %82 = vector.multi_reduction <maximumf>, %81, %cst_34 [2] : vector<8x16x16xf32> to vector<8x16xf32>
    %83 = vector.shape_cast %82 : vector<8x16xf32> to vector<8x16x1xf32>
    %84 = vector.broadcast %83 : vector<8x16x1xf32> to vector<8x16x16xf32>
    %85 = arith.subf %81, %84 : vector<8x16x16xf32>
    %86 = math.exp %85 : vector<8x16x16xf32>
    %cst_35 = arith.constant dense<0.000000e+00> : vector<8x16xf32>
    %87 = vector.multi_reduction <add>, %86, %cst_35 [2] : vector<8x16x16xf32> to vector<8x16xf32>
    %88 = vector.shape_cast %87 : vector<8x16xf32> to vector<8x16x1xf32>
    %89 = tpu.reciprocal %88 {approx = true} : vector<8x16x1xf32> -> vector<8x16x1xf32>
    %90 = vector.broadcast %89 : vector<8x16x1xf32> to vector<8x16x16xf32>
    %91 = arith.mulf %86, %90 : vector<8x16x16xf32>
    "tpu.trace_start"() <{level = 10 : i32, message = "tqk,tkc->tqc"}> : () -> ()
    %cst_36 = arith.constant dense<0.000000e+00> : vector<8x16x32xf32>
    %92 = tpu.matmul %91, %73, %cst_36 {dimension_numbers = #tpu.dot_dimension_numbers<[2], [1], [1], [2], [0, 0, 0, 1, 1, 2], [0], [0]>} : vector<8x16x16xf32>, vector<8x16x32xf32>, vector<8x16x32xf32> -> vector<8x16x32xf32>
    "tpu.trace_stop"() : () -> ()
    %93 = vector.shape_cast %92 : vector<8x16x32xf32> to vector<128x32xf32>
    %94 = vector.extract_strided_slice %6 {offsets = [0, 96], sizes = [128, 32], strides = [1, 1]} : vector<128x512xf32> to vector<128x32xf32>
    %95 = vector.shape_cast %94 : vector<128x32xf32> to vector<8x16x32xf32>
    %96 = vector.extract_strided_slice %6 {offsets = [0, 224], sizes = [128, 32], strides = [1, 1]} : vector<128x512xf32> to vector<128x32xf32>
    %97 = vector.shape_cast %96 : vector<128x32xf32> to vector<8x16x32xf32>
    %98 = vector.extract_strided_slice %6 {offsets = [0, 352], sizes = [128, 32], strides = [1, 1]} : vector<128x512xf32> to vector<128x32xf32>
    %99 = vector.shape_cast %98 : vector<128x32xf32> to vector<8x16x32xf32>
    "tpu.trace_start"() <{level = 10 : i32, message = "tqc,tkc->tqk"}> : () -> ()
    %cst_37 = arith.constant dense<0.000000e+00> : vector<8x16x16xf32>
    %100 = tpu.matmul %95, %97, %cst_37 {dimension_numbers = #tpu.dot_dimension_numbers<[2], [2], [1], [1], [0, 0, 0, 1, 1, 1], [0], [0]>} : vector<8x16x32xf32>, vector<8x16x32xf32>, vector<8x16x16xf32> -> vector<8x16x16xf32>
    "tpu.trace_stop"() : () -> ()
    %cst_38 = arith.constant 0.176776692 : f32
    %101 = vector.broadcast %cst_38 : f32 to vector<8x16x16xf32>
    %102 = arith.mulf %100, %101 : vector<8x16x16xf32>
    %c0_39 = arith.constant 0 : index
    %c3 = arith.constant 3 : index
    %c0_40 = arith.constant 0 : index
    %c0_41 = arith.constant 0 : index
    %103 = vector.load %arg4[%c0_39, %c3, %c0_40, %c0_41] : memref<1x4x16x16xf32, #tpu.memory_space<vmem>>, vector<1x1x16x16xf32>
    %104 = vector.shape_cast %103 : vector<1x1x16x16xf32> to vector<16x16xf32>
    %105 = vector.shape_cast %104 : vector<16x16xf32> to vector<1x16x16xf32>
    %106 = vector.broadcast %105 : vector<1x16x16xf32> to vector<8x16x16xf32>
    %107 = arith.addf %102, %106 : vector<8x16x16xf32>
    %cst_42 = arith.constant dense<0xFF800000> : vector<8x16xf32>
    %108 = vector.multi_reduction <maximumf>, %107, %cst_42 [2] : vector<8x16x16xf32> to vector<8x16xf32>
    %109 = vector.shape_cast %108 : vector<8x16xf32> to vector<8x16x1xf32>
    %110 = vector.broadcast %109 : vector<8x16x1xf32> to vector<8x16x16xf32>
    %111 = arith.subf %107, %110 : vector<8x16x16xf32>
    %112 = math.exp %111 : vector<8x16x16xf32>
    %cst_43 = arith.constant dense<0.000000e+00> : vector<8x16xf32>
    %113 = vector.multi_reduction <add>, %112, %cst_43 [2] : vector<8x16x16xf32> to vector<8x16xf32>
    %114 = vector.shape_cast %113 : vector<8x16xf32> to vector<8x16x1xf32>
    %115 = tpu.reciprocal %114 {approx = true} : vector<8x16x1xf32> -> vector<8x16x1xf32>
    %116 = vector.broadcast %115 : vector<8x16x1xf32> to vector<8x16x16xf32>
    %117 = arith.mulf %112, %116 : vector<8x16x16xf32>
    "tpu.trace_start"() <{level = 10 : i32, message = "tqk,tkc->tqc"}> : () -> ()
    %cst_44 = arith.constant dense<0.000000e+00> : vector<8x16x32xf32>
    %118 = tpu.matmul %117, %99, %cst_44 {dimension_numbers = #tpu.dot_dimension_numbers<[2], [1], [1], [2], [0, 0, 0, 1, 1, 2], [0], [0]>} : vector<8x16x16xf32>, vector<8x16x32xf32>, vector<8x16x32xf32> -> vector<8x16x32xf32>
    "tpu.trace_stop"() : () -> ()
    %119 = vector.shape_cast %118 : vector<8x16x32xf32> to vector<128x32xf32>
    %120 = tpu.concatenate %41, %67, %93, %119 in 1 : vector<128x32xf32>, vector<128x32xf32>, vector<128x32xf32>, vector<128x32xf32> -> vector<128x128xf32>
    %121 = arith.mulf %120, %15 : vector<128x128xf32>
    %c0_45 = arith.constant 0 : index
    %c0_46 = arith.constant 0 : index
    %122 = vector.load %arg7[%c0_45, %c0_46] : memref<128x32xf32, #tpu.memory_space<vmem>>, vector<128x32xf32>
    %cst_47 = arith.constant dense<0.000000e+00> : vector<128x32xf32>
    %123 = tpu.matmul %121, %122, %cst_47 {dimension_numbers = #tpu.dot_dimension_numbers<[1], [0], [0], [1], [0, 0, 1, 1], [], []>} : vector<128x128xf32>, vector<128x32xf32>, vector<128x32xf32> -> vector<128x32xf32>
    %124 = vector.shape_cast %123 : vector<128x32xf32> to vector<8x16x32xf32>
    %125 = arith.addf %1, %124 : vector<8x16x32xf32>
    %c0_48 = arith.constant 0 : index
    %c0_49 = arith.constant 0 : index
    %126 = vector.load %arg8[%c0_48, %c0_49] : memref<1x32xf32, #tpu.memory_space<vmem>>, vector<1x32xf32>
    %127 = vector.shape_cast %126 : vector<1x32xf32> to vector<1x1x32xf32>
    %128 = vector.broadcast %127 : vector<1x1x32xf32> to vector<8x16x32xf32>
    %129 = arith.addf %125, %128 : vector<8x16x32xf32>
    %c0_50 = arith.constant 0 : index
    %c0_51 = arith.constant 0 : index
    %c0_52 = arith.constant 0 : index
    %c0_53 = arith.constant 0 : index
    %130 = vector.load %arg9[%c0_50, %c0_51, %c0_52, %c0_53] : memref<1x8x16x32xf32, #tpu.memory_space<vmem>>, vector<1x8x16x32xf32>
    %131 = vector.shape_cast %130 : vector<1x8x16x32xf32> to vector<8x16x32xf32>
    %132 = vector.shape_cast %129 : vector<8x16x32xf32> to vector<1x8x16x32xf32>
    tpu.vector_store %arg9[%c0_50, %c0_51, %c0_52, %c0_53], %132 {strides = array<i32>} : memref<1x8x16x32xf32, #tpu.memory_space<vmem>>, vector<1x8x16x32xf32>,
    return
  }
  func.func @transform_0(%arg0: i32, %arg1: i32) -> (i32, i32, i32, i32) {
    %c0_i32 = arith.constant 0 : i32
    %c0_i32_0 = arith.constant 0 : i32
    %c0_i32_1 = arith.constant 0 : i32
    return %arg0, %arg1, %c0_i32, %c0_i32_0 : i32, i32, i32, i32
  }
  func.func @transform_1(%arg0: i32, %arg1: i32) -> (i32, i32, i32, i32) {
    %c0_i32 = arith.constant 0 : i32
    %c0_i32_0 = arith.constant 0 : i32
    %c0_i32_1 = arith.constant 0 : i32
    return %arg0, %arg1, %c0_i32, %c0_i32_0 : i32, i32, i32, i32
  }
  func.func @transform_2(%arg0: i32, %arg1: i32) -> (i32, i32, i32, i32) {
    %c0_i32 = arith.constant 0 : i32
    %c0_i32_0 = arith.constant 0 : i32
    %c0_i32_1 = arith.constant 0 : i32
    %c0_i32_2 = arith.constant 0 : i32
    return %arg0, %c0_i32, %c0_i32_0, %c0_i32_1 : i32, i32, i32, i32
  }
  func.func @transform_3(%arg0: i32, %arg1: i32) -> (i32, i32) {
    %c0_i32 = arith.constant 0 : i32
    %c0_i32_0 = arith.constant 0 : i32
    %c0_i32_1 = arith.constant 0 : i32
    return %c0_i32, %c0_i32_0 : i32, i32
  }
  func.func @transform_4(%arg0: i32, %arg1: i32) -> (i32, i32) {
    %c0_i32 = arith.constant 0 : i32
    %c0_i32_0 = arith.constant 0 : i32
    %c0_i32_1 = arith.constant 0 : i32
    return %c0_i32, %c0_i32_0 : i32, i32
  }
  func.func @transform_5(%arg0: i32, %arg1: i32) -> (i32, i32) {
    %c0_i32 = arith.constant 0 : i32
    %c0_i32_0 = arith.constant 0 : i32
    %c0_i32_1 = arith.constant 0 : i32
    return %c0_i32, %c0_i32_0 : i32, i32
  }
  func.func @transform_6(%arg0: i32, %arg1: i32) -> (i32, i32) {
    %c0_i32 = arith.constant 0 : i32
    %c0_i32_0 = arith.constant 0 : i32
    %c0_i32_1 = arith.constant 0 : i32
    return %c0_i32, %c0_i32_0 : i32, i32
  }
  func.func @transform_7(%arg0: i32, %arg1: i32) -> (i32, i32, i32, i32) {
    %c0_i32 = arith.constant 0 : i32
    %c0_i32_0 = arith.constant 0 : i32
    %c0_i32_1 = arith.constant 0 : i32
    return %arg0, %arg1, %c0_i32, %c0_i32_0 : i32, i32, i32, i32
  }
}

</mosaic_0001>

<bundles_post_ra>
// kernel: tpu_custom_call.1
= control target key start
LH: loop header
LB: loop body
LE: loop exit
PB: predicated region body
PF: predicated region fallthrough
CT: control target
= control target key end

     0   :  { %s12431_s0 = inlined_call_operand.hbm [shape: f32[2,16,16,32], index: 0, kind: input, shape index: {}]   ;;  %s12432_s1 = inlined_call_operand.hbm [shape: f32[2,16,16,32], index: 1, kind: input, shape index: {}]   ;;  %s12433_s2 = inlined_call_operand.vmem [shape: f32[2,4,16,16], index: 2, kind: input, shape index: {}]   ;;  %s12434_s3 = inlined_call_operand.hbm [shape: f32[32,512], index: 3, kind: input, shape index: {}]   ;;  %s12435_s4 = inlined_call_operand.vmem [shape: f32[1,128], index: 4, kind: input, shape index: {}]   ;;  %s12436_s5 = inlined_call_operand.vmem [shape: f32[128,32], index: 5, kind: input, shape index: {}]   ;;  %s12437_s6 = inlined_call_operand.vmem [shape: f32[1,32], index: 6, kind: input, shape index: {}]   ;;  %s12438_s7 = inlined_call_operand.hbm [shape: f32[2,16,16,32], index: 7, kind: output, shape index: {}]  }
   0x1   :  { %12525 = sst [smem:[#allocation99_spill]] %s12431_s0 }
   0x2   :  { %12526 = sst [smem:[#allocation100_spill]] %s12434_s3 }
   0x3   :  { %12527 = sst [smem:[#allocation101_spill]] %s12438_s7 }
   0x4   :  { %12 = vsyncpa [#allocation3], 0 }
   0x5   :  { %14 = vsyncpa [#allocation3 + $0x1], 0 }
   0x6   :  { %15 = vsyncpa [#allocation6], 0 }
   0x7   :  { %17 = vsyncpa [#allocation6 + $0x1], 0 }
   0x8   :  { %18 = vsyncpa [#allocation4], 0 }
   0x9   :  { %20 = vsyncpa [#allocation4 + $0x1], 0  ;;  %s9787_s24 = smov 0   ;;  %s9789_s25 = smov 0  }
   0xa   :  { %s9791_s26 = smov 0   ;;  %s9793_s27 = smov 0  }
   0xb   :  { %s9795_s28 = smov 0   ;;  %s9797_s29 = smov 0  }
   0xc   :  { %s9799_s30 = smov 0   ;;  %s9801_s8 = smov 0  }
   0xd LB: > { %12528 = sst [smem:[#allocation13_spill]] %s9703_s24  ;;  %s9828_s9 = sadd.s32 4294967295, %s9731_s8   ;;  %s9731_s8 = sphi %s9801_s8, %s26_s8   ;;  %s9727_s30 = sphi %s9799_s30, %s12798_s30   ;;  %s9723_s29 = sphi %s9797_s29, %s12792_s29   ;;  %s9719_s28 = sphi %s9795_s28, %s12797_s28   ;;  %s9715_s27 = sphi %s9793_s27, %s12790_s27   ;;  %s9711_s26 = sphi %s9791_s26, %s12796_s26   ;;  %s9707_s25 = sphi %s9789_s25, %s12795_s25   ;;  %s9703_s24 = sphi %s9787_s24, %s12794_s24  }
   0xe   : > { %12529 = sst [smem:[#allocation14_spill]] %s9715_s27  ;;  %s8041_s10 = sadd.s32 4294967294, %s9731_s8  }
   0xf   : > { %12530 = sst [smem:[#allocation15_spill]] %s9723_s29  ;;  %p60_p0 = scmp.ne.s32.totalorder %s9707_s25, %s9703_s24 }
  0x10   : > { %12531 = sst [smem:[#allocation16_spill]] %s9727_s30  ;;  %p61_p1 = scmp.eq.s32.totalorder %s9828_s9, 0 }
  0x11   : > { %p230_p3 = scmp.eq.s32.totalorder %s8041_s10, 3  ;;  %p8042_p5 = scmp.ge.s32.totalorder %s9731_s8, 1 }
  0x12   : > { %p9837_p4 = por %p61_p1, %p60_p0  ;;  %p237_p7 = scmp.lt.s32.totalorder %s9731_s8, 5 }
  0x13   : > { %p9842_p6 = por %p230_p3, %p60_p0  ;;  %s9733_s14 = smov [#allocation7]  }
  0x14   : > { %p9847_p8 = pnand %p8042_p5, %p237_p7  ;;  %s249_s15 = sshll.u32 %s9733_s14, 4  ;;  %s250_s15 = int_to_ptr.vmem [resolvable:$true] %s249_s15 }
  0x15   : > { %s12533_s12 = scalar_select %p9842_p6, 1, 0 }
  0x16   : > { %p9131_p9 = pneg %p9847_p8  ;;  %s9556_s16 = scalar_lea.vmem %s250_s15, 2048 }
  0x17   : > { %12534 = sst [smem:[#allocation17_spill]] %s12533_s12  ;;  %p9557_p12 = scmp.ne.s32.totalorder %s250_s15, %s9556_s16 }
  0x18   : > { %p9132_p10 = pnand %p9131_p9, %p61_p1  ;;  %p9564_p3 = scmp.lt.s32.totalorder %s250_s15, %s250_s15 }
  0x19   : > { %p9565_p2 = scmp.lt.s32.totalorder %s9556_s16, %s9556_s16 }
  0x1a   : > { %p9547_p11 = pneg %p9132_p10 }
  0x1b   : > { %p9566_p6 = por %p9565_p2, %p9564_p3 }
  0x1c   : > { %p9559_p13 = pnand %p9557_p12, %p9547_p11 }
  0x1e   : > { %p9560_p0 = pneg %p9559_p13 }
  0x20   : > { %p9567_p5 = pnand %p9566_p6, %p9560_p0 }
  0x22   : > { %9570 = shalt.err (!%p9567_p5)
}
  0x23   : > { %s9734_s17 = smov 512   ;;  %s9735_s18 = smov 32  }
  0x24   : > { %s12536_s3 = sld [smem:[#allocation100_spill]]  ;;  %s35_s21 = sadd.s32 1, %s9723_s29 }
  0x25   : > { %p36_p2 = scmp.ge.s32.totalorder %s35_s21, 2  ;;  %s38_s22 = sadd.s32 1, %s9727_s30 }
  0x26   : > { %s47_s23 = sadd.s32 1, %s9711_s26  ;;  %p54_p6 = scmp.ne.s32.totalorder %s9711_s26, %s9707_s25 }
  0x27   : > { %s12800_s21 = smov (%p36_p2, %s35_s21), 0  ;;  %s12802_s22 = smov (!%p36_p2, %s38_s22), %s9727_s30 }
  0x28   : > { %12537 = sst [smem:[#allocation18_spill]] %s12800_s21  ;;  %s43_s10 = ssub.s32 %s9723_s29, %s12800_s21 }
  0x29   : > { %p55_p7 = scmp.eq.s32.totalorder %s9731_s8, 0  ;;  %p40_p9 = scmp.ge.s32.totalorder %s12802_s22, 2 }
  0x2a   : > { %9134 = dma.hbm_to_vmem [thread:$0]  (!%p9132_p10), %s12536_s3, 2048, %s250_s15, [#allocation6], %s9734_s17, %s9734_s17, %s9735_s18  }
  0x2b   : > { %p12538_p11 = scmp.eq.s32.totalorder %s9828_s9, 3  ;;  %p9875_p10 = por %p55_p7, %p54_p6 }
  0x2c   : > { %p9147_p13 = scmp.lt.s32.totalorder %s9731_s8, 4  ;;  %s12804_s22 = smov (%p40_p9, %s12802_s22), 0 }
  0x2d   : > { %p9871_p12 = por %p12538_p11, %p54_p6  ;;  %12542 = sst [smem:[#allocation20_spill]] %s12804_s22 }
  0x2e   : > { %s272_s16 = sand.u32 1, %s9711_s26   ;;  %s8317_s17 = sshll.u32 %s9723_s29, 4 }
  0x2f   : > { %s12539_s14 = scalar_select %p9871_p12, 1, 0 }
  0x30   : > { %s42_s18 = ssub.s32 %s9727_s30, %s12804_s22  ;;  %s9886_s20 = sshll.u32 %s272_s16, 7 }
  0x31   : > { %12540 = sst [smem:[#allocation19_spill]] %s12539_s14  ;;  %s44_s19 = sor.u32 %s43_s10, %s42_s18 }
  0x32   : > { %p45_p0 = scmp.eq.s32.totalorder %s44_s19, 0  ;;  %s8048_s3 = sshll.u32 %s9727_s30, 5 }
  0x33   : > { %s276_s21 = scalar_lea.vmem [#allocation2], %s9886_s20  ;;  %s283_s7 = sadd.s32 %s8317_s17, %s8048_s3 }
  0x34   : > { %s286_s12 = sshll.u32 %s276_s21, 4  ;;  %s8049_s14 = sshll.u32 %s283_s7, 7  ;;  %s287_s12 = int_to_ptr.vmem [resolvable:$true] %s286_s12 }
  0x35   : > { %s9891_s24 = scalar_select %p45_p0, %s9711_s26, %s47_s23  }
  0x36   : > { %p9897_p3 = pnand %p9147_p13, %p9875_p10  ;;  %s12545_s0 = sld [smem:[#allocation99_spill]] }
  0x37   : > { %12543 = sst [smem:[#allocation21_spill]] %s9891_s24  ;;  %s273_s19 = scalar_lea.sflag [#allocation3], %s272_s16 }
  0x38   : > { %p9573_p5 = pneg %p9897_p3  ;;  %s9584_s21 = scalar_lea.vmem %s287_s12, 2048 }
  0x39   : > { %p9585_p2 = scmp.ne.s32.totalorder %s287_s12, %s9584_s21  ;;  %s9736_s3 = smov [#allocation2]  }
  0x3a   : > { %s9589_s7 = sshll.u32 %s9736_s3, 4  ;;  %s9590_s7 = int_to_ptr.vmem [resolvable:$false] %s9589_s7 }
  0x3b   : > { %p9587_p6 = pnand %p9585_p2, %p9573_p5  ;;  %s9591_s23 = scalar_lea.vmem %s9590_s7, 4096 }
  0x3c   : > { %s285_s18 = scalar_lea.hbm %s12545_s0, %s8049_s14  ;;  %p9592_p9 = scmp.lt.s32.totalorder %s287_s12, %s9590_s7 }
  0x3d   : > { %p9588_p7 = pneg %p9587_p6  ;;  %p9593_p11 = scmp.lt.s32.totalorder %s9591_s23, %s9584_s21 }
  0x3f   : > { %p9594_p10 = por %p9593_p11, %p9592_p9 }
  0x41   : > { %p9595_p13 = pnand %p9594_p10, %p9588_p7 }
  0x43   : > { %9598 = shalt.err (!%p9595_p13)
}
  0x44   : > { %s9737_s22 = smov 128   ;;  %s9738_s15 = smov 8  }
  0x45   : > { %9138 = dma.hbm_to_vmem [thread:$0]  (!%p9897_p3), %s285_s18, 2048, %s287_s12, %s273_s19, %s9737_s22, %s9737_s22, %s9738_s15  }
  0x46   : > { %s309_s10 = scalar_lea.hbm %s12432_s1, %s8049_s14  ;;  %s300_s3 = scalar_lea.vmem [#allocation5], %s9886_s20 }
  0x47   : > { %s310_s0 = sshll.u32 %s300_s3, 4  ;;  %s296_s30 = sand.u32 1, %s9731_s8   ;;  %s311_s0 = int_to_ptr.vmem [resolvable:$true] %s310_s0 }
  0x48   : > { %s297_s21 = scalar_lea.sflag [#allocation6], %s296_s30  ;;  %s9612_s7 = scalar_lea.vmem %s311_s0, 2048 }
  0x49   : > { %p9613_p0 = scmp.ne.s32.totalorder %s311_s0, %s9612_s7  ;;  %s9739_s23 = smov [#allocation5]  }
  0x4a   : > { %s9617_s29 = sshll.u32 %s9739_s23, 4  ;;  %s9618_s29 = int_to_ptr.vmem [resolvable:$false] %s9617_s29 }
  0x4b   : > { %p9615_p2 = pnand %p9613_p0, %p9573_p5  ;;  %s9619_s24 = scalar_lea.vmem %s9618_s29, 4096 }
  0x4c   : > { %p9620_p7 = scmp.lt.s32.totalorder %s311_s0, %s9618_s29  ;;  %p9621_p9 = scmp.lt.s32.totalorder %s9619_s24, %s9612_s7 }
  0x4d   : > { %p9616_p6 = pneg %p9615_p2 }
  0x4e   : > { %p9622_p11 = por %p9621_p9, %p9620_p7 }
  0x50   : > { %p9623_p10 = pnand %p9622_p11, %p9616_p6 }
  0x52   : > { %9626 = shalt.err (!%p9623_p10)
}
  0x53   : > { %9141 = dma.hbm_to_vmem [thread:$0]  (!%p9897_p3), %s309_s10, 2048, %s311_s0, %s297_s21, %s9737_s22, %s9737_s22, %s9738_s15  }
  0x54   : > { %330 = sbr.rel (%p9847_p8) target bundleno = 3040 (0xbe0), region = 48 }
  0x59   : > { %s9924_s30 = sand.u32 1, %s9707_s25  }
  0x5a   : > { %s9927_s12 = sshll.u32 %s9924_s30, 7  ;;  %s333_s29 = scalar_lea.sflag [#allocation3], %s9924_s30 }
  0x5b   : > { %s9931_s24 = scalar_lea.vmem [#allocation2], %s9927_s12 }
  0x5c   : > { %9686 = dma.done.wait (%p9837_p4), %s333_s29, 2048  }
  0x5d   : > { %9688 = vsyncadd (%p9837_p4), %s333_s29, 4294965248  ;;  %s341_s0 = sand.u32 1, %s9828_s9   ;;  %s9939_s13 = scalar_lea.vmem [#allocation5], %s9927_s12 }
  0x5e   : > { %s342_s27 = scalar_lea.sflag [#allocation6], %s341_s0 }
  0x5f   : > { %9690 = dma.done.wait (%p9837_p4), %s342_s27, 2048  }
  0x60   : > { %9692 = vsyncadd (%p9837_p4), %s342_s27, 4294965248 }
  0x61   : > { %9694 = dma.done.wait (%p61_p1), [#allocation6], 2048  }
  0x62   : > { %9696 = vsyncadd (%p61_p1), [#allocation6], 4294965248  ;;  %v9740_v0 = vmov 0.0   ;;  %v443_v1 = vld [vmem:[#allocation7 + $0x68] sm:$0xff]  ;;  %v442_v2 = vld [vmem:[#allocation7 + $0x60] sm:$0xff]  ;;  %vm446_vm0 = vcmask 261120  }
  0x63   : > { %559 = vmatprep.mubr.f32.mxu0 %v9740_v0  ;;  %613 = vmatprep.mubr.f32.mxu1 %v9740_v0  ;;  %v439_v3 = vld [vmem:[#allocation7 + $0x48] sm:$0xff]  ;;  %v438_v4 = vld [vmem:[#allocation7 + $0x40] sm:$0xff]  ;;  %v445_v11 = vld [vmem:[#allocation7 + $0x78] sm:$0xff]  ;;  %s9741_s9 = smov 96   ;;  %p392_p1 = scmp.lt.s32.totalorder %s9719_s28, 1  ;;  %vm1666_vm1 = vcmask 130048  }
  0x64   : > { %519 = vmatprep.subr.mxu0 %v443_v1  ;;  %9113 = vmatprep.subr.mxu1 %v443_v1  ;;  %v435_v5 = vld [vmem:[#allocation7 + $0x28] sm:$0xff]  ;;  %v434_v6 = vld [vmem:[#allocation7 + $0x20] sm:$0xff]  ;;  %v444_v12 = vld [vmem:[#allocation7 + $0x70] sm:$0xff]  ;;  %s9742_s22 = smov 64   ;;  %s9743_s15 = smov 32   ;;  %vm7620_vm2 = vcmask 523264  }
  0x65   : > { %520 = vmatpush1.msra.mxu0 %v442_v2  ;;  %9117 = vmatpush1.msra.mxu1 %v442_v2  ;;  %v431_v7 = vld [vmem:[#allocation7 + $0x8] sm:$0xff]  ;;  %v430_v8 = vld [vmem:[#allocation7] sm:$0xff]  ;;  %v9965_v14 = vld [vmem:[%s9939_s13 + $0x50] sm:$0xff]  ;;  %s393_s11 = scalar_select %p392_p1, %s9719_s28, 1  ;;  %vm7637_vm3 = vcmask 785408  }
  0x66   : > { %521 = vmatprep.subr.mxu0 %v439_v3  ;;  %9114 = vmatprep.subr.mxu1 %v439_v3  ;;  %v9952_v9 = vld [vmem:[%s9939_s13] sm:$0xff]  ;;  %v9955_v10 = vld [vmem:[%s9939_s13 + $0x48] sm:$0xff]  ;;  %v441_v15 = vld [vmem:[#allocation7 + $0x58] sm:$0xff]  ;;  %s8313_s17 = sshll.u32 %s9719_s28, 5  ;;  %s12784_s29 = sld [smem:[#allocation101_spill]] }
  0x67   : > { %522 = vmatpush1.msra.mxu0 %v438_v4  ;;  %9118 = vmatpush1.msra.mxu1 %v438_v4  ;;  %v415_v13 = vld [vmem:[%s9939_s13 + $0x8] sm:$0xff]  ;;  %v440_v16 = vld [vmem:[#allocation7 + $0x50] sm:$0xff]  ;;  %v9974_v18 = vld [vmem:[%s9939_s13 + $0x58] sm:$0xff]  ;;  %s8319_s14 = sshll.u32 %s393_s11, 6  ;;  %s9744_s11 = smov [#allocation8]  }
  0x68   : > { %523 = vmatprep.subr.mxu0 %v435_v5  ;;  %9115 = vmatprep.subr.mxu1 %v435_v5  ;;  %v416_v17 = vld [vmem:[%s9939_s13 + $0x10] sm:$0xff]  ;;  %v437_v19 = vld [vmem:[#allocation7 + $0x38] sm:$0xff]  ;;  %v426_v22 = vld [vmem:[%s9939_s13 + $0x60] sm:$0xff]  ;;  %s10300_s19 = scalar_lea.vmem %s12433_s2, %s8319_s14  ;;  %s9631_s14 = sshll.u32 %s9744_s11, 4  ;;  %s9632_s14 = int_to_ptr.vmem [resolvable:$false] %s9631_s14 }
  0x69   : > { %524 = vmatpush1.msra.mxu0 %v434_v6  ;;  %9119 = vmatpush1.msra.mxu1 %v434_v6  ;;  %v436_v20 = vld [vmem:[#allocation7 + $0x30] sm:$0xff]  ;;  %v417_v21 = vld [vmem:[%s9939_s13 + $0x18] sm:$0xff]  ;;  %v418_v25 = vld [vmem:[%s9939_s13 + $0x20] sm:$0xff]  ;;  %s9633_s20 = scalar_lea.vmem %s9632_s14, 4096 }
  0x6a   : > { %525 = vmatprep.subr.mxu0 %v431_v7  ;;  %9116 = vmatprep.subr.mxu1 %v431_v7  ;;  %v433_v23 = vld [vmem:[#allocation7 + $0x18] sm:$0xff]  ;;  %v432_v24 = vld [vmem:[#allocation7 + $0x10] sm:$0xff]  ;;  %v427_v26 = vld [vmem:[%s9939_s13 + $0x68] sm:$0xff] }
  0x6b   : > { %526 = vmatpush1.msra.mxu0 %v430_v8  ;;  %9120 = vmatpush1.msra.mxu1 %v430_v8  ;;  %v419_v27 = vld [vmem:[%s9939_s13 + $0x28] sm:$0xff]  ;;  %v428_v28 = vld [vmem:[%s9939_s13 + $0x70] sm:$0xff]  ;;  %v429_v30 = vld [vmem:[%s9939_s13 + $0x78] sm:$0xff] }
  0x6c   : > { %8062 = vmatmul.mubr.msk.f32.vlgmr.msra.gmra.mxu0 %vm446_vm0, %v9952_v9  ;;  %8071 = vmatmul.mubr.msk.f32.vlgmr.msra.gmra.mxu1 %vm446_vm0, %v9955_v10  ;;  %v420_v29 = vld [vmem:[%s9939_s13 + $0x30] sm:$0xff]  ;;  %v421_v31 = vld [vmem:[%s9939_s13 + $0x38] sm:$0xff]  ;;  %v422_v32 = vld [vmem:[%s9939_s13 + $0x40] sm:$0xff]  ;;  %s12785_s0 = smov %s12784_s29 }
  0x6d   : > { %565 = vmatprep.mubr.f32.mxu0 %v9740_v0  ;;  %619 = vmatprep.mubr.f32.mxu1 %v9740_v0 }
  0x6e   : > { %680 = vmatprep.subr.mxu1 %v445_v11 }
  0x6f   : > { %681 = vmatpush1.msra.mxu1 %v444_v12 }
  0x70   : > { %8063 = vmatmul.mubr.msk.f32.gmra.mxu0 %vm446_vm0, %v415_v13  ;;  %8072 = vmatmul.mubr.msk.f32.gmra.mxu1 %vm446_vm0, %v9965_v14 }
  0x71   : > { %571 = vmatprep.mubr.f32.mxu0 %v9740_v0  ;;  %625 = vmatprep.mubr.f32.mxu1 %v9740_v0 }
  0x72   : > { %682 = vmatprep.subr.mxu1 %v441_v15 }
  0x73   : > { %683 = vmatpush1.msra.mxu1 %v440_v16 }
  0x74   : > { %8064 = vmatmul.mubr.msk.f32.gmra.mxu0 %vm446_vm0, %v416_v17  ;;  %8073 = vmatmul.mubr.msk.f32.gmra.mxu1 %vm446_vm0, %v9974_v18 }
  0x75   : > { %577 = vmatprep.mubr.f32.mxu0 %v9740_v0  ;;  %631 = vmatprep.mubr.f32.mxu1 %v9740_v0 }
  0x76   : > { %684 = vmatprep.subr.mxu1 %v437_v19 }
  0x77   : > { %685 = vmatpush1.msra.mxu1 %v436_v20 }
  0x78   : > { %8065 = vmatmul.mubr.msk.f32.gmra.mxu0 %vm446_vm0, %v417_v21  ;;  %8074 = vmatmul.mubr.msk.f32.gmra.mxu1 %vm446_vm0, %v426_v22 }
  0x79   : > { %583 = vmatprep.mubr.f32.mxu0 %v9740_v0  ;;  %637 = vmatprep.mubr.f32.mxu1 %v9740_v0 }
  0x7a   : > { %686 = vmatprep.subr.mxu1 %v433_v23 }
  0x7b   : > { %687 = vmatpush1.msra.mxu1 %v432_v24 }
  0x7c   : > { %8066 = vmatmul.mubr.msk.f32.gmra.mxu0 %vm446_vm0, %v418_v25  ;;  %8075 = vmatmul.mubr.msk.f32.gmra.mxu1 %vm446_vm0, %v427_v26 }
  0x7d   : > { %589 = vmatprep.mubr.f32.mxu0 %v9740_v0  ;;  %643 = vmatprep.mubr.f32.mxu1 %v9740_v0 }
  0x80   : > { %8067 = vmatmul.mubr.msk.f32.gmra.mxu0 %vm446_vm0, %v419_v27  ;;  %8076 = vmatmul.mubr.msk.f32.gmra.mxu1 %vm446_vm0, %v428_v28 }
  0x81   : > { %595 = vmatprep.mubr.f32.mxu0 %v9740_v0  ;;  %649 = vmatprep.mubr.f32.mxu1 %v9740_v0 }
  0x84   : > { %8068 = vmatmul.mubr.msk.f32.gmra.mxu0 %vm446_vm0, %v420_v29  ;;  %8077 = vmatmul.mubr.msk.f32.gmra.mxu1 %vm446_vm0, %v429_v30 }
  0x85   : > { %601 = vmatprep.mubr.f32.mxu0 %v9740_v0  ;;  %720 = vmatprep.mubr.f32.mxu1 %v9740_v0 }
  0x88   : > { %8069 = vmatmul.mubr.msk.f32.gmra.mxu0 %vm446_vm0, %v421_v31  ;;  %8078 = vmatmul.mubr.msk.f32.vlgmr.msra.gmra.mxu1 %vm446_vm0, %v9952_v9 }
  0x89   : > { %607 = vmatprep.mubr.f32.mxu0 %v9740_v0  ;;  %726 = vmatprep.mubr.f32.mxu1 %v9740_v0 }
  0x8c   : > { %8070 = vmatmul.mubr.msk.f32.gmra.mxu0 %vm446_vm0, %v422_v32  ;;  %8079 = vmatmul.mubr.msk.f32.gmra.mxu1 %vm446_vm0, %v415_v13 }
  0x8d   : > { %732 = vmatprep.mubr.f32.mxu1 %v9740_v0 }
  0x90   : > { %8080 = vmatmul.mubr.msk.f32.gmra.mxu1 %vm446_vm0, %v416_v17 }
  0x91   : > { %738 = vmatprep.mubr.f32.mxu1 %v9740_v0 }
  0x94   : > { %8081 = vmatmul.mubr.msk.f32.gmra.mxu1 %vm446_vm0, %v417_v21 }
  0x95   : > { %744 = vmatprep.mubr.f32.mxu1 %v9740_v0 }
  0x98   : > { %8082 = vmatmul.mubr.msk.f32.gmra.mxu1 %vm446_vm0, %v418_v25 }
  0x99   : > { %750 = vmatprep.mubr.f32.mxu1 %v9740_v0 }
  0x9c   : > { %8083 = vmatmul.mubr.msk.f32.gmra.mxu1 %vm446_vm0, %v419_v27 }
  0x9d   : > { %756 = vmatprep.mubr.f32.mxu1 %v9740_v0 }
  0xa0   : > { %8084 = vmatmul.mubr.msk.f32.gmra.mxu1 %vm446_vm0, %v420_v29 }
  0xa1   : > { %762 = vmatprep.mubr.f32.mxu1 %v9740_v0 }
  0xa4   : > { %8085 = vmatmul.mubr.msk.f32.gmra.mxu1 %vm446_vm0, %v421_v31 }
  0xa5   : > { %768 = vmatprep.mubr.f32.mxu1 %v9740_v0 }
  0xa8   : > { %8086 = vmatmul.mubr.msk.f32.gmra.mxu1 %vm446_vm0, %v422_v32  ;;  %v10303_v32 = vld [vmem:[%s10300_s19 + $0x8] sm:$0xff] }
  0xa9   : > { %774 = vmatprep.mubr.f32.mxu1 %v9740_v0 }
  0xac   : > { %8087 = vmatmul.mubr.msk.f32.gmra.mxu1 %vm446_vm0, %v9955_v10 }
  0xad   : > { %780 = vmatprep.mubr.f32.mxu1 %v9740_v0 }
  0xb0   : > { %8088 = vmatmul.mubr.msk.f32.gmra.mxu1 %vm446_vm0, %v9965_v14 }
  0xb1   : > { %786 = vmatprep.mubr.f32.mxu1 %v9740_v0 }
  0xb4   : > { %8089 = vmatmul.mubr.msk.f32.gmra.mxu1 %vm446_vm0, %v9974_v18 }
  0xb5   : > { %792 = vmatprep.mubr.f32.mxu1 %v9740_v0 }
  0xb8   : > { %8090 = vmatmul.mubr.msk.f32.gmra.mxu1 %vm446_vm0, %v426_v22 }
  0xb9   : > { %798 = vmatprep.mubr.f32.mxu1 %v9740_v0 }
  0xbc   : > { %8091 = vmatmul.mubr.msk.f32.gmra.mxu1 %vm446_vm0, %v427_v26 }
  0xbd   : > { %804 = vmatprep.mubr.f32.mxu1 %v9740_v0 }
  0xc0   : > { %8092 = vmatmul.mubr.msk.f32.gmra.mxu1 %vm446_vm0, %v428_v28 }
  0xc1   : > { %810 = vmatprep.mubr.f32.mxu1 %v9740_v0 }
  0xc4   : > { %8093 = vmatmul.mubr.msk.f32.gmra.mxu1 %vm446_vm0, %v429_v30 }
 0x12c   : > { %v10045_v33 = vpop.f32.mrf.mxu0  ;;  %v10047_v34 = vpop.f32.mrf.mxu1 }
 0x12d   : > { %12546 = vst [vmem:[#allocation22_spill] sm:$0xff] %v10045_v33  ;;  %2491 = vrot.lane.b32.xlu1 %v10045_v33, %s9741_s9  ;;  %8613 = vmatprep.mubr.msk.f32.mxu0 %vm446_vm0, %v10045_v33 }
 0x12e   : > { %v10053_v35 = vpop.f32.mrf.mxu0  ;;  %v10055_v36 = vpop.f32.mrf.mxu1 }
 0x12f   : > { %12547 = vst [vmem:[#allocation23_spill] sm:$0xff] %v10053_v35  ;;  %12548 = vst [vmem:[#allocation24_spill] sm:$0xff] %v10055_v36 }
 0x130   : > { %v10057_v37 = vpop.f32.mrf.mxu0  ;;  %v10059_v38 = vpop.f32.mrf.mxu1 }
 0x131   : > { %12549 = vst [vmem:[#allocation25_spill] sm:$0xff] %v10057_v37  ;;  %2495 = vrot.lane.b32.xlu1 %v10053_v35, %s9741_s9  ;;  %2493 = vrot.lane.b32.xlu0 %v10057_v37, %s9741_s9 }
 0x132   : > { %v10065_v39 = vpop.f32.mrf.mxu0  ;;  %v10067_v40 = vpop.f32.mrf.mxu1 }
 0x133   : > { %12550 = vst [vmem:[#allocation26_spill] sm:$0xff] %v10065_v39  ;;  %8609 = vmatprep.subr.msk.mxu0 %vm446_vm0, %v10065_v39 }
 0x134   : > { %v10071_v41 = vpop.f32.mrf.mxu0  ;;  %8610 = vmatpush3.xpose.msk.msra.mxu0 %vm446_vm0, %v10065_v39  ;;  %v10075_v42 = vpop.f32.mrf.mxu1 }
 0x135   : > { %12551 = vst [vmem:[#allocation27_spill] sm:$0xff] %v10071_v41  ;;  %2497 = vrot.lane.b32.xlu0 %v10065_v39, %s9741_s9  ;;  %8611 = vmatprep.subr.msk.mxu0 %vm446_vm0, %v10053_v35 }
 0x136   : > { %2582 = vrot.lane.b32.xlu1 %v10071_v41, %s9741_s9  ;;  %8620 = vmatprep.mubr.msk.f32.mxu1 %vm446_vm0, %v10071_v41  ;;  %v10085_v43 = vpop.f32.mrf.mxu0  ;;  %v10087_v44 = vpop.f32.mrf.mxu1 }
 0x137   : > { %12552 = vst [vmem:[#allocation28_spill] sm:$0xff] %v10085_v43 }
 0x138   : > { %v10089_v45 = vpop.f32.mrf.mxu0  ;;  %8612 = vmatpush3.xpose.msk.msra.mxu0 %vm446_vm0, %v10053_v35  ;;  %v10093_v46 = vpop.f32.mrf.mxu1 }
 0x139   : > { %12553 = vst [vmem:[#allocation29_spill] sm:$0xff] %v10089_v45  ;;  %2586 = vrot.lane.b32.xlu0 %v10085_v43, %s9741_s9 }
 0x13a   : > { %v10097_v47 = vpop.f32.mrf.mxu0  ;;  %v10099_v48 = vpop.f32.mrf.mxu1 }
 0x13b   : > { %12554 = vst [vmem:[#allocation30_spill] sm:$0xff] %v10097_v47  ;;  %8614 = vmatmul.mubr.msk.f32.vlgmr.msra.gmra.mxu0 %vm446_vm0, %v10057_v37  ;;  %2588 = vrot.lane.b32.xlu1 %v10097_v47, %s9741_s9 }
 0x13c   : > { %8616 = vmatprep.subr.msk.mxu1 %vm446_vm0, %v10097_v47  ;;  %v10107_v49 = vpop.f32.mrf.mxu0  ;;  %v10109_v50 = vpop.f32.mrf.mxu1 }
 0x13d   : > { %12555 = vst [vmem:[#allocation31_spill] sm:$0xff] %v10107_v49  ;;  %12556 = vst [vmem:[#allocation32_spill] sm:$0xff] %v10109_v50  ;;  %8617 = vmatpush3.xpose.msk.msra.mxu1 %vm446_vm0, %v10097_v47  ;;  %8627 = vmatprep.mubr.msk.f32.mxu0 %vm446_vm0, %v10107_v49 }
 0x13e   : > { %8618 = vmatprep.subr.msk.mxu1 %vm446_vm0, %v10085_v43  ;;  %v10117_v51 = vpop.f32.mrf.mxu0  ;;  %v10119_v52 = vpop.f32.mrf.mxu1 }
 0x13f   : > { %12557 = vst [vmem:[#allocation33_spill] sm:$0xff] %v10117_v51  ;;  %2677 = vrot.lane.b32.xlu0 %v10117_v51, %s9741_s9 }
 0x140   : > { %v10123_v53 = vpop.f32.mrf.mxu0  ;;  %v10125_v54 = vpop.f32.mrf.mxu1 }
 0x141   : > { %12558 = vst [vmem:[#allocation34_spill] sm:$0xff] %v10123_v53  ;;  %12559 = vst [vmem:[#allocation35_spill] sm:$0xff] %v10125_v54  ;;  %8619 = vmatpush3.xpose.msk.msra.mxu1 %vm446_vm0, %v10085_v43 }
 0x142   : > { %v10129_v55 = vpop.f32.mrf.mxu0  ;;  %v10131_v56 = vpop.f32.mrf.mxu1 }
 0x143   : > { %12560 = vst [vmem:[#allocation36_spill] sm:$0xff] %v10129_v55  ;;  %8623 = vmatprep.subr.msk.mxu0 %vm446_vm0, %v10129_v55  ;;  %2679 = vrot.lane.b32.xlu1 %v10129_v55, %s9741_s9 }
 0x144   : > { %8621 = vmatmul.mubr.msk.f32.vlgmr.msra.gmra.mxu1 %vm446_vm0, %v10089_v45  ;;  %v10139_v57 = vpop.f32.mrf.mxu0  ;;  %8624 = vmatpush3.xpose.msk.msra.mxu0 %vm446_vm0, %v10129_v55  ;;  %v10143_v58 = vpop.f32.mrf.mxu1 }
 0x145   : > { %12561 = vst [vmem:[#allocation37_spill] sm:$0xff] %v10139_v57  ;;  %12562 = vst [vmem:[#allocation38_spill] sm:$0xff] %v10143_v58  ;;  %8625 = vmatprep.subr.msk.mxu0 %vm446_vm0, %v10117_v51  ;;  %8634 = vmatprep.mubr.msk.f32.mxu1 %vm446_vm0, %v10139_v57 }
 0x146   : > { %v10149_v59 = vpop.f32.mrf.mxu0  ;;  %v10151_v60 = vpop.f32.mrf.mxu1 }
 0x147   : > { %12563 = vst [vmem:[#allocation39_spill] sm:$0xff] %v10149_v59 }
 0x148   : > { %v10153_v61 = vpop.f32.mrf.mxu0  ;;  %8626 = vmatpush3.xpose.msk.msra.mxu0 %vm446_vm0, %v10117_v51  ;;  %v10157_v62 = vpop.f32.mrf.mxu1 }
 0x149   : > { %12564 = vst [vmem:[#allocation40_spill] sm:$0xff] %v10157_v62  ;;  %8637 = vmatprep.subr.msk.mxu0 %vm446_vm0, %v10055_v36 }
 0x14a   : > { %v10161_v63 = vpop.f32.mrf.mxu0  ;;  %v10163_v0 = vpop.f32.mrf.mxu1 }
 0x14b   : > { %12565 = vst [vmem:[#allocation41_spill] sm:$0xff] %v10161_v63  ;;  %12566 = vst [vmem:[#allocation42_spill] sm:$0xff] %v10163_v0  ;;  %8628 = vmatmul.mubr.msk.f32.vlgmr.msra.gmra.mxu0 %vm446_vm0, %v10123_v53  ;;  %8630 = vmatprep.subr.msk.mxu1 %vm446_vm0, %v10161_v63 }
 0x14c   : > { %v10169_v1 = vpop.f32.mrf.mxu0  ;;  %8631 = vmatpush3.xpose.msk.msra.mxu1 %vm446_vm0, %v10161_v63  ;;  %8638 = vmatpush3.xpose.msk.msra.mxu0 %vm446_vm0, %v10055_v36  ;;  %v10175_v2 = vpop.f32.mrf.mxu1 }
 0x14d   : > { %12567 = vst [vmem:[#allocation43_spill] sm:$0xff] %v10175_v2  ;;  %8632 = vmatprep.subr.msk.mxu1 %vm446_vm0, %v10149_v59  ;;  %8641 = vmatprep.mubr.msk.f32.mxu0 %vm446_vm0, %v10169_v1 }
 0x14e   : > { %v10181_v3 = vpop.f32.mrf.mxu0  ;;  %2770 = vrot.lane.b32.xlu1 %v10161_v63, %s9741_s9  ;;  %v10185_v4 = vpop.f32.mrf.mxu1 }
 0x14f   : > { %12568 = vst [vmem:[#allocation44_spill] sm:$0xff] %v10185_v4  ;;  %8639 = vmatprep.subr.msk.mxu0 %vm446_vm0, %v10181_v3 }
 0x150   : > { %8633 = vmatpush3.xpose.msk.msra.mxu1 %vm446_vm0, %v10149_v59  ;;  %8640 = vmatpush3.xpose.msk.msra.mxu0 %vm446_vm0, %v10181_v3  ;;  %v10193_v5 = vpop.f32.mrf.mxu1 }
 0x151   : > { %12569 = vst [vmem:[#allocation45_spill] sm:$0xff] %v10193_v5  ;;  %8644 = vmatprep.subr.msk.mxu1 %vm446_vm0, %v10087_v44  ;;  %8651 = vmatprep.subr.msk.mxu0 %vm446_vm0, %v10119_v52 }
 0x152   : > { %v10199_v6 = vpop.f32.mrf.mxu1 }
 0x153   : > { %12570 = vst [vmem:[#allocation46_spill] sm:$0xff] %v10199_v6  ;;  %8635 = vmatmul.mubr.msk.f32.vlgmr.msra.gmra.mxu1 %vm446_vm0, %v10153_v61  ;;  %8642 = vmatmul.mubr.msk.f32.vlgmr.msra.gmra.mxu0 %vm446_vm0, %v10047_v34 }
 0x154   : > { %8645 = vmatpush3.xpose.msk.msra.mxu1 %vm446_vm0, %v10087_v44  ;;  %8652 = vmatpush3.xpose.msk.msra.mxu0 %vm446_vm0, %v10119_v52  ;;  %v10209_v7 = vpop.f32.mrf.mxu1 }
 0x155   : > { %12571 = vst [vmem:[#allocation47_spill] sm:$0xff] %v10209_v7  ;;  %8646 = vmatprep.subr.msk.mxu1 %vm446_vm0, %v10067_v40  ;;  %8653 = vmatprep.subr.msk.mxu0 %vm446_vm0, %v10099_v48 }
 0x156   : > { %8648 = vmatprep.mubr.msk.f32.mxu1 %vm446_vm0, %v10059_v38  ;;  %8655 = vmatprep.mubr.msk.f32.mxu0 %vm446_vm0, %v10093_v46  ;;  %v10219_v8 = vpop.f32.mrf.mxu1 }
 0x157   : > { %12572 = vst [vmem:[#allocation48_spill] sm:$0xff] %v10219_v8 }
 0x158   : > { %8647 = vmatpush3.xpose.msk.msra.mxu1 %vm446_vm0, %v10067_v40  ;;  %8654 = vmatpush3.xpose.msk.msra.mxu0 %vm446_vm0, %v10099_v48  ;;  %v10225_v9 = vpop.f32.mrf.mxu1 }
 0x159   : > { %8658 = vmatprep.subr.msk.mxu1 %vm446_vm0, %v10151_v60  ;;  %8665 = vmatprep.subr.mxu0 %v10175_v2 }
 0x15a   : > { %v10230_v10 = vpop.f32.mrf.mxu1 }
 0x15b   : > { %12573 = vst [vmem:[#allocation49_spill] sm:$0xff] %v10230_v10  ;;  %8649 = vmatmul.mubr.msk.f32.vlgmr.msra.gmra.mxu1 %vm446_vm0, %v10075_v42  ;;  %8656 = vmatmul.mubr.msk.f32.vlgmr.msra.gmra.mxu0 %vm446_vm0, %v10109_v50 }
 0x15c   : > { %8659 = vmatpush3.xpose.msk.msra.mxu1 %vm446_vm0, %v10151_v60  ;;  %8662 = vmatprep.mubr.msk.f32.mxu1 %vm446_vm0, %v10125_v54  ;;  %v10240_v11 = vpop.f32.mrf.mxu1 }
 0x15d   : > { %8660 = vmatprep.subr.msk.mxu1 %vm446_vm0, %v10131_v56  ;;  %8666 = vmatpush3.msra.mxu0 %v10175_v2 }
 0x15e   : > { %v10245_v12 = vpop.f32.mrf.mxu1  ;;  %8667 = vmatprep.subr.mxu0 %v10157_v62 }
 0x15f   : > { %12574 = vst [vmem:[#allocation50_spill] sm:$0xff] %v10245_v12  ;;  %8668 = vmatpush3.msra.mxu0 %v10157_v62 }
 0x160   : > { %8661 = vmatpush3.xpose.msk.msra.mxu1 %vm446_vm0, %v10131_v56  ;;  %v10251_v13 = vpop.f32.mrf.mxu1  ;;  %8679 = vmatprep.subr.mxu0 %v10240_v11 }
 0x161   : > { %12575 = vst [vmem:[#allocation51_spill] sm:$0xff] %v10251_v13  ;;  %8672 = vmatprep.subr.mxu1 %v10209_v7 }
 0x162   : > { %v10255_v14 = vpop.f32.mrf.mxu1 }
 0x163   : > { %12576 = vst [vmem:[#allocation52_spill] sm:$0xff] %v10255_v14  ;;  %8663 = vmatmul.mubr.msk.f32.vlgmr.msra.gmra.mxu1 %vm446_vm0, %v10143_v58 }
 0x164   : > { %8673 = vmatpush3.msra.mxu1 %v10209_v7  ;;  %v10261_v15 = vpop.f32.mrf.mxu1 }
 0x165   : > { %8674 = vmatprep.subr.mxu1 %v10193_v5 }
 0x166   : > { %8675 = vmatpush3.msra.mxu1 %v10193_v5  ;;  %v10265_v16 = vpop.f32.mrf.mxu1 }
 0x167   : > { %8686 = vmatprep.subr.mxu1 %v10261_v15  ;;  %12577 = vst [vmem:[#allocation53_spill] sm:$0xff] %v10265_v16 }
 0x168   : > { %v10267_v17 = vpop.f32.mrf.mxu1 }
 0x169   : > { %12578 = vst [vmem:[#allocation54_spill] sm:$0xff] %v10267_v17 }
 0x16a   : > { %v10269_v18 = vpop.f32.mrf.mxu1 }
 0x16b   : > { %12579 = vst [vmem:[#allocation55_spill] sm:$0xff] %v10269_v18 }
 0x16c   : > { %v10271_v19 = vpop.f32.mrf.mxu1 }
 0x16d   : > { %12580 = vst [vmem:[#allocation56_spill] sm:$0xff] %v10271_v19 }
 0x16e   : > { %v10273_v20 = vpop.f32.mrf.mxu1 }
 0x16f   : > { %12581 = vst [vmem:[#allocation57_spill] sm:$0xff] %v10273_v20 }
 0x170   : > { %v10275_v21 = vpop.f32.mrf.mxu1 }
 0x171   : > { %12582 = vst [vmem:[#allocation58_spill] sm:$0xff] %v10275_v21 }
 0x172   : > { %v10277_v22 = vpop.f32.mrf.mxu1 }
 0x173   : > { %12583 = vst [vmem:[#allocation59_spill] sm:$0xff] %v10277_v22  ;;  %v10308_v22 = vld [vmem:[%s10300_s19] sm:$0xff] }
 0x174   : > { %v10279_v23 = vpop.f32.mrf.mxu1 }
 0x175   : > { %12584 = vst [vmem:[#allocation60_spill] sm:$0xff] %v10279_v23 }
 0x176   : > { %v10281_v24 = vpop.f32.mrf.mxu1 }
 0x177   : > { %12585 = vst [vmem:[#allocation61_spill] sm:$0xff] %v10281_v24 }
 0x178   : > { %v10283_v25 = vpop.f32.mrf.mxu1 }
 0x179   : > { %12586 = vst [vmem:[#allocation62_spill] sm:$0xff] %v10283_v25 }
 0x17a   : > { %v10285_v26 = vpop.f32.mrf.mxu1 }
 0x17b   : > { %12587 = vst [vmem:[#allocation63_spill] sm:$0xff] %v10285_v26 }
 0x17c   : > { %v10287_v27 = vpop.f32.mrf.mxu1 }
 0x17d   : > { %12588 = vst [vmem:[#allocation64_spill] sm:$0xff] %v10287_v27 }
 0x17e   : > { %v10290_v28 = vpop.f32.mrf.mxu1 }
 0x17f   : > { %12589 = vst [vmem:[#allocation65_spill] sm:$0xff] %v10290_v28 }
 0x180   : > { %v10293_v29 = vpop.f32.mrf.mxu1 }
 0x181   : > { %12590 = vst [vmem:[#allocation66_spill] sm:$0xff] %v10293_v29 }
 0x182   : > { %v10295_v30 = vpop.f32.mrf.mxu1 }
 0x183   : > { %12591 = vst [vmem:[#allocation67_spill] sm:$0xff] %v10295_v30 }
 0x184   : > { %v10305_v24 = vpop.f32.mrf.mxu1 }
 0x185   : > { %12592 = vst [vmem:[#allocation68_spill] sm:$0xff] %v10305_v24 }
 0x186   : > { %v10313_v18 = vpop.f32.mrf.mxu1 }
 0x187   : > { %12593 = vst [vmem:[#allocation69_spill] sm:$0xff] %v10313_v18 }
 0x1fb   : > { %v8615_v31 = vpop.f32.mrf.mxu0 }
 0x1fc   : > { %v1633_v26 = vmul.f32 0.17677669, %v8615_v31 }
 0x1fd   : > { %v1014_v28 = vpop.f32.mrf.mxu0 }
 0x1fe   : > { %v1632_v20 = vmul.f32 0.17677669, %v1014_v28  ;;  %v10311_v30 = vadd.f32 %v10303_v32, %v1633_v26 }
 0x200   : > { %v1670_v16 = vsel %vm1666_vm1, %v10311_v30, -inf  ;;  %v10318_v14 = vadd.f32 %v10308_v22, %v1632_v20 }
 0x201   : > { %1671 = vmax.xlane.f32.xlu0 %v1670_v16 }
 0x202   : > { %v1667_v12 = vsel %vm1666_vm1, %v10318_v14, -inf }
 0x204   : > { %v8622_v31 = vpop.f32.mrf.mxu1 }
 0x205   : > { %v1635_v10 = vmul.f32 0.17677669, %v8622_v31  ;;  %1668 = vmax.xlane.f32.xlu0 %v1667_v12 }
 0x206   : > { %v1101_v8 = vpop.f32.mrf.mxu1 }
 0x207   : > { %v1634_v28 = vmul.f32 0.17677669, %v1101_v8  ;;  %v10323_v26 = vadd.f32 %v10303_v32, %v1635_v10 }
 0x209   : > { %v1676_v18 = vsel %vm1666_vm1, %v10323_v26, -inf  ;;  %v10328_v6 = vadd.f32 %v10308_v22, %v1634_v28 }
 0x20a   : > { %1677 = vmax.xlane.f32.xlu0 %v1676_v18 }
 0x20b   : > { %v1673_v16 = vsel %vm1666_vm1, %v10328_v6, -inf  ;;  %v8629_v20 = vpop.f32.mrf.mxu0 }
 0x20c   : > { %1674 = vmax.xlane.f32.xlu1 %v1673_v16  ;;  %v1637_v4 = vmul.f32 0.17677669, %v8629_v20 }
 0x20d   : > { %v1188_v31 = vpop.f32.mrf.mxu0 }
 0x20e   : > { %v1636_v12 = vmul.f32 0.17677669, %v1188_v31  ;;  %v10333_v8 = vadd.f32 %v10303_v32, %v1637_v4 }
 0x210   : > { %v1682_v10 = vsel %vm1666_vm1, %v10333_v8, -inf  ;;  %v10338_v0 = vadd.f32 %v10308_v22, %v1636_v12 }
 0x211   : > { %1683 = vmax.xlane.f32.xlu1 %v1682_v10 }
 0x212   : > { %v1679_v16 = vsel %vm1666_vm1, %v10338_v0, -inf }
 0x213   : > { %v8636_v28 = vpop.f32.mrf.mxu1  ;;  %v8643_v18 = vpop.f32.mrf.mxu0 }
 0x214   : > { %v1639_v63 = vmul.f32 0.17677669, %v8636_v28  ;;  %v1641_v51 = vmul.f32 0.17677669, %v8643_v18 }
 0x215   : > { %1680 = vmax.xlane.f32.xlu1 %v1679_v16  ;;  %v1275_v20 = vpop.f32.mrf.mxu1  ;;  %v1362_v31 = vpop.f32.mrf.mxu0 }
 0x216   : > { %v1638_v41 = vmul.f32 0.17677669, %v1275_v20  ;;  %v1640_v4 = vmul.f32 0.17677669, %v1362_v31  ;;  %v10343_v37 = vadd.f32 %v10303_v32, %v1639_v63  ;;  %v10346_v55 = vadd.f32 %v10303_v32, %v1641_v51 }
 0x218   : > { %v1688_v12 = vsel %vm1666_vm1, %v10343_v37, -inf  ;;  %v1694_v10 = vsel %vm1666_vm1, %v10346_v55, -inf  ;;  %v10353_v28 = vadd.f32 %v10308_v22, %v1638_v41  ;;  %v10356_v18 = vadd.f32 %v10308_v22, %v1640_v4 }
 0x219   : > { %1689 = vmax.xlane.f32.xlu0 %v1688_v12  ;;  %1695 = vmax.xlane.f32.xlu1 %v1694_v10 }
 0x21a   : > { %v1685_v51 = vsel %vm1666_vm1, %v10353_v28, -inf  ;;  %v1691_v43 = vsel %vm1666_vm1, %v10356_v18, -inf }
 0x21b   : > { %v8650_v16 = vpop.f32.mrf.mxu1  ;;  %v8657_v63 = vpop.f32.mrf.mxu0 }
 0x21c   : > { %v1643_v20 = vmul.f32 0.17677669, %v8650_v16  ;;  %v1645_v31 = vmul.f32 0.17677669, %v8657_v63 }
 0x21d   : > { %1686 = vmax.xlane.f32.xlu0 %v1685_v51  ;;  %1692 = vmax.xlane.f32.xlu1 %v1691_v43  ;;  %v1449_v33 = vpop.f32.mrf.mxu1  ;;  %v1536_v41 = vpop.f32.mrf.mxu0 }
 0x21e   : > { %v1642_v47 = vmul.f32 0.17677669, %v1449_v33  ;;  %v1644_v35 = vmul.f32 0.17677669, %v1536_v41  ;;  %v10363_v4 = vadd.f32 %v10303_v32, %v1643_v20  ;;  %v10366_v12 = vadd.f32 %v10303_v32, %v1645_v31 }
 0x220   : > { %v1700_v10 = vsel %vm1666_vm1, %v10363_v4, -inf  ;;  %v1706_v16 = vsel %vm1666_vm1, %v10366_v12, -inf  ;;  %v10373_v63 = vadd.f32 %v10308_v22, %v1642_v47  ;;  %v10376_v43 = vadd.f32 %v10308_v22, %v1644_v35 }
 0x221   : > { %1701 = vmax.xlane.f32.xlu0 %v1700_v10  ;;  %1707 = vmax.xlane.f32.xlu1 %v1706_v16 }
 0x222   : > { %v1697_v31 = vsel %vm1666_vm1, %v10373_v63, -inf  ;;  %v1703_v51 = vsel %vm1666_vm1, %v10376_v43, -inf }
 0x223   : > { %v8664_v33 = vpop.f32.mrf.mxu1 }
 0x224   : > { %v1647_v20 = vmul.f32 0.17677669, %v8664_v33 }
 0x225   : > { %v1623_v41 = vpop.f32.mrf.mxu1  ;;  %1698 = vmax.xlane.f32.xlu0 %v1697_v31  ;;  %1704 = vmax.xlane.f32.xlu1 %v1703_v51 }
 0x226   : > { %v1646_v29 = vmul.f32 0.17677669, %v1623_v41  ;;  %v10383_v47 = vadd.f32 %v10303_v32, %v1647_v20 }
 0x228   : > { %v1712_v35 = vsel %vm1666_vm1, %v10383_v47, -inf  ;;  %v10388_v10 = vadd.f32 %v10308_v22, %v1646_v29  ;;  %v10404_v22 = vpop.permute.xlu0 %2493  ;;  %v10406_v29 = vpop.permute.xlu1 %2491 }
 0x229   : > { %1713 = vmax.xlane.f32.xlu1 %v1712_v35  ;;  %12594 = vst [vmem:[#allocation70_spill] sm:$0xff] %v10404_v22 }
 0x22a   : > { %v1709_v16 = vsel %vm1666_vm1, %v10388_v10, -inf }
 0x22b   : > { %1710 = vmax.xlane.f32.xlu0 %v1709_v16 }
 0x22c   : > { %v10408_v32 = vpop.permute.xlu0 %2497  ;;  %v10410_v33 = vpop.permute.xlu1 %2495 }
 0x230   : > { %v10412_v20 = vpop.permute.xlu0 %2586  ;;  %v10414_v31 = vpop.permute.xlu1 %2582 }
 0x231   : > { %12595 = vst [vmem:[#allocation71_spill] sm:$0xff] %v10412_v20  ;;  %12596 = vst [vmem:[#allocation72_spill] sm:$0xff] %v10414_v31 }
 0x234   : > { %v10416_v51 = vpop.permute.xlu0 %2677  ;;  %v10418_v41 = vpop.permute.xlu1 %2588 }
 0x235   : > { %12597 = vst [vmem:[#allocation73_spill] sm:$0xff] %v10416_v51  ;;  %12598 = vst [vmem:[#allocation74_spill] sm:$0xff] %v10418_v41 }
 0x23a   : > { %2673 = vrot.lane.b32.xlu1 %v10107_v49, %s9741_s9 }
 0x23e   : > { %2861 = vrot.lane.b32.xlu1 %v10055_v36, %s9741_s9 }
 0x241   : > { %2584 = vrot.lane.b32.xlu0 %v10089_v45, %s9741_s9 }
 0x242   : > { %2764 = vrot.lane.b32.xlu1 %v10139_v57, %s9741_s9 }
 0x245   : > { %2768 = vrot.lane.b32.xlu0 %v10149_v59, %s9741_s9 }
 0x249   : > { %2675 = vrot.lane.b32.xlu0 %v10123_v53, %s9741_s9  ;;  %v10421_v53 = vpop.permute.xlu1 %2679 }
 0x24d   : > { %v10424_v36 = vpop.permute.xlu1 %2770 }
 0x28a   : > { %v1672_v35 = vpop.xlane.xlu0 %1671 }
 0x28b   : > { %v1716_v16 = vsub.f32 %v10311_v30, %v1672_v35 }
 0x28d   : > { %v1733_v59 = vmul.f32 1.442695, %v1716_v16 }
 0x28e   : > { %v1669_v57 = vpop.xlane.xlu0 %1668 }
 0x28f   : > { %9225 = vpow2.f32 %v1733_v59  ;;  %v1715_v45 = vsub.f32 %v10318_v14, %v1669_v57 }
 0x291   : > { %v1731_v49 = vmul.f32 1.442695, %v1715_v45 }
 0x293   : > { %9227 = vpow2.f32 %v1731_v49  ;;  %v1678_v22 = vpop.xlane.xlu0 %1677 }
 0x294   : > { %v1718_v31 = vsub.f32 %v10323_v26, %v1678_v22 }
 0x295   : > { %v1675_v51 = vpop.xlane.xlu1 %1674 }
 0x296   : > { %v1737_v20 = vmul.f32 1.442695, %v1718_v31  ;;  %v1717_v41 = vsub.f32 %v10328_v6, %v1675_v51 }
 0x298   : > { %9229 = vpow2.f32 %v1737_v20  ;;  %v1735_v30 = vmul.f32 1.442695, %v1717_v41 }
 0x29a   : > { %9231 = vpow2.f32 %v1735_v30  ;;  %v1684_v35 = vpop.xlane.xlu1 %1683 }
 0x29b   : > { %v1720_v16 = vsub.f32 %v10333_v8, %v1684_v35 }
 0x29c   : > { %v10429_v59 = vpop.eup %9225 }
 0x29d   : > { %v1741_v57 = vmul.f32 1.442695, %v1720_v16  ;;  %v1766_v45 = vsel %vm1666_vm1, %v10429_v59, 0.0 }
 0x29e   : > { %v1681_v49 = vpop.xlane.xlu1 %1680  ;;  %1767 = vadd.xlane.f32.xlu1 %v1766_v45 }
 0x29f   : > { %9233 = vpow2.f32 %v1741_v57  ;;  %v1719_v14 = vsub.f32 %v10338_v0, %v1681_v49 }
 0x2a0   : > { %v10434_v26 = vpop.eup %9227 }
 0x2a1   : > { %v1739_v6 = vmul.f32 1.442695, %v1719_v14  ;;  %v1763_v22 = vsel %vm1666_vm1, %v10434_v26, 0.0 }
 0x2a2   : > { %1764 = vadd.xlane.f32.xlu0 %v1763_v22  ;;  %v1690_v20 = vpop.xlane.xlu0 %1689  ;;  %v1696_v8 = vpop.xlane.xlu1 %1695 }
 0x2a3   : > { %9235 = vpow2.f32 %v1739_v6  ;;  %v1722_v31 = vsub.f32 %v10343_v37, %v1690_v20  ;;  %v1724_v51 = vsub.f32 %v10346_v55, %v1696_v8 }
 0x2a5   : > { %v10440_v41 = vpop.eup %9229  ;;  %v1745_v30 = vmul.f32 1.442695, %v1722_v31  ;;  %v1749_v35 = vmul.f32 1.442695, %v1724_v51 }
 0x2a6   : > { %v1772_v0 = vsel %vm1666_vm1, %v10440_v41, 0.0  ;;  %v1687_v16 = vpop.xlane.xlu0 %1686  ;;  %v1693_v57 = vpop.xlane.xlu1 %1692 }
 0x2a7   : > { %v10444_v45 = vpop.eup %9231  ;;  %9237 = vpow2.f32 %v1745_v30  ;;  %1773 = vadd.xlane.f32.xlu0 %v1772_v0  ;;  %v1721_v49 = vsub.f32 %v10353_v28, %v1687_v16  ;;  %v1723_v14 = vsub.f32 %v10356_v18, %v1693_v57 }
 0x2a8   : > { %9239 = vpow2.f32 %v1749_v35  ;;  %v1769_v6 = vsel %vm1666_vm1, %v10444_v45, 0.0 }
 0x2a9   : > { %v1743_v37 = vmul.f32 1.442695, %v1721_v49  ;;  %v1747_v55 = vmul.f32 1.442695, %v1723_v14 }
 0x2aa   : > { %v1702_v22 = vpop.xlane.xlu0 %1701  ;;  %v1708_v20 = vpop.xlane.xlu1 %1707 }
 0x2ab   : > { %9241 = vpow2.f32 %v1743_v37  ;;  %1770 = vadd.xlane.f32.xlu0 %v1769_v6  ;;  %v1726_v8 = vsub.f32 %v10363_v4, %v1702_v22  ;;  %v1728_v31 = vsub.f32 %v10366_v12, %v1708_v20 }
 0x2ac   : > { %v10452_v51 = vpop.eup %9233  ;;  %9243 = vpow2.f32 %v1747_v55 }
 0x2ad   : > { %v1753_v28 = vmul.f32 1.442695, %v1726_v8  ;;  %v1757_v30 = vmul.f32 1.442695, %v1728_v31  ;;  %v1778_v18 = vsel %vm1666_vm1, %v10452_v51, 0.0 }
 0x2ae   : > { %v1699_v35 = vpop.xlane.xlu0 %1698  ;;  %1779 = vadd.xlane.f32.xlu1 %v1778_v18  ;;  %v1705_v0 = vpop.xlane.xlu1 %1704 }
 0x2af   : > { %9245 = vpow2.f32 %v1753_v28  ;;  %v1725_v16 = vsub.f32 %v10373_v63, %v1699_v35  ;;  %v1727_v57 = vsub.f32 %v10376_v43, %v1705_v0 }
 0x2b0   : > { %v10458_v49 = vpop.eup %9235  ;;  %9247 = vpow2.f32 %v1757_v30 }
 0x2b1   : > { %v1751_v4 = vmul.f32 1.442695, %v1725_v16  ;;  %v1755_v12 = vmul.f32 1.442695, %v1727_v57  ;;  %v1775_v14 = vsel %vm1666_vm1, %v10458_v49, 0.0 }
 0x2b2   : > { %1776 = vadd.xlane.f32.xlu1 %v1775_v14  ;;  %v1714_v37 = vpop.xlane.xlu1 %1713 }
 0x2b3   : > { %9249 = vpow2.f32 %v1751_v4  ;;  %v1730_v55 = vsub.f32 %v10383_v47, %v1714_v37 }
 0x2b4   : > { %v10463_v6 = vpop.eup %9237  ;;  %9251 = vpow2.f32 %v1755_v12  ;;  %v1711_v22 = vpop.xlane.xlu0 %1710 }
 0x2b5   : > { %v10465_v63 = vpop.eup %9239  ;;  %v1761_v43 = vmul.f32 1.442695, %v1730_v55  ;;  %v1729_v20 = vsub.f32 %v10388_v10, %v1711_v22  ;;  %v1784_v8 = vsel %vm1666_vm1, %v10463_v6, 0.0 }
 0x2b6   : > { %1785 = vadd.xlane.f32.xlu0 %v1784_v8  ;;  %v1790_v31 = vsel %vm1666_vm1, %v10465_v63, 0.0  ;;  %v10566_v8 = vpop.permute.xlu1 %2673 }
 0x2b7   : > { %9253 = vpow2.f32 %v1761_v43  ;;  %v1759_v28 = vmul.f32 1.442695, %v1729_v20  ;;  %1791 = vadd.xlane.f32.xlu1 %v1790_v31  ;;  %v12599_v31 = vld [vmem:[#allocation66_spill] sm:$0xff] }
 0x2b8   : > { %v10472_v47 = vpop.eup %9241 }
 0x2b9   : > { %v10474_v30 = vpop.eup %9243  ;;  %9255 = vpow2.f32 %v1759_v28  ;;  %v1781_v18 = vsel %vm1666_vm1, %v10472_v47, 0.0  ;;  %v10572_v28 = vpop.permute.xlu0 %2584 }
 0x2ba   : > { %1782 = vadd.xlane.f32.xlu0 %v1781_v18  ;;  %v1787_v10 = vsel %vm1666_vm1, %v10474_v30, 0.0  ;;  %v12600_v18 = vld [vmem:[#allocation23_spill] sm:$0xff] }
 0x2bb   : > { %1788 = vadd.xlane.f32.xlu1 %v1787_v10  ;;  %v10576_v10 = vpop.permute.xlu1 %2861 }
 0x2bc   : > { %v10480_v35 = vpop.eup %9245 }
 0x2bd   : > { %v10482_v0 = vpop.eup %9247  ;;  %v1796_v16 = vsel %vm1666_vm1, %v10480_v35, 0.0 }
 0x2be   : > { %1797 = vadd.xlane.f32.xlu0 %v1796_v16  ;;  %v1802_v57 = vsel %vm1666_vm1, %v10482_v0, 0.0  ;;  %v12601_v16 = vld [vmem:[#allocation30_spill] sm:$0xff] }
 0x2bf   : > { %1803 = vadd.xlane.f32.xlu1 %v1802_v57  ;;  %v12602_v57 = vld [vmem:[#allocation22_spill] sm:$0xff] }
 0x2c0   : > { %v10488_v4 = vpop.eup %9249 }
 0x2c1   : > { %v10490_v12 = vpop.eup %9251  ;;  %v1793_v14 = vsel %vm1666_vm1, %v10488_v4, 0.0 }
 0x2c2   : > { %1794 = vadd.xlane.f32.xlu0 %v1793_v14  ;;  %v1799_v37 = vsel %vm1666_vm1, %v10490_v12, 0.0  ;;  %v10582_v14 = vpop.permute.xlu0 %2768 }
 0x2c3   : > { %1800 = vadd.xlane.f32.xlu1 %v1799_v37  ;;  %v12603_v37 = vld [vmem:[#allocation28_spill] sm:$0xff] }
 0x2c4   : > { %v10496_v55 = vpop.eup %9253 }
 0x2c5   : > { %v1808_v22 = vsel %vm1666_vm1, %v10496_v55, 0.0 }
 0x2c6   : > { %v10500_v43 = vpop.eup %9255 }
 0x2c7   : > { %1809 = vadd.xlane.f32.xlu1 %v1808_v22  ;;  %v1805_v20 = vsel %vm1666_vm1, %v10500_v43, 0.0  ;;  %v10586_v22 = vpop.permute.xlu1 %2764 }
 0x2c8   : > { %1806 = vadd.xlane.f32.xlu0 %v1805_v20  ;;  %v12604_v20 = vld [vmem:[#allocation36_spill] sm:$0xff] }
 0x2d8   : > { %2952 = vrot.lane.b32.xlu1 %v10087_v44, %s9741_s9 }
 0x2dc   : > { %2855 = vrot.lane.b32.xlu1 %v10169_v1, %s9741_s9 }
 0x2de   : > { %2859 = vrot.lane.b32.xlu0 %v10181_v3, %s9741_s9 }
 0x2e0   : > { %3043 = vrot.lane.b32.xlu1 %v10119_v52, %s9741_s9 }
 0x2e2   : > { %2766 = vrot.lane.b32.xlu0 %v10153_v61, %s9741_s9 }
 0x2e4   : > { %2946 = vrot.lane.b32.xlu1 %v10059_v38, %s9741_s9 }
 0x2e6   : > { %2950 = vrot.lane.b32.xlu0 %v10067_v40, %s9741_s9 }
 0x2e8   : > { %3134 = vrot.lane.b32.xlu1 %v10151_v60, %s9741_s9 }
 0x2ea   : > { %2857 = vrot.lane.b32.xlu0 %v10047_v34, %s9741_s9 }
 0x2ec   : > { %3037 = vrot.lane.b32.xlu1 %v10093_v46, %s9741_s9 }
 0x2ee   : > { %3041 = vrot.lane.b32.xlu0 %v10099_v48, %s9741_s9 }
 0x2f0   : > { %3132 = vrot.lane.b32.xlu1 %v10131_v56, %s9741_s9 }
 0x2f2   : > { %2948 = vrot.lane.b32.xlu0 %v10075_v42, %s9741_s9 }
 0x2f4   : > { %3130 = vrot.lane.b32.xlu1 %v10143_v58, %s9741_s9 }
 0x2f6   : > { %3039 = vrot.lane.b32.xlu0 %v10109_v50, %s9741_s9 }
 0x2f8   : > { %3432 = vrot.lane.b32.xlu1 %v10157_v62, %s9741_s9 }
 0x2fa   : > { %3128 = vrot.lane.b32.xlu0 %v10125_v54, %s9741_s9 }
 0x2fc   : > { %3523 = vrot.lane.b32.xlu1 %v10209_v7, %s9741_s9 }
 0x2fe   : > { %3434 = vrot.lane.b32.xlu0 %v10175_v2, %s9741_s9 }
 0x300   : > { %3612 = vrot.lane.b32.xlu1 %v10240_v11, %s9741_s9 }
 0x302   : > { %3521 = vrot.lane.b32.xlu0 %v10193_v5, %s9741_s9 }
 0x304   : > { %3610 = vrot.lane.b32.xlu1 %v10225_v9, %s9741_s9 }
 0x306   : > { %3701 = vrot.lane.b32.xlu0 %v10261_v15, %s9741_s9 }
 0x308   : > { %3790 = vrot.lane.b32.xlu1 %v10271_v19, %s9741_s9 }
 0x30a   : > { %3699 = vrot.lane.b32.xlu0 %v10251_v13, %s9741_s9 }
 0x30c   : > { %3788 = vrot.lane.b32.xlu1 %v10267_v17, %s9741_s9 }
 0x30e   : > { %3879 = vrot.lane.b32.xlu0 %v10279_v23, %s9741_s9 }
 0x310   : > { %3968 = vrot.lane.b32.xlu1 %v10287_v27, %s9741_s9 }
 0x312   : > { %3877 = vrot.lane.b32.xlu0 %v10275_v21, %s9741_s9 }
 0x314   : > { %3966 = vrot.lane.b32.xlu1 %v10283_v25, %s9741_s9 }
 0x316   : > { %4057 = vrot.lane.b32.xlu0 %v10305_v24, %s9741_s9 }
 0x318   : > { %4148 = vrot.lane.b32.xlu1 %v10065_v39, %s9742_s22  ;;  %v10592_v39 = vpop.permute.xlu0 %2675 }
 0x31a   : > { %4055 = vrot.lane.b32.xlu0 %v12599_v31, %s9741_s9 }
 0x31c   : > { %4146 = vrot.lane.b32.xlu1 %v12600_v18, %s9742_s22  ;;  %v12605_v18 = vld [vmem:[#allocation25_spill] sm:$0xff] }
 0x31e   : > { %4239 = vrot.lane.b32.xlu0 %v12601_v16, %s9742_s22  ;;  %v12606_v16 = vld [vmem:[#allocation27_spill] sm:$0xff] }
 0x320   : > { %4142 = vrot.lane.b32.xlu1 %v12602_v57, %s9742_s22  ;;  %v12607_v57 = vld [vmem:[#allocation33_spill] sm:$0xff] }
 0x322   : > { %4237 = vrot.lane.b32.xlu0 %v12603_v37, %s9742_s22  ;;  %v12608_v37 = vld [vmem:[#allocation41_spill] sm:$0xff] }
 0x324   : > { %4330 = vrot.lane.b32.xlu1 %v12604_v20, %s9742_s22 }
 0x326   : > { %4144 = vrot.lane.b32.xlu0 %v12605_v18, %s9742_s22 }
 0x327   : > { %v1768_v5 = vpop.xlane.xlu1 %1767 }
 0x328   : > { %4233 = vrot.lane.b32.xlu1 %v12606_v16, %s9742_s22  ;;  %9257 = vrcp.f32 %v1768_v5 }
 0x32a   : > { %4328 = vrot.lane.b32.xlu0 %v12607_v57, %s9742_s22 }
 0x32b   : > { %v1765_v2 = vpop.xlane.xlu0 %1764 }
 0x32c   : > { %9259 = vrcp.f32 %v1765_v2  ;;  %4421 = vrot.lane.b32.xlu1 %v12608_v37, %s9742_s22 }
 0x330   : > { %v1774_v7 = vpop.xlane.xlu0 %1773 }
 0x331   : > { %9261 = vrcp.f32 %v1774_v7 }
 0x334   : > { %v1771_v20 = vpop.xlane.xlu0 %1770 }
 0x335   : > { %9263 = vrcp.f32 %v1771_v20  ;;  %v9258_v54 = vpop.eup %9257 }
 0x336   : > { %v1828_v58 = vmul.f32 %v9258_v54, %v10429_v59 }
 0x337   : > { %v1780_v18 = vpop.xlane.xlu1 %1779 }
 0x338   : > { %9265 = vrcp.f32 %v1780_v18 }
 0x339   : > { %v9260_v62 = vpop.eup %9259 }
 0x33a   : > { %v1827_v50 = vmul.f32 %v9260_v62, %v10434_v26 }
 0x33b   : > { %v1777_v16 = vpop.xlane.xlu1 %1776 }
 0x33c   : > { %9267 = vrcp.f32 %v1777_v16  ;;  %8669 = vmatprep.mubr.msk.f32.mxu0 %vm1666_vm1, %v1827_v50 }
 0x33d   : > { %8670 = vmatmul.mubr.msk.f32.vlgmr.msra.gmra.mxu0 %vm1666_vm1, %v1828_v58 }
 0x33e   : > { %8680 = vmatpush3.msra.mxu0 %v10240_v11  ;;  %v9262_v7 = vpop.eup %9261 }
 0x33f   : > { %8681 = vmatprep.subr.mxu0 %v10225_v9  ;;  %v1786_v2 = vpop.xlane.xlu0 %1785  ;;  %v1830_v58 = vmul.f32 %v9262_v7, %v10440_v41 }
 0x340   : > { %8682 = vmatpush3.msra.mxu0 %v10225_v9  ;;  %v1792_v5 = vpop.xlane.xlu1 %1791  ;;  %9269 = vrcp.f32 %v1786_v2 }
 0x341   : > { %8693 = vmatprep.subr.mxu0 %v10271_v19  ;;  %9271 = vrcp.f32 %v1792_v5 }
 0x342   : > { %v9264_v62 = vpop.eup %9263 }
 0x343   : > { %v1783_v54 = vpop.xlane.xlu0 %1782  ;;  %v1829_v59 = vmul.f32 %v9264_v62, %v10444_v45 }
 0x344   : > { %9273 = vrcp.f32 %v1783_v54  ;;  %v1789_v50 = vpop.xlane.xlu1 %1788 }
 0x345   : > { %9275 = vrcp.f32 %v1789_v50  ;;  %8676 = vmatprep.mubr.msk.f32.mxu1 %vm1666_vm1, %v1829_v59  ;;  %v9266_v18 = vpop.eup %9265 }
 0x346   : > { %8677 = vmatmul.mubr.msk.f32.vlgmr.msra.gmra.mxu1 %vm1666_vm1, %v1830_v58  ;;  %v1832_v2 = vmul.f32 %v9266_v18, %v10452_v51 }
 0x347   : > { %8687 = vmatpush3.msra.mxu1 %v10261_v15  ;;  %v1798_v26 = vpop.xlane.xlu0 %1797 }
 0x348   : > { %8688 = vmatprep.subr.mxu1 %v10251_v13  ;;  %v1804_v16 = vpop.xlane.xlu1 %1803  ;;  %9277 = vrcp.f32 %v1798_v26 }
 0x349   : > { %v9268_v20 = vpop.eup %9267  ;;  %8689 = vmatpush3.msra.mxu1 %v10251_v13  ;;  %9279 = vrcp.f32 %v1804_v16 }
 0x34a   : > { %8700 = vmatprep.subr.mxu1 %v10279_v23  ;;  %v1831_v41 = vmul.f32 %v9268_v20, %v10458_v49 }
 0x34b   : > { %v1795_v45 = vpop.xlane.xlu0 %1794 }
 0x34c   : > { %9281 = vrcp.f32 %v1795_v45  ;;  %v1801_v5 = vpop.xlane.xlu1 %1800  ;;  %8683 = vmatprep.mubr.msk.f32.mxu0 %vm1666_vm1, %v1831_v41 }
 0x34d   : > { %9283 = vrcp.f32 %v1801_v5  ;;  %8684 = vmatmul.mubr.msk.f32.vlgmr.msra.gmra.mxu0 %vm1666_vm1, %v1832_v2  ;;  %v9270_v7 = vpop.eup %9269 }
 0x34e   : > { %8694 = vmatpush3.msra.mxu0 %v10271_v19  ;;  %v9272_v62 = vpop.eup %9271  ;;  %v1834_v26 = vmul.f32 %v9270_v7, %v10463_v6 }
 0x34f   : > { %8695 = vmatprep.subr.mxu0 %v10267_v17  ;;  %v1836_v16 = vmul.f32 %v9272_v62, %v10465_v63 }
 0x350   : > { %8696 = vmatpush3.msra.mxu0 %v10267_v17  ;;  %v1810_v49 = vpop.xlane.xlu1 %1809 }
 0x351   : > { %v9274_v54 = vpop.eup %9273  ;;  %9285 = vrcp.f32 %v1810_v49  ;;  %8707 = vmatprep.subr.mxu0 %v10287_v27  ;;  %v1807_v51 = vpop.xlane.xlu0 %1806 }
 0x352   : > { %v9276_v59 = vpop.eup %9275  ;;  %9287 = vrcp.f32 %v1807_v51  ;;  %v1833_v50 = vmul.f32 %v9274_v54, %v10472_v47 }
 0x353   : > { %v1835_v58 = vmul.f32 %v9276_v59, %v10474_v30 }
 0x354   : > { %v10627_v18 = vpop.permute.xlu1 %2952  ;;  %8690 = vmatprep.mubr.msk.f32.mxu1 %vm1666_vm1, %v1833_v50  ;;  %v12609_v50 = vld [vmem:[#allocation74_spill] sm:$0xff] }
 0x355   : > { %8697 = vmatprep.mubr.msk.f32.mxu0 %vm1666_vm1, %v1835_v58  ;;  %8691 = vmatmul.mubr.msk.f32.vlgmr.msra.gmra.mxu1 %vm1666_vm1, %v1834_v26  ;;  %v10633_v20 = vpop.permute.xlu0 %2859  ;;  %v9278_v47 = vpop.eup %9277  ;;  %v12612_v58 = vld [vmem:[#allocation70_spill] sm:$0xff] }
 0x356   : > { %8701 = vmatpush3.msra.mxu1 %v10279_v23  ;;  %8698 = vmatmul.mubr.msk.f32.vlgmr.msra.gmra.mxu0 %vm1666_vm1, %v1836_v16  ;;  %v9280_v6 = vpop.eup %9279  ;;  %v1838_v7 = vmul.f32 %v9278_v47, %v10480_v35 }
 0x357   : > { %8708 = vmatpush3.msra.mxu0 %v10287_v27  ;;  %8702 = vmatprep.subr.mxu1 %v10275_v21  ;;  %v1840_v49 = vmul.f32 %v9280_v6, %v10482_v0 }
 0x358   : > { %8709 = vmatprep.subr.mxu0 %v10283_v25  ;;  %8703 = vmatpush3.msra.mxu1 %v10275_v21  ;;  %v2856_v63 = vpop.permute.xlu1 %2855 }
 0x359   : > { %v9282_v30 = vpop.eup %9281  ;;  %8710 = vmatpush3.msra.mxu0 %v10283_v25  ;;  %8714 = vmatprep.subr.mxu1 %v10305_v24  ;;  %v2767_v41 = vpop.permute.xlu0 %2766 }
 0x35a   : > { %v9284_v45 = vpop.eup %9283  ;;  %8721 = vmatprep.subr.msk.mxu0 %vm446_vm0, %v10408_v32  ;;  %v1837_v2 = vmul.f32 %v9282_v30, %v10488_v4 }
 0x35b   : > { %v1839_v5 = vmul.f32 %v9284_v45, %v10490_v12 }
 0x35c   : > { %v3044_v62 = vpop.permute.xlu1 %3043  ;;  %8704 = vmatprep.mubr.msk.f32.mxu1 %vm1666_vm1, %v1837_v2 }
 0x35d   : > { %8711 = vmatprep.mubr.msk.f32.mxu0 %vm1666_vm1, %v1839_v5  ;;  %8705 = vmatmul.mubr.msk.f32.vlgmr.msra.gmra.mxu1 %vm1666_vm1, %v1838_v7  ;;  %v2951_v54 = vpop.permute.xlu0 %2950 }
 0x35e   : > { %v9286_v51 = vpop.eup %9285  ;;  %8715 = vmatpush3.msra.mxu1 %v10305_v24  ;;  %8712 = vmatmul.mubr.msk.f32.vlgmr.msra.gmra.mxu0 %vm1666_vm1, %v1840_v49 }
 0x35f   : > { %v9288_v4 = vpop.eup %9287  ;;  %8722 = vmatpush3.xpose.msk.msra.mxu0 %vm446_vm0, %v10408_v32  ;;  %8716 = vmatprep.subr.mxu1 %v12599_v31  ;;  %v1842_v59 = vmul.f32 %v9286_v51, %v10496_v55  ;;  %v12610_v32 = vld [vmem:[#allocation71_spill] sm:$0xff]  ;;  %v12611_v55 = vld [vmem:[#allocation72_spill] sm:$0xff] }
 0x360   : > { %8723 = vmatprep.subr.msk.mxu0 %vm446_vm0, %v10410_v33  ;;  %8725 = vmatprep.mubr.msk.f32.mxu0 %vm446_vm0, %v10406_v29  ;;  %v2947_v35 = vpop.permute.xlu1 %2946  ;;  %v1841_v0 = vmul.f32 %v9288_v4, %v10500_v43 }
 0x361   : > { %8717 = vmatpush3.msra.mxu1 %v12599_v31  ;;  %v2858_v12 = vpop.permute.xlu0 %2857 }
 0x362   : > { %8728 = vmatprep.subr.msk.mxu1 %vm446_vm0, %v12609_v50  ;;  %8718 = vmatprep.mubr.msk.f32.mxu1 %vm1666_vm1, %v1841_v0 }
 0x363   : > { %8724 = vmatpush3.xpose.msk.msra.mxu0 %vm446_vm0, %v10410_v33  ;;  %8719 = vmatmul.mubr.msk.f32.vlgmr.msra.gmra.mxu1 %vm1666_vm1, %v1842_v59  ;;  %v12613_v33 = vld [vmem:[#allocation73_spill] sm:$0xff] }
 0x364   : > { %8735 = vmatprep.subr.msk.mxu0 %vm446_vm0, %v10421_v53  ;;  %8729 = vmatpush3.xpose.msk.msra.mxu1 %vm446_vm0, %v12609_v50  ;;  %v3135_v29 = vpop.permute.xlu1 %3134 }
 0x365   : > { %8730 = vmatprep.subr.msk.mxu1 %vm446_vm0, %v12610_v32  ;;  %8732 = vmatprep.mubr.msk.f32.mxu1 %vm446_vm0, %v12611_v55  ;;  %v3042_v43 = vpop.permute.xlu0 %3041 }
 0x366   : > { %8726 = vmatmul.mubr.msk.f32.vlgmr.msra.gmra.mxu0 %vm446_vm0, %v12612_v58 }
 0x367   : > { %8736 = vmatpush3.xpose.msk.msra.mxu0 %vm446_vm0, %v10421_v53  ;;  %8739 = vmatprep.mubr.msk.f32.mxu0 %vm446_vm0, %v10566_v8 }
 0x368   : > { %8737 = vmatprep.subr.msk.mxu0 %vm446_vm0, %v12613_v33  ;;  %8731 = vmatpush3.xpose.msk.msra.mxu1 %vm446_vm0, %v12610_v32  ;;  %v3038_v26 = vpop.permute.xlu1 %3037 }
 0x369   : > { %8742 = vmatprep.subr.msk.mxu1 %vm446_vm0, %v10424_v36  ;;  %v2949_v16 = vpop.permute.xlu0 %2948 }
 0x36b   : > { %8738 = vmatpush3.xpose.msk.msra.mxu0 %vm446_vm0, %v12613_v33  ;;  %8733 = vmatmul.mubr.msk.f32.vlgmr.msra.gmra.mxu1 %vm446_vm0, %v10572_v28 }
 0x36c   : > { %8749 = vmatprep.subr.msk.mxu0 %vm446_vm0, %v10576_v10  ;;  %8743 = vmatpush3.xpose.msk.msra.mxu1 %vm446_vm0, %v10424_v36  ;;  %v3133_v53 = vpop.permute.xlu1 %3132 }
 0x36d   : > { %8746 = vmatprep.mubr.msk.f32.mxu1 %vm446_vm0, %v10586_v22  ;;  %8744 = vmatprep.subr.msk.mxu1 %vm446_vm0, %v10582_v14  ;;  %v3040_v8 = vpop.permute.xlu0 %3039 }
 0x36e   : > { %8740 = vmatmul.mubr.msk.f32.vlgmr.msra.gmra.mxu0 %vm446_vm0, %v10592_v39 }
 0x36f   : > { %8750 = vmatpush3.xpose.msk.msra.mxu0 %vm446_vm0, %v10576_v10  ;;  %8753 = vmatprep.mubr.msk.f32.mxu0 %vm446_vm0, %v2856_v63 }
 0x370   : > { %8751 = vmatprep.subr.msk.mxu0 %vm446_vm0, %v10633_v20  ;;  %8745 = vmatpush3.xpose.msk.msra.mxu1 %vm446_vm0, %v10582_v14  ;;  %v3131_v36 = vpop.permute.xlu1 %3130 }
 0x371   : > { %8756 = vmatprep.subr.msk.mxu1 %vm446_vm0, %v10627_v18  ;;  %v3129_v39 = vpop.permute.xlu0 %3128 }
 0x373   : > { %8752 = vmatpush3.xpose.msk.msra.mxu0 %vm446_vm0, %v10633_v20  ;;  %8747 = vmatmul.mubr.msk.f32.vlgmr.msra.gmra.mxu1 %vm446_vm0, %v2767_v41 }
 0x374   : > { %8763 = vmatprep.subr.msk.mxu0 %vm446_vm0, %v3044_v62  ;;  %8757 = vmatpush3.xpose.msk.msra.mxu1 %vm446_vm0, %v10627_v18  ;;  %v3433_v28 = vpop.permute.xlu1 %3432 }
 0x375   : > { %8760 = vmatprep.mubr.msk.f32.mxu1 %vm446_vm0, %v2947_v35  ;;  %8758 = vmatprep.subr.msk.mxu1 %vm446_vm0, %v2951_v54  ;;  %v3435_v10 = vpop.permute.xlu0 %3434 }
 0x376   : > { %8754 = vmatmul.mubr.msk.f32.vlgmr.msra.gmra.mxu0 %vm446_vm0, %v2858_v12  ;;  %v10772_v12 = vld [vmem:[%s10300_s19 + $0x18] sm:$0xff] }
 0x377   : > { %8764 = vmatpush3.xpose.msk.msra.mxu0 %vm446_vm0, %v3044_v62  ;;  %8767 = vmatprep.mubr.msk.f32.mxu0 %vm446_vm0, %v3038_v26 }
 0x378   : > { %8765 = vmatprep.subr.msk.mxu0 %vm446_vm0, %v3042_v43  ;;  %8759 = vmatpush3.xpose.msk.msra.mxu1 %vm446_vm0, %v2951_v54  ;;  %v3524_v14 = vpop.permute.xlu1 %3523 }
 0x379   : > { %8770 = vmatprep.subr.msk.mxu1 %vm446_vm0, %v3135_v29  ;;  %v3522_v22 = vpop.permute.xlu0 %3521 }
 0x37b   : > { %8766 = vmatpush3.xpose.msk.msra.mxu0 %vm446_vm0, %v3042_v43  ;;  %8761 = vmatmul.mubr.msk.f32.vlgmr.msra.gmra.mxu1 %vm446_vm0, %v2949_v16 }
 0x37c   : > { %8777 = vmatprep.subr.mxu0 %v3435_v10  ;;  %8771 = vmatpush3.xpose.msk.msra.mxu1 %vm446_vm0, %v3135_v29  ;;  %v10734_v18 = vpop.permute.xlu1 %3612  ;;  %v10775_v29 = vld [vmem:[%s10300_s19 + $0x10] sm:$0xff] }
 0x37d   : > { %8774 = vmatprep.mubr.msk.f32.mxu1 %vm446_vm0, %v3129_v39  ;;  %8772 = vmatprep.subr.msk.mxu1 %vm446_vm0, %v3133_v53  ;;  %v10738_v20 = vpop.permute.xlu0 %3701 }
 0x37e   : > { %8768 = vmatmul.mubr.msk.f32.vlgmr.msra.gmra.mxu0 %vm446_vm0, %v3040_v8 }
 0x37f   : > { %8778 = vmatpush3.msra.mxu0 %v3435_v10 }
 0x380   : > { %8779 = vmatprep.subr.mxu0 %v3433_v28  ;;  %8773 = vmatpush3.xpose.msk.msra.mxu1 %vm446_vm0, %v3133_v53 }
 0x381   : > { %8780 = vmatpush3.msra.mxu0 %v3433_v28  ;;  %8784 = vmatprep.subr.mxu1 %v3524_v14 }
 0x382   : > { %8791 = vmatprep.subr.mxu0 %v10734_v18 }
 0x383   : > { %8775 = vmatmul.mubr.msk.f32.vlgmr.msra.gmra.mxu1 %vm446_vm0, %v3131_v36 }
 0x384   : > { %8785 = vmatpush3.msra.mxu1 %v3524_v14 }
 0x385   : > { %8786 = vmatprep.subr.mxu1 %v3522_v22 }
 0x386   : > { %8787 = vmatpush3.msra.mxu1 %v3522_v22 }
 0x387   : > { %8798 = vmatprep.subr.mxu1 %v10738_v20 }
 0x3fd   : > { %v10741_v47 = vpop.f32.mrf.mxu0 }
 0x3fe   : > { %12614 = vst [vmem:[#allocation33_spill] sm:$0xff] %v10741_v47 }
 0x3ff   : > { %v10743_v6 = vpop.f32.mrf.mxu0 }
 0x400   : > { %12615 = vst [vmem:[#allocation74_spill] sm:$0xff] %v10743_v6 }
 0x406   : > { %v10745_v63 = vpop.f32.mrf.mxu1 }
 0x407   : > { %12616 = vst [vmem:[#allocation71_spill] sm:$0xff] %v10745_v63 }
 0x408   : > { %v10749_v41 = vpop.f32.mrf.mxu1 }
 0x409   : > { %12618 = vst [vmem:[#allocation70_spill] sm:$0xff] %v10749_v41 }
 0x40d   : > { %v10747_v30 = vpop.f32.mrf.mxu0 }
 0x40e   : > { %12617 = vst [vmem:[#allocation72_spill] sm:$0xff] %v10747_v30 }
 0x40f   : > { %v10751_v45 = vpop.f32.mrf.mxu0 }
 0x410   : > { %12619 = vst [vmem:[#allocation73_spill] sm:$0xff] %v10751_v45 }
 0x415   : > { %v10753_v2 = vpop.f32.mrf.mxu1 }
 0x416   : > { %12620 = vst [vmem:[#allocation75_spill] sm:$0xff] %v10753_v2  ;;  %v10755_v5 = vpop.f32.mrf.mxu0 }
 0x417   : > { %12621 = vst [vmem:[#allocation76_spill] sm:$0xff] %v10755_v5  ;;  %v10757_v7 = vpop.f32.mrf.mxu1 }
 0x418   : > { %12622 = vst [vmem:[#allocation77_spill] sm:$0xff] %v10757_v7  ;;  %v10759_v62 = vpop.f32.mrf.mxu0 }
 0x419   : > { %12623 = vst [vmem:[#allocation78_spill] sm:$0xff] %v10759_v62 }
 0x41d   : > { %v10761_v49 = vpop.f32.mrf.mxu1 }
 0x41e   : > { %12624 = vst [vmem:[#allocation79_spill] sm:$0xff] %v10761_v49  ;;  %v10763_v54 = vpop.f32.mrf.mxu0 }
 0x41f   : > { %12625 = vst [vmem:[#allocation80_spill] sm:$0xff] %v10763_v54  ;;  %v10765_v51 = vpop.f32.mrf.mxu1 }
 0x420   : > { %12626 = vst [vmem:[#allocation81_spill] sm:$0xff] %v10765_v51  ;;  %v10767_v4 = vpop.f32.mrf.mxu0 }
 0x421   : > { %12627 = vst [vmem:[#allocation82_spill] sm:$0xff] %v10767_v4 }
 0x423   : > { %v10769_v35 = vpop.f32.mrf.mxu1 }
 0x424   : > { %12628 = vst [vmem:[#allocation83_spill] sm:$0xff] %v10769_v35 }
 0x425   : > { %v10777_v32 = vpop.f32.mrf.mxu1 }
 0x426   : > { %v8727_v0 = vpop.f32.mrf.mxu0  ;;  %12629 = vst [vmem:[#allocation84_spill] sm:$0xff] %v10777_v32 }
 0x427   : > { %v3220_v59 = vmul.f32 0.17677669, %v8727_v0 }
 0x428   : > { %v2573_v50 = vpop.f32.mrf.mxu0 }
 0x429   : > { %v3219_v55 = vmul.f32 0.17677669, %v2573_v50  ;;  %v10780_v43 = vadd.f32 %v10772_v12, %v3220_v59 }
 0x42b   : > { %v3257_v58 = vsel %vm1666_vm1, %v10780_v43, -inf  ;;  %v8734_v33 = vpop.f32.mrf.mxu1  ;;  %v10785_v26 = vadd.f32 %v10775_v29, %v3219_v55 }
 0x42c   : > { %3258 = vmax.xlane.f32.xlu1 %v3257_v58  ;;  %v3222_v16 = vmul.f32 0.17677669, %v8734_v33 }
 0x42d   : > { %v3254_v53 = vsel %vm1666_vm1, %v10785_v26, -inf  ;;  %v2664_v8 = vpop.f32.mrf.mxu1 }
 0x42e   : > { %3255 = vmax.xlane.f32.xlu0 %v3254_v53  ;;  %v3221_v36 = vmul.f32 0.17677669, %v2664_v8  ;;  %v8741_v39 = vpop.f32.mrf.mxu0  ;;  %v10790_v28 = vadd.f32 %v10772_v12, %v3222_v16 }
 0x42f   : > { %v3224_v10 = vmul.f32 0.17677669, %v8741_v39 }
 0x430   : > { %v2755_v14 = vpop.f32.mrf.mxu0  ;;  %v3263_v22 = vsel %vm1666_vm1, %v10790_v28, -inf  ;;  %v10798_v50 = vadd.f32 %v10775_v29, %v3221_v36 }
 0x431   : > { %v3223_v0 = vmul.f32 0.17677669, %v2755_v14  ;;  %v10795_v59 = vadd.f32 %v10772_v12, %v3224_v10 }
 0x432   : > { %3264 = vmax.xlane.f32.xlu0 %v3263_v22  ;;  %v3260_v16 = vsel %vm1666_vm1, %v10798_v50, -inf }
 0x433   : > { %v3269_v55 = vsel %vm1666_vm1, %v10795_v59, -inf  ;;  %v8748_v58 = vpop.f32.mrf.mxu1  ;;  %v10805_v8 = vadd.f32 %v10775_v29, %v3223_v0 }
 0x434   : > { %3270 = vmax.xlane.f32.xlu1 %v3269_v55  ;;  %v3226_v33 = vmul.f32 0.17677669, %v8748_v58 }
 0x435   : > { %v2846_v53 = vpop.f32.mrf.mxu1  ;;  %v3266_v55 = vsel %vm1666_vm1, %v10805_v8, -inf }
 0x436   : > { %3261 = vmax.xlane.f32.xlu0 %v3260_v16  ;;  %v8755_v39 = vpop.f32.mrf.mxu0  ;;  %v3225_v14 = vmul.f32 0.17677669, %v2846_v53  ;;  %v10813_v58 = vadd.f32 %v10772_v12, %v3226_v33 }
 0x437   : > { %v3228_v10 = vmul.f32 0.17677669, %v8755_v39 }
 0x438   : > { %v2937_v36 = vpop.f32.mrf.mxu0  ;;  %v10821_v53 = vadd.f32 %v10775_v29, %v3225_v14 }
 0x439   : > { %v10808_v22 = vadd.f32 %v10772_v12, %v3228_v10  ;;  %v3227_v32 = vmul.f32 0.17677669, %v2937_v36  ;;  %v3275_v10 = vsel %vm1666_vm1, %v10813_v58, -inf }
 0x43a   : > { %3267 = vmax.xlane.f32.xlu0 %v3266_v55  ;;  %v3272_v54 = vsel %vm1666_vm1, %v10821_v53, -inf }
 0x43b   : > { %v10816_v35 = vadd.f32 %v10775_v29, %v3227_v32  ;;  %v3281_v0 = vsel %vm1666_vm1, %v10808_v22, -inf  ;;  %v8762_v16 = vpop.f32.mrf.mxu1 }
 0x43c   : > { %3282 = vmax.xlane.f32.xlu1 %v3281_v0  ;;  %v3230_v39 = vmul.f32 0.17677669, %v8762_v16 }
 0x43d   : > { %v3028_v36 = vpop.f32.mrf.mxu1  ;;  %v3278_v32 = vsel %vm1666_vm1, %v10816_v35, -inf }
 0x43e   : > { %3276 = vmax.xlane.f32.xlu0 %v3275_v10  ;;  %v8769_v33 = vpop.f32.mrf.mxu0  ;;  %v10830_v0 = vadd.f32 %v10772_v12, %v3230_v39  ;;  %v3229_v14 = vmul.f32 0.17677669, %v3028_v36 }
 0x43f   : > { %v3232_v4 = vmul.f32 0.17677669, %v8769_v33 }
 0x440   : > { %3279 = vmax.xlane.f32.xlu1 %v3278_v32  ;;  %v3119_v55 = vpop.f32.mrf.mxu0  ;;  %v10841_v62 = vadd.f32 %v10775_v29, %v3229_v14  ;;  %v3287_v39 = vsel %vm1666_vm1, %v10830_v0, -inf }
 0x441   : > { %v10833_v16 = vadd.f32 %v10772_v12, %v3232_v4  ;;  %v3231_v51 = vmul.f32 0.17677669, %v3119_v55 }
 0x442   : > { %3273 = vmax.xlane.f32.xlu0 %v3272_v54  ;;  %v3284_v14 = vsel %vm1666_vm1, %v10841_v62, -inf }
 0x443   : > { %v10836_v10 = vadd.f32 %v10775_v29, %v3231_v51  ;;  %v3293_v33 = vsel %vm1666_vm1, %v10833_v16, -inf  ;;  %v8776_v32 = vpop.f32.mrf.mxu1 }
 0x444   : > { %3294 = vmax.xlane.f32.xlu1 %v3293_v33  ;;  %v3234_v49 = vmul.f32 0.17677669, %v8776_v32 }
 0x445   : > { %v3210_v36 = vpop.f32.mrf.mxu1  ;;  %v3290_v51 = vsel %vm1666_vm1, %v10836_v10, -inf }
 0x446   : > { %3288 = vmax.xlane.f32.xlu0 %v3287_v39  ;;  %v3233_v4 = vmul.f32 0.17677669, %v3210_v36  ;;  %v10846_v54 = vadd.f32 %v10772_v12, %v3234_v49  ;;  %v12630_v49 = vld [vmem:[#allocation31_spill] sm:$0xff]  ;;  %v12631_v12 = vld [vmem:[#allocation24_spill] sm:$0xff]  ;;  %v12633_v39 = vld [vmem:[#allocation37_spill] sm:$0xff] }
 0x447   : > { %v12634_v36 = vld [vmem:[#allocation39_spill] sm:$0xff] }
 0x448   : > { %3291 = vmax.xlane.f32.xlu1 %v3290_v51  ;;  %v10851_v55 = vadd.f32 %v10775_v29, %v3233_v4  ;;  %v3299_v33 = vsel %vm1666_vm1, %v10846_v54, -inf  ;;  %v12632_v29 = vld [vmem:[#allocation29_spill] sm:$0xff]  ;;  %v12635_v4 = vld [vmem:[#allocation34_spill] sm:$0xff]  ;;  %v10871_v51 = vpop.permute.xlu1 %3610 }
 0x44a   : > { %3285 = vmax.xlane.f32.xlu0 %v3284_v14  ;;  %v3296_v32 = vsel %vm1666_vm1, %v10851_v55, -inf }
 0x44c   : > { %3300 = vmax.xlane.f32.xlu1 %v3299_v33  ;;  %v10873_v14 = vpop.permute.xlu1 %3790 }
 0x44e   : > { %3297 = vmax.xlane.f32.xlu0 %v3296_v32  ;;  %v10877_v32 = vpop.permute.xlu0 %3699 }
 0x450   : > { %v10875_v33 = vpop.permute.xlu1 %3788 }
 0x452   : > { %v10881_v7 = vpop.permute.xlu0 %3879 }
 0x454   : > { %v10879_v5 = vpop.permute.xlu1 %3968 }
 0x455   : > { %12636 = vst [vmem:[#allocation29_spill] sm:$0xff] %v10879_v5 }
 0x456   : > { %v10885_v45 = vpop.permute.xlu0 %3877 }
 0x457   : > { %12638 = vst [vmem:[#allocation86_spill] sm:$0xff] %v10885_v45 }
 0x458   : > { %v10883_v2 = vpop.permute.xlu1 %3966 }
 0x459   : > { %12637 = vst [vmem:[#allocation85_spill] sm:$0xff] %v10883_v2 }
 0x45a   : > { %v10889_v41 = vpop.permute.xlu0 %4057 }
 0x45b   : > { %12640 = vst [vmem:[#allocation88_spill] sm:$0xff] %v10889_v41 }
 0x45c   : > { %v10887_v30 = vpop.permute.xlu1 %4148 }
 0x45d   : > { %4324 = vrot.lane.b32.xlu1 %v12630_v49, %s9742_s22  ;;  %12639 = vst [vmem:[#allocation87_spill] sm:$0xff] %v10887_v30 }
 0x45e   : > { %v10893_v6 = vpop.permute.xlu0 %4055 }
 0x45f   : > { %12642 = vst [vmem:[#allocation90_spill] sm:$0xff] %v10893_v6 }
 0x460   : > { %v10891_v63 = vpop.permute.xlu1 %4146 }
 0x461   : > { %4512 = vrot.lane.b32.xlu1 %v12631_v12, %s9742_s22  ;;  %12641 = vst [vmem:[#allocation89_spill] sm:$0xff] %v10891_v63 }
 0x462   : > { %v10897_v12 = vpop.permute.xlu0 %4239 }
 0x463   : > { %12644 = vst [vmem:[#allocation92_spill] sm:$0xff] %v10897_v12 }
 0x464   : > { %4235 = vrot.lane.b32.xlu0 %v12632_v29, %s9742_s22  ;;  %v10895_v47 = vpop.permute.xlu1 %4142 }
 0x465   : > { %4415 = vrot.lane.b32.xlu1 %v12633_v39, %s9742_s22  ;;  %12643 = vst [vmem:[#allocation91_spill] sm:$0xff] %v10895_v47 }
 0x466   : > { %v10901_v39 = vpop.permute.xlu0 %4237 }
 0x467   : > { %12646 = vst [vmem:[#allocation94_spill] sm:$0xff] %v10901_v39 }
 0x468   : > { %4419 = vrot.lane.b32.xlu0 %v12634_v36, %s9742_s22 }
 0x46a   : > { %v10905_v36 = vpop.permute.xlu0 %4144 }
 0x46b   : > { %12648 = vst [vmem:[#allocation96_spill] sm:$0xff] %v10905_v36 }
 0x46c   : > { %4326 = vrot.lane.b32.xlu0 %v12635_v4, %s9742_s22  ;;  %v10899_v4 = vpop.permute.xlu1 %4330 }
 0x46d   : > { %12645 = vst [vmem:[#allocation93_spill] sm:$0xff] %v10899_v4 }
 0x46e   : > { %v10909_v30 = vpop.permute.xlu0 %4328 }
 0x46f   : > { %12650 = vst [vmem:[#allocation98_spill] sm:$0xff] %v10909_v30 }
 0x470   : > { %v10903_v37 = vpop.permute.xlu1 %4233 }
 0x471   : > { %12647 = vst [vmem:[#allocation95_spill] sm:$0xff] %v10903_v37 }
 0x474   : > { %v10907_v49 = vpop.permute.xlu1 %4421 }
 0x475   : > { %12649 = vst [vmem:[#allocation97_spill] sm:$0xff] %v10907_v49 }
 0x4b5   : > { %v3259_v41 = vpop.xlane.xlu1 %3258 }
 0x4b6   : > { %v3303_v63 = vsub.f32 %v10780_v43, %v3259_v41 }
 0x4b7   : > { %v3256_v6 = vpop.xlane.xlu0 %3255 }
 0x4b8   : > { %v3320_v2 = vmul.f32 1.442695, %v3303_v63  ;;  %v3302_v47 = vsub.f32 %v10785_v26, %v3256_v6 }
 0x4ba   : > { %9289 = vpow2.f32 %v3320_v2  ;;  %v3318_v12 = vmul.f32 1.442695, %v3302_v47 }
 0x4bb   : > { %v3265_v4 = vpop.xlane.xlu0 %3264 }
 0x4bc   : > { %9291 = vpow2.f32 %v3318_v12  ;;  %v3305_v39 = vsub.f32 %v10790_v28, %v3265_v4 }
 0x4bd   : > { %v3271_v37 = vpop.xlane.xlu1 %3270 }
 0x4be   : > { %v3324_v45 = vmul.f32 1.442695, %v3305_v39  ;;  %v3307_v36 = vsub.f32 %v10795_v59, %v3271_v37 }
 0x4bf   : > { %v3262_v49 = vpop.xlane.xlu0 %3261 }
 0x4c0   : > { %9293 = vpow2.f32 %v3324_v45  ;;  %v3328_v30 = vmul.f32 1.442695, %v3307_v36  ;;  %v3304_v5 = vsub.f32 %v10798_v50, %v3262_v49 }
 0x4c2   : > { %9295 = vpow2.f32 %v3328_v30  ;;  %v3322_v41 = vmul.f32 1.442695, %v3304_v5 }
 0x4c3   : > { %v3268_v63 = vpop.xlane.xlu0 %3267 }
 0x4c4   : > { %9297 = vpow2.f32 %v3322_v41  ;;  %v3306_v6 = vsub.f32 %v10805_v8, %v3268_v63 }
 0x4c5   : > { %v3283_v47 = vpop.xlane.xlu1 %3282 }
 0x4c6   : > { %v3326_v2 = vmul.f32 1.442695, %v3306_v6  ;;  %v3311_v43 = vsub.f32 %v10808_v22, %v3283_v47 }
 0x4c7   : > { %v10918_v26 = vpop.eup %9289  ;;  %v3277_v28 = vpop.xlane.xlu0 %3276 }
 0x4c8   : > { %9299 = vpow2.f32 %v3326_v2  ;;  %v3336_v37 = vmul.f32 1.442695, %v3311_v43  ;;  %v3309_v45 = vsub.f32 %v10813_v58, %v3277_v28  ;;  %v3353_v59 = vsel %vm1666_vm1, %v10918_v26, 0.0 }
 0x4c9   : > { %v10923_v30 = vpop.eup %9291  ;;  %3354 = vadd.xlane.f32.xlu1 %v3353_v59  ;;  %v3280_v5 = vpop.xlane.xlu1 %3279 }
 0x4ca   : > { %9301 = vpow2.f32 %v3336_v37  ;;  %v3332_v50 = vmul.f32 1.442695, %v3309_v45  ;;  %v3310_v8 = vsub.f32 %v10816_v35, %v3280_v5  ;;  %v3350_v22 = vsel %vm1666_vm1, %v10923_v30, 0.0 }
 0x4cb   : > { %v3274_v49 = vpop.xlane.xlu0 %3273  ;;  %3351 = vadd.xlane.f32.xlu0 %v3350_v22 }
 0x4cc   : > { %9303 = vpow2.f32 %v3332_v50  ;;  %v3334_v12 = vmul.f32 1.442695, %v3310_v8  ;;  %v3308_v58 = vsub.f32 %v10821_v53, %v3274_v49 }
 0x4cd   : > { %v10929_v39 = vpop.eup %9293  ;;  %v3295_v36 = vpop.xlane.xlu1 %3294 }
 0x4ce   : > { %9305 = vpow2.f32 %v3334_v12  ;;  %v3330_v4 = vmul.f32 1.442695, %v3308_v58  ;;  %v3315_v41 = vsub.f32 %v10833_v16, %v3295_v36  ;;  %v3359_v63 = vsel %vm1666_vm1, %v10929_v39, 0.0 }
 0x4cf   : > { %v10934_v35 = vpop.eup %9295  ;;  %v3289_v6 = vpop.xlane.xlu0 %3288  ;;  %3360 = vadd.xlane.f32.xlu0 %v3359_v63 }
 0x4d0   : > { %9307 = vpow2.f32 %v3330_v4  ;;  %v3344_v47 = vmul.f32 1.442695, %v3315_v41  ;;  %v3313_v2 = vsub.f32 %v10830_v0, %v3289_v6  ;;  %v3365_v53 = vsel %vm1666_vm1, %v10934_v35, 0.0 }
 0x4d1   : > { %v10939_v43 = vpop.eup %9297  ;;  %3366 = vadd.xlane.f32.xlu1 %v3365_v53  ;;  %v3292_v28 = vpop.xlane.xlu1 %3291 }
 0x4d2   : > { %9309 = vpow2.f32 %v3344_v47  ;;  %v3340_v16 = vmul.f32 1.442695, %v3313_v2  ;;  %v3314_v37 = vsub.f32 %v10836_v10, %v3292_v28  ;;  %v3356_v45 = vsel %vm1666_vm1, %v10939_v43, 0.0 }
 0x4d3   : > { %v3286_v59 = vpop.xlane.xlu0 %3285  ;;  %3357 = vadd.xlane.f32.xlu0 %v3356_v45 }
 0x4d4   : > { %9311 = vpow2.f32 %v3340_v16  ;;  %v3342_v5 = vmul.f32 1.442695, %v3314_v37  ;;  %v3312_v0 = vsub.f32 %v10841_v62, %v3286_v59 }
 0x4d5   : > { %v10945_v50 = vpop.eup %9299  ;;  %v3301_v8 = vpop.xlane.xlu1 %3300 }
 0x4d6   : > { %9313 = vpow2.f32 %v3342_v5  ;;  %v3338_v22 = vmul.f32 1.442695, %v3312_v0  ;;  %v3317_v49 = vsub.f32 %v10846_v54, %v3301_v8  ;;  %v3362_v12 = vsel %vm1666_vm1, %v10945_v50, 0.0 }
 0x4d7   : > { %v10950_v10 = vpop.eup %9301  ;;  %v3298_v58 = vpop.xlane.xlu0 %3297  ;;  %3363 = vadd.xlane.f32.xlu1 %v3362_v12 }
 0x4d8   : > { %9315 = vpow2.f32 %v3338_v22  ;;  %v3348_v36 = vmul.f32 1.442695, %v3317_v49  ;;  %v3316_v4 = vsub.f32 %v10851_v55, %v3298_v58  ;;  %v3377_v54 = vsel %vm1666_vm1, %v10950_v10, 0.0  ;;  %v12651_v58 = vld [vmem:[#allocation38_spill] sm:$0xff] }
 0x4d9   : > { %v10953_v41 = vpop.eup %9303 }
 0x4da   : > { %9317 = vpow2.f32 %v3348_v36  ;;  %v3346_v62 = vmul.f32 1.442695, %v3316_v4  ;;  %v3371_v63 = vsel %vm1666_vm1, %v10953_v41, 0.0  ;;  %v12652_v36 = vld [vmem:[#allocation32_spill] sm:$0xff] }
 0x4db   : > { %v10959_v6 = vpop.eup %9305  ;;  %3372 = vadd.xlane.f32.xlu0 %v3371_v63  ;;  %3378 = vadd.xlane.f32.xlu1 %v3377_v54  ;;  %v12653_v4 = vld [vmem:[#allocation40_spill] sm:$0xff]  ;;  %v12655_v63 = vld [vmem:[#allocation47_spill] sm:$0xff] }
 0x4dc   : > { %9319 = vpow2.f32 %v3346_v62  ;;  %v3374_v2 = vsel %vm1666_vm1, %v10959_v6, 0.0  ;;  %v12654_v62 = vld [vmem:[#allocation35_spill] sm:$0xff] }
 0x4dd   : > { %v10961_v47 = vpop.eup %9307  ;;  %v12656_v54 = vld [vmem:[#allocation43_spill] sm:$0xff] }
 0x4de   : > { %v3368_v55 = vsel %vm1666_vm1, %v10961_v47, 0.0 }
 0x4df   : > { %v10967_v53 = vpop.eup %9309  ;;  %3369 = vadd.xlane.f32.xlu0 %v3368_v55  ;;  %3375 = vadd.xlane.f32.xlu1 %v3374_v2  ;;  %v12657_v55 = vld [vmem:[#allocation45_spill] sm:$0xff]  ;;  %v12658_v2 = vld [vmem:[#allocation26_spill] sm:$0xff] }
 0x4e0   : > { %v3389_v37 = vsel %vm1666_vm1, %v10967_v53, 0.0 }
 0x4e1   : > { %v10969_v28 = vpop.eup %9311 }
 0x4e2   : > { %v3383_v16 = vsel %vm1666_vm1, %v10969_v28, 0.0 }
 0x4e3   : > { %v10975_v45 = vpop.eup %9313  ;;  %3384 = vadd.xlane.f32.xlu0 %v3383_v16  ;;  %3390 = vadd.xlane.f32.xlu1 %v3389_v37  ;;  %v12659_v16 = vld [vmem:[#allocation23_spill] sm:$0xff]  ;;  %v12660_v37 = vld [vmem:[#allocation30_spill] sm:$0xff] }
 0x4e4   : > { %v3386_v0 = vsel %vm1666_vm1, %v10975_v45, 0.0 }
 0x4e5   : > { %v10977_v59 = vpop.eup %9315 }
 0x4e6   : > { %v3380_v5 = vsel %vm1666_vm1, %v10977_v59, 0.0 }
 0x4e7   : > { %v10983_v8 = vpop.eup %9317  ;;  %3381 = vadd.xlane.f32.xlu0 %v3380_v5  ;;  %3387 = vadd.xlane.f32.xlu1 %v3386_v0  ;;  %v11061_v5 = vpop.permute.xlu1 %4324 }
 0x4e8   : > { %v3395_v12 = vsel %vm1666_vm1, %v10983_v8, 0.0  ;;  %v11063_v0 = vpop.permute.xlu0 %4235 }
 0x4e9   : > { %v10985_v22 = vpop.eup %9319 }
 0x4ea   : > { %v3392_v49 = vsel %vm1666_vm1, %v10985_v22, 0.0 }
 0x4eb   : > { %3393 = vadd.xlane.f32.xlu0 %v3392_v49  ;;  %3396 = vadd.xlane.f32.xlu1 %v3395_v12  ;;  %v12661_v49 = vld [vmem:[#allocation22_spill] sm:$0xff]  ;;  %v12662_v12 = vld [vmem:[#allocation25_spill] sm:$0xff] }
 0x4fc   : > { %4603 = vrot.lane.b32.xlu1 %v10087_v44, %s9742_s22 }
 0x500   : > { %4506 = vrot.lane.b32.xlu1 %v10169_v1, %s9742_s22 }
 0x501   : > { %4510 = vrot.lane.b32.xlu0 %v10181_v3, %s9742_s22 }
 0x504   : > { %4694 = vrot.lane.b32.xlu1 %v10119_v52, %s9742_s22 }
 0x505   : > { %4417 = vrot.lane.b32.xlu0 %v10153_v61, %s9742_s22 }
 0x508   : > { %4597 = vrot.lane.b32.xlu1 %v10059_v38, %s9742_s22 }
 0x509   : > { %4601 = vrot.lane.b32.xlu0 %v10067_v40, %s9742_s22 }
 0x50c   : > { %4785 = vrot.lane.b32.xlu1 %v10151_v60, %s9742_s22 }
 0x50d   : > { %4508 = vrot.lane.b32.xlu0 %v10047_v34, %s9742_s22 }
 0x510   : > { %4688 = vrot.lane.b32.xlu1 %v10093_v46, %s9742_s22 }
 0x511   : > { %4692 = vrot.lane.b32.xlu0 %v10099_v48, %s9742_s22 }
 0x514   : > { %4783 = vrot.lane.b32.xlu1 %v10131_v56, %s9742_s22 }
 0x515   : > { %4599 = vrot.lane.b32.xlu0 %v10075_v42, %s9742_s22 }
 0x518   : > { %4781 = vrot.lane.b32.xlu1 %v12651_v58, %s9742_s22 }
 0x519   : > { %4690 = vrot.lane.b32.xlu0 %v12652_v36, %s9742_s22 }
 0x51c   : > { %5081 = vrot.lane.b32.xlu1 %v12653_v4, %s9742_s22 }
 0x51d   : > { %4779 = vrot.lane.b32.xlu0 %v12654_v62, %s9742_s22 }
 0x520   : > { %5170 = vrot.lane.b32.xlu1 %v12655_v63, %s9742_s22 }
 0x521   : > { %5083 = vrot.lane.b32.xlu0 %v12656_v54, %s9742_s22 }
 0x524   : > { %5257 = vrot.lane.b32.xlu1 %v10240_v11, %s9742_s22 }
 0x525   : > { %5168 = vrot.lane.b32.xlu0 %v12657_v55, %s9742_s22 }
 0x528   : > { %5255 = vrot.lane.b32.xlu1 %v10225_v9, %s9742_s22 }
 0x529   : > { %5344 = vrot.lane.b32.xlu0 %v10261_v15, %s9742_s22 }
 0x52c   : > { %5431 = vrot.lane.b32.xlu1 %v10271_v19, %s9742_s22 }
 0x52d   : > { %5342 = vrot.lane.b32.xlu0 %v10251_v13, %s9742_s22 }
 0x530   : > { %5429 = vrot.lane.b32.xlu1 %v10267_v17, %s9742_s22 }
 0x531   : > { %5518 = vrot.lane.b32.xlu0 %v10279_v23, %s9742_s22 }
 0x534   : > { %5605 = vrot.lane.b32.xlu1 %v10287_v27, %s9742_s22 }
 0x535   : > { %5516 = vrot.lane.b32.xlu0 %v10275_v21, %s9742_s22 }
 0x538   : > { %5603 = vrot.lane.b32.xlu1 %v10283_v25, %s9742_s22 }
 0x539   : > { %5692 = vrot.lane.b32.xlu0 %v10305_v24, %s9742_s22  ;;  %v12663_v24 = vld [vmem:[#allocation28_spill] sm:$0xff] }
 0x53c   : > { %5783 = vrot.lane.b32.xlu1 %v12658_v2, %s9743_s15  ;;  %v11069_v2 = vpop.permute.xlu1 %4512 }
 0x53d   : > { %5690 = vrot.lane.b32.xlu0 %v12599_v31, %s9742_s22  ;;  %v11075_v31 = vpop.permute.xlu0 %4419 }
 0x540   : > { %5781 = vrot.lane.b32.xlu1 %v12659_v16, %s9743_s15  ;;  %v12664_v16 = vld [vmem:[#allocation36_spill] sm:$0xff] }
 0x541   : > { %5874 = vrot.lane.b32.xlu0 %v12660_v37, %s9743_s15  ;;  %v12665_v37 = vld [vmem:[#allocation27_spill] sm:$0xff]  ;;  %v11083_v27 = vpop.permute.xlu0 %4326 }
 0x544   : > { %5777 = vrot.lane.b32.xlu1 %v12661_v49, %s9743_s15  ;;  %v11081_v49 = vpop.permute.xlu1 %4415 }
 0x545   : > { %5779 = vrot.lane.b32.xlu0 %v12662_v12, %s9743_s15 }
 0x548   : > { %5872 = vrot.lane.b32.xlu1 %v12663_v24, %s9743_s15 }
 0x549   : > { %5965 = vrot.lane.b32.xlu0 %v12664_v16, %s9743_s15 }
 0x54c   : > { %5868 = vrot.lane.b32.xlu1 %v12665_v37, %s9743_s15 }
 0x54d   : > { %5870 = vrot.lane.b32.xlu0 %v12632_v29, %s9743_s15 }
 0x550   : > { %5963 = vrot.lane.b32.xlu1 %v12607_v57, %s9743_s15 }
 0x552   : > { %v3355_v12 = vpop.xlane.xlu1 %3354 }
 0x553   : > { %9321 = vrcp.f32 %v3355_v12 }
 0x554   : > { %v3352_v24 = vpop.xlane.xlu0 %3351 }
 0x555   : > { %9323 = vrcp.f32 %v3352_v24 }
 0x558   : > { %v3361_v16 = vpop.xlane.xlu0 %3360 }
 0x559   : > { %9325 = vrcp.f32 %v3361_v16 }
 0x55a   : > { %v3367_v23 = vpop.xlane.xlu1 %3366 }
 0x55c   : > { %v3358_v25 = vpop.xlane.xlu0 %3357 }
 0x55d   : > { %9327 = vrcp.f32 %v3358_v25 }
 0x55e   : > { %9329 = vrcp.f32 %v3367_v23 }
 0x560   : > { %v3364_v37 = vpop.xlane.xlu1 %3363  ;;  %v9322_v21 = vpop.eup %9321 }
 0x561   : > { %9331 = vrcp.f32 %v3364_v37  ;;  %v3415_v57 = vmul.f32 %v9322_v21, %v10918_v26 }
 0x562   : > { %v9324_v29 = vpop.eup %9323 }
 0x563   : > { %v3414_v17 = vmul.f32 %v9324_v29, %v10923_v30 }
 0x564   : > { %v3373_v19 = vpop.xlane.xlu0 %3372  ;;  %v3379_v13 = vpop.xlane.xlu1 %3378 }
 0x565   : > { %8781 = vmatprep.mubr.msk.f32.mxu0 %vm1666_vm1, %v3414_v17  ;;  %9333 = vrcp.f32 %v3373_v19 }
 0x566   : > { %8782 = vmatmul.mubr.msk.f32.vlgmr.msra.gmra.mxu0 %vm1666_vm1, %v3415_v57  ;;  %9335 = vrcp.f32 %v3379_v13  ;;  %v9326_v12 = vpop.eup %9325 }
 0x567   : > { %8792 = vmatpush3.msra.mxu0 %v10734_v18  ;;  %v3417_v19 = vmul.f32 %v9326_v12, %v10929_v39 }
 0x568   : > { %8793 = vmatprep.subr.mxu0 %v10871_v51  ;;  %v3370_v23 = vpop.xlane.xlu0 %3369  ;;  %v3376_v25 = vpop.xlane.xlu1 %3375 }
 0x569   : > { %9337 = vrcp.f32 %v3370_v23  ;;  %8794 = vmatpush3.msra.mxu0 %v10871_v51 }
 0x56a   : > { %v9328_v30 = vpop.eup %9327  ;;  %9339 = vrcp.f32 %v3376_v25  ;;  %8805 = vmatprep.subr.mxu0 %v10873_v14 }
 0x56b   : > { %v3416_v17 = vmul.f32 %v9328_v30, %v10939_v43  ;;  %v9330_v18 = vpop.eup %9329 }
 0x56c   : > { %v3385_v21 = vpop.xlane.xlu0 %3384  ;;  %v3391_v26 = vpop.xlane.xlu1 %3390  ;;  %v3419_v16 = vmul.f32 %v9330_v18, %v10934_v35 }
 0x56d   : > { %8788 = vmatprep.mubr.msk.f32.mxu1 %vm1666_vm1, %v3416_v17  ;;  %9341 = vrcp.f32 %v3385_v21  ;;  %v12668_v21 = vld [vmem:[#allocation85_spill] sm:$0xff] }
 0x56e   : > { %v9332_v13 = vpop.eup %9331  ;;  %8789 = vmatmul.mubr.msk.f32.vlgmr.msra.gmra.mxu1 %vm1666_vm1, %v3417_v19  ;;  %9343 = vrcp.f32 %v3391_v26  ;;  %v12669_v26 = vld [vmem:[#allocation88_spill] sm:$0xff] }
 0x56f   : > { %8799 = vmatpush3.msra.mxu1 %v10738_v20  ;;  %v3418_v51 = vmul.f32 %v9332_v13, %v10945_v50 }
 0x570   : > { %8800 = vmatprep.subr.mxu1 %v10877_v32  ;;  %v3382_v24 = vpop.xlane.xlu0 %3381  ;;  %v3388_v43 = vpop.xlane.xlu1 %3387 }
 0x571   : > { %9345 = vrcp.f32 %v3382_v24  ;;  %8801 = vmatpush3.msra.mxu1 %v10877_v32  ;;  %8795 = vmatprep.mubr.msk.f32.mxu0 %vm1666_vm1, %v3418_v51  ;;  %v12666_v32 = vld [vmem:[#allocation29_spill] sm:$0xff] }
 0x572   : > { %9347 = vrcp.f32 %v3388_v43  ;;  %8812 = vmatprep.subr.mxu1 %v10881_v7  ;;  %8796 = vmatmul.mubr.msk.f32.vlgmr.msra.gmra.mxu0 %vm1666_vm1, %v3419_v16  ;;  %v9334_v20 = vpop.eup %9333 }
 0x573   : > { %8806 = vmatpush3.msra.mxu0 %v10873_v14  ;;  %v9336_v37 = vpop.eup %9335  ;;  %v3421_v12 = vmul.f32 %v9334_v20, %v10953_v41 }
 0x574   : > { %8807 = vmatprep.subr.mxu0 %v10875_v33  ;;  %v3394_v39 = vpop.xlane.xlu0 %3393  ;;  %v3397_v50 = vpop.xlane.xlu1 %3396  ;;  %v3423_v30 = vmul.f32 %v9336_v37, %v10950_v10  ;;  %v12672_v37 = vld [vmem:[#allocation89_spill] sm:$0xff] }
 0x575   : > { %9349 = vrcp.f32 %v3394_v39  ;;  %8808 = vmatpush3.msra.mxu0 %v10875_v33 }
 0x576   : > { %v9338_v35 = vpop.eup %9337  ;;  %9351 = vrcp.f32 %v3397_v50  ;;  %8819 = vmatprep.subr.mxu0 %v12666_v32 }
 0x577   : > { %v9340_v29 = vpop.eup %9339  ;;  %v3420_v57 = vmul.f32 %v9338_v35, %v10961_v47  ;;  %v12667_v47 = vld [vmem:[#allocation86_spill] sm:$0xff]  ;;  %v12673_v35 = vld [vmem:[#allocation91_spill] sm:$0xff] }
 0x578   : > { %v11112_v23 = vpop.permute.xlu0 %4510  ;;  %v11114_v25 = vpop.permute.xlu1 %4603  ;;  %v3422_v14 = vmul.f32 %v9340_v29, %v10959_v6  ;;  %v12675_v29 = vld [vmem:[#allocation94_spill] sm:$0xff] }
 0x579   : > { %8802 = vmatprep.mubr.msk.f32.mxu1 %vm1666_vm1, %v3420_v57  ;;  %v12676_v57 = vld [vmem:[#allocation95_spill] sm:$0xff] }
 0x57a   : > { %8809 = vmatprep.mubr.msk.f32.mxu0 %vm1666_vm1, %v3422_v14  ;;  %8803 = vmatmul.mubr.msk.f32.vlgmr.msra.gmra.mxu1 %vm1666_vm1, %v3421_v12  ;;  %v9342_v33 = vpop.eup %9341  ;;  %v12677_v14 = vld [vmem:[#allocation93_spill] sm:$0xff]  ;;  %v12678_v12 = vld [vmem:[#allocation96_spill] sm:$0xff] }
 0x57b   : > { %8810 = vmatmul.mubr.msk.f32.vlgmr.msra.gmra.mxu0 %vm1666_vm1, %v3423_v30  ;;  %8813 = vmatpush3.msra.mxu1 %v10881_v7  ;;  %v9344_v17 = vpop.eup %9343  ;;  %v12670_v7 = vld [vmem:[#allocation87_spill] sm:$0xff]  ;;  %v3425_v43 = vmul.f32 %v9342_v33, %v10969_v28  ;;  %v12671_v28 = vld [vmem:[#allocation90_spill] sm:$0xff] }
 0x57c   : > { %8820 = vmatpush3.msra.mxu0 %v12666_v32  ;;  %8814 = vmatprep.subr.mxu1 %v12667_v47  ;;  %v11126_v6 = vpop.permute.xlu0 %4417  ;;  %v4507_v41 = vpop.permute.xlu1 %4506  ;;  %v3427_v16 = vmul.f32 %v9344_v17, %v10967_v53  ;;  %v12680_v17 = vld [vmem:[#allocation97_spill] sm:$0xff] }
 0x57d   : > { %8821 = vmatprep.subr.mxu0 %v12668_v21  ;;  %8815 = vmatpush3.msra.mxu1 %v12667_v47  ;;  %v12679_v47 = vld [vmem:[#allocation98_spill] sm:$0xff] }
 0x57e   : > { %v9346_v10 = vpop.eup %9345  ;;  %8822 = vmatpush3.msra.mxu0 %v12668_v21  ;;  %8826 = vmatprep.subr.mxu1 %v12669_v26 }
 0x57f   : > { %v9348_v19 = vpop.eup %9347  ;;  %8833 = vmatprep.subr.msk.mxu0 %vm446_vm0, %v12670_v7  ;;  %v3424_v18 = vmul.f32 %v9346_v10, %v10977_v59 }
 0x580   : > { %v11135_v13 = vpop.permute.xlu0 %4601  ;;  %v11137_v51 = vpop.permute.xlu1 %4694  ;;  %v3426_v24 = vmul.f32 %v9348_v19, %v10975_v45 }
 0x581   : > { %8816 = vmatprep.mubr.msk.f32.mxu1 %vm1666_vm1, %v3424_v18 }
 0x582   : > { %v9350_v20 = vpop.eup %9349  ;;  %8823 = vmatprep.mubr.msk.f32.mxu0 %vm1666_vm1, %v3426_v24  ;;  %8817 = vmatmul.mubr.msk.f32.vlgmr.msra.gmra.mxu1 %vm1666_vm1, %v3425_v43 }
 0x583   : > { %v9352_v39 = vpop.eup %9351  ;;  %8824 = vmatmul.mubr.msk.f32.vlgmr.msra.gmra.mxu0 %vm1666_vm1, %v3427_v16  ;;  %8827 = vmatpush3.msra.mxu1 %v12669_v26  ;;  %v3428_v59 = vmul.f32 %v9350_v20, %v10985_v22  ;;  %v12674_v22 = vld [vmem:[#allocation92_spill] sm:$0xff] }
 0x584   : > { %8834 = vmatpush3.xpose.msk.msra.mxu0 %vm446_vm0, %v12670_v7  ;;  %8828 = vmatprep.subr.mxu1 %v12671_v28  ;;  %v4509_v45 = vpop.permute.xlu0 %4508  ;;  %v4598_v50 = vpop.permute.xlu1 %4597  ;;  %v3429_v53 = vmul.f32 %v9352_v39, %v10983_v8 }
 0x585   : > { %8835 = vmatprep.subr.msk.mxu0 %vm446_vm0, %v12672_v37  ;;  %8837 = vmatprep.mubr.msk.f32.mxu0 %vm446_vm0, %v12673_v35 }
 0x586   : > { %8829 = vmatpush3.msra.mxu1 %v12671_v28  ;;  %8830 = vmatprep.mubr.msk.f32.mxu1 %vm1666_vm1, %v3428_v59 }
 0x587   : > { %8840 = vmatprep.subr.msk.mxu1 %vm446_vm0, %v12674_v22  ;;  %8831 = vmatmul.mubr.msk.f32.vlgmr.msra.gmra.mxu1 %vm1666_vm1, %v3429_v53 }
 0x588   : > { %8836 = vmatpush3.xpose.msk.msra.mxu0 %vm446_vm0, %v12672_v37  ;;  %8841 = vmatpush3.xpose.msk.msra.mxu1 %vm446_vm0, %v12674_v22  ;;  %v4693_v8 = vpop.permute.xlu0 %4692  ;;  %v4786_v32 = vpop.permute.xlu1 %4785  ;;  %v11275_v22 = vld [vmem:[%s10300_s19 + $0x20] sm:$0xff] }
 0x589   : > { %8842 = vmatprep.subr.msk.mxu1 %vm446_vm0, %v12675_v29  ;;  %8844 = vmatprep.mubr.msk.f32.mxu1 %vm446_vm0, %v12676_v57 }
 0x58a   : > { %8847 = vmatprep.subr.msk.mxu0 %vm446_vm0, %v12677_v14 }
 0x58b   : > { %8838 = vmatmul.mubr.msk.f32.vlgmr.msra.gmra.mxu0 %vm446_vm0, %v12678_v12 }
 0x58c   : > { %8843 = vmatpush3.xpose.msk.msra.mxu1 %vm446_vm0, %v12675_v29  ;;  %8848 = vmatpush3.xpose.msk.msra.mxu0 %vm446_vm0, %v12677_v14  ;;  %v4600_v30 = vpop.permute.xlu0 %4599  ;;  %v4689_v33 = vpop.permute.xlu1 %4688 }
 0x58d   : > { %8851 = vmatprep.mubr.msk.f32.mxu0 %vm446_vm0, %v11061_v5  ;;  %8849 = vmatprep.subr.msk.mxu0 %vm446_vm0, %v12679_v47 }
 0x58e   : > { %8854 = vmatprep.subr.msk.mxu1 %vm446_vm0, %v12680_v17 }
 0x58f   : > { %8845 = vmatmul.mubr.msk.f32.vlgmr.msra.gmra.mxu1 %vm446_vm0, %v11063_v0 }
 0x590   : > { %8850 = vmatpush3.xpose.msk.msra.mxu0 %vm446_vm0, %v12679_v47  ;;  %8855 = vmatpush3.xpose.msk.msra.mxu1 %vm446_vm0, %v12680_v17  ;;  %v4784_v21 = vpop.permute.xlu1 %4783  ;;  %v4691_v5 = vpop.permute.xlu0 %4690 }
 0x591   : > { %8858 = vmatprep.mubr.msk.f32.mxu1 %vm446_vm0, %v11081_v49  ;;  %8856 = vmatprep.subr.msk.mxu1 %vm446_vm0, %v11075_v31 }
 0x592   : > { %8861 = vmatprep.subr.msk.mxu0 %vm446_vm0, %v11069_v2 }
 0x593   : > { %8852 = vmatmul.mubr.msk.f32.vlgmr.msra.gmra.mxu0 %vm446_vm0, %v11083_v27 }
 0x594   : > { %8857 = vmatpush3.xpose.msk.msra.mxu1 %vm446_vm0, %v11075_v31  ;;  %8862 = vmatpush3.xpose.msk.msra.mxu0 %vm446_vm0, %v11069_v2  ;;  %v4782_v0 = vpop.permute.xlu1 %4781  ;;  %v4780_v49 = vpop.permute.xlu0 %4779 }
 0x595   : > { %8865 = vmatprep.mubr.msk.f32.mxu0 %vm446_vm0, %v4507_v41  ;;  %8863 = vmatprep.subr.msk.mxu0 %vm446_vm0, %v11112_v23 }
 0x596   : > { %8868 = vmatprep.subr.msk.mxu1 %vm446_vm0, %v11114_v25 }
 0x597   : > { %8859 = vmatmul.mubr.msk.f32.vlgmr.msra.gmra.mxu1 %vm446_vm0, %v11126_v6 }
 0x598   : > { %8864 = vmatpush3.xpose.msk.msra.mxu0 %vm446_vm0, %v11112_v23  ;;  %8869 = vmatpush3.xpose.msk.msra.mxu1 %vm446_vm0, %v11114_v25  ;;  %v5082_v27 = vpop.permute.xlu1 %5081  ;;  %v5084_v31 = vpop.permute.xlu0 %5083 }
 0x599   : > { %8872 = vmatprep.mubr.msk.f32.mxu1 %vm446_vm0, %v4598_v50  ;;  %8870 = vmatprep.subr.msk.mxu1 %vm446_vm0, %v11135_v13  ;;  %v11270_v50 = vld [vmem:[%s10300_s19 + $0x28] sm:$0xff] }
 0x59a   : > { %8875 = vmatprep.subr.msk.mxu0 %vm446_vm0, %v11137_v51 }
 0x59b   : > { %8866 = vmatmul.mubr.msk.f32.vlgmr.msra.gmra.mxu0 %vm446_vm0, %v4509_v45 }
 0x59c   : > { %8871 = vmatpush3.xpose.msk.msra.mxu1 %vm446_vm0, %v11135_v13  ;;  %8876 = vmatpush3.xpose.msk.msra.mxu0 %vm446_vm0, %v11137_v51  ;;  %v5171_v2 = vpop.permute.xlu1 %5170  ;;  %v5169_v23 = vpop.permute.xlu0 %5168 }
 0x59d   : > { %8879 = vmatprep.mubr.msk.f32.mxu0 %vm446_vm0, %v4689_v33  ;;  %8877 = vmatprep.subr.msk.mxu0 %vm446_vm0, %v4693_v8 }
 0x59e   : > { %8882 = vmatprep.subr.msk.mxu1 %vm446_vm0, %v4786_v32 }
 0x59f   : > { %8873 = vmatmul.mubr.msk.f32.vlgmr.msra.gmra.mxu1 %vm446_vm0, %v4600_v30 }
 0x5a0   : > { %8878 = vmatpush3.xpose.msk.msra.mxu0 %vm446_vm0, %v4693_v8  ;;  %8883 = vmatpush3.xpose.msk.msra.mxu1 %vm446_vm0, %v4786_v32  ;;  %v11232_v25 = vpop.permute.xlu1 %5257  ;;  %v11236_v6 = vpop.permute.xlu0 %5344 }
 0x5a1   : > { %8886 = vmatprep.mubr.msk.f32.mxu1 %vm446_vm0, %v4780_v49  ;;  %8884 = vmatprep.subr.msk.mxu1 %vm446_vm0, %v4784_v21 }
 0x5a2   : > { %8889 = vmatprep.subr.mxu0 %v5084_v31 }
 0x5a3   : > { %8880 = vmatmul.mubr.msk.f32.vlgmr.msra.gmra.mxu0 %vm446_vm0, %v4691_v5 }
 0x5a4   : > { %8885 = vmatpush3.xpose.msk.msra.mxu1 %vm446_vm0, %v4784_v21  ;;  %8890 = vmatpush3.msra.mxu0 %v5084_v31 }
 0x5a5   : > { %8891 = vmatprep.subr.mxu0 %v5082_v27  ;;  %8896 = vmatprep.subr.mxu1 %v5171_v2 }
 0x5a6   : > { %8892 = vmatpush3.msra.mxu0 %v5082_v27 }
 0x5a7   : > { %8887 = vmatmul.mubr.msk.f32.vlgmr.msra.gmra.mxu1 %vm446_vm0, %v4782_v0  ;;  %8903 = vmatprep.subr.mxu0 %v11232_v25 }
 0x5a8   : > { %8897 = vmatpush3.msra.mxu1 %v5171_v2 }
 0x5a9   : > { %8898 = vmatprep.subr.mxu1 %v5169_v23 }
 0x5aa   : > { %8899 = vmatpush3.msra.mxu1 %v5169_v23 }
 0x5ab   : > { %8910 = vmatprep.subr.mxu1 %v11236_v6 }
 0x626   : > { %v11239_v41 = vpop.f32.mrf.mxu0 }
 0x627   : > { %12681 = vst [vmem:[#allocation38_spill] sm:$0xff] %v11239_v41 }
 0x628   : > { %v11243_v26 = vpop.f32.mrf.mxu0 }
 0x629   : > { %12683 = vst [vmem:[#allocation40_spill] sm:$0xff] %v11243_v26 }
 0x62e   : > { %v11241_v10 = vpop.f32.mrf.mxu1 }
 0x62f   : > { %12682 = vst [vmem:[#allocation32_spill] sm:$0xff] %v11241_v10 }
 0x630   : > { %v11247_v7 = vpop.f32.mrf.mxu1 }
 0x631   : > { %12685 = vst [vmem:[#allocation47_spill] sm:$0xff] %v11247_v7 }
 0x632   : > { %v11245_v19 = vpop.f32.mrf.mxu0 }
 0x633   : > { %12684 = vst [vmem:[#allocation35_spill] sm:$0xff] %v11245_v19 }
 0x634   : > { %v11251_v13 = vpop.f32.mrf.mxu0 }
 0x635   : > { %12687 = vst [vmem:[#allocation45_spill] sm:$0xff] %v11251_v13 }
 0x63a   : > { %v11249_v18 = vpop.f32.mrf.mxu1 }
 0x63b   : > { %12686 = vst [vmem:[#allocation43_spill] sm:$0xff] %v11249_v18  ;;  %v11253_v51 = vpop.f32.mrf.mxu0 }
 0x63c   : > { %12688 = vst [vmem:[#allocation26_spill] sm:$0xff] %v11253_v51  ;;  %v11255_v24 = vpop.f32.mrf.mxu1 }
 0x63d   : > { %12689 = vst [vmem:[#allocation23_spill] sm:$0xff] %v11255_v24  ;;  %v11259_v16 = vpop.f32.mrf.mxu0 }
 0x63e   : > { %12691 = vst [vmem:[#allocation22_spill] sm:$0xff] %v11259_v16 }
 0x642   : > { %v11257_v43 = vpop.f32.mrf.mxu1 }
 0x643   : > { %12690 = vst [vmem:[#allocation30_spill] sm:$0xff] %v11257_v43  ;;  %v11261_v20 = vpop.f32.mrf.mxu0 }
 0x644   : > { %12692 = vst [vmem:[#allocation25_spill] sm:$0xff] %v11261_v20  ;;  %v11263_v39 = vpop.f32.mrf.mxu1 }
 0x645   : > { %12693 = vst [vmem:[#allocation28_spill] sm:$0xff] %v11263_v39  ;;  %v11265_v59 = vpop.f32.mrf.mxu0 }
 0x646   : > { %12694 = vst [vmem:[#allocation36_spill] sm:$0xff] %v11265_v59 }
 0x647   : > { %v11267_v28 = vpop.f32.mrf.mxu1 }
 0x648   : > { %12695 = vst [vmem:[#allocation27_spill] sm:$0xff] %v11267_v28 }
 0x649   : > { %v11272_v37 = vpop.f32.mrf.mxu1 }
 0x64a   : > { %12696 = vst [vmem:[#allocation29_spill] sm:$0xff] %v11272_v37 }
 0x64b   : > { %v8839_v45 = vpop.f32.mrf.mxu0 }
 0x64c   : > { %v4871_v53 = vmul.f32 0.17677669, %v8839_v45 }
 0x64d   : > { %v4224_v35 = vpop.f32.mrf.mxu0 }
 0x64e   : > { %v11278_v8 = vadd.f32 %v11270_v50, %v4871_v53  ;;  %v4870_v32 = vmul.f32 0.17677669, %v4224_v35 }
 0x64f   : > { %v8846_v29 = vpop.f32.mrf.mxu1 }
 0x650   : > { %v11281_v57 = vadd.f32 %v11275_v22, %v4870_v32  ;;  %v4873_v14 = vmul.f32 0.17677669, %v8846_v29  ;;  %v4908_v12 = vsel %vm1666_vm1, %v11278_v8, -inf }
 0x651   : > { %4909 = vmax.xlane.f32.xlu1 %v4908_v12  ;;  %v4315_v30 = vpop.f32.mrf.mxu1 }
 0x652   : > { %v11286_v33 = vadd.f32 %v11270_v50, %v4873_v14  ;;  %v4872_v47 = vmul.f32 0.17677669, %v4315_v30  ;;  %v4905_v17 = vsel %vm1666_vm1, %v11281_v57, -inf }
 0x653   : > { %4906 = vmax.xlane.f32.xlu0 %v4905_v17  ;;  %v8853_v21 = vpop.f32.mrf.mxu0 }
 0x654   : > { %v4875_v5 = vmul.f32 0.17677669, %v8853_v21  ;;  %v11291_v49 = vadd.f32 %v11275_v22, %v4872_v47  ;;  %v4914_v2 = vsel %vm1666_vm1, %v11286_v33, -inf }
 0x655   : > { %v4406_v0 = vpop.f32.mrf.mxu0 }
 0x656   : > { %v11294_v27 = vadd.f32 %v11270_v50, %v4875_v5  ;;  %v4874_v31 = vmul.f32 0.17677669, %v4406_v0  ;;  %v4911_v29 = vsel %vm1666_vm1, %v11291_v49, -inf }
 0x657   : > { %4915 = vmax.xlane.f32.xlu0 %v4914_v2  ;;  %v8860_v23 = vpop.f32.mrf.mxu1 }
 0x658   : > { %v4920_v45 = vsel %vm1666_vm1, %v11294_v27, -inf  ;;  %v11301_v53 = vadd.f32 %v11275_v22, %v4874_v31  ;;  %v4877_v35 = vmul.f32 0.17677669, %v8860_v23 }
 0x659   : > { %4921 = vmax.xlane.f32.xlu1 %v4920_v45  ;;  %v4497_v32 = vpop.f32.mrf.mxu1 }
 0x65a   : > { %v4876_v30 = vmul.f32 0.17677669, %v4497_v32  ;;  %v11306_v17 = vadd.f32 %v11270_v50, %v4877_v35  ;;  %v4917_v0 = vsel %vm1666_vm1, %v11301_v53, -inf }
 0x65b   : > { %4912 = vmax.xlane.f32.xlu0 %v4911_v29  ;;  %v8867_v14 = vpop.f32.mrf.mxu0 }
 0x65c   : > { %v4879_v12 = vmul.f32 0.17677669, %v8867_v14  ;;  %v11319_v45 = vadd.f32 %v11275_v22, %v4876_v30  ;;  %v4926_v32 = vsel %vm1666_vm1, %v11306_v17, -inf }
 0x65d   : > { %v4588_v47 = vpop.f32.mrf.mxu0 }
 0x65e   : > { %v11309_v21 = vadd.f32 %v11270_v50, %v4879_v12  ;;  %v4878_v5 = vmul.f32 0.17677669, %v4588_v47 }
 0x65f   : > { %4918 = vmax.xlane.f32.xlu0 %v4917_v0  ;;  %v8874_v31 = vpop.f32.mrf.mxu1  ;;  %v4923_v0 = vsel %vm1666_vm1, %v11319_v45, -inf }
 0x660   : > { %v11314_v2 = vadd.f32 %v11275_v22, %v4878_v5  ;;  %v4932_v23 = vsel %vm1666_vm1, %v11309_v21, -inf  ;;  %v4881_v35 = vmul.f32 0.17677669, %v8874_v31 }
 0x661   : > { %4933 = vmax.xlane.f32.xlu1 %v4932_v23  ;;  %v4679_v29 = vpop.f32.mrf.mxu1 }
 0x662   : > { %v4929_v47 = vsel %vm1666_vm1, %v11314_v2, -inf  ;;  %v11328_v30 = vadd.f32 %v11270_v50, %v4881_v35  ;;  %v4880_v23 = vmul.f32 0.17677669, %v4679_v29 }
 0x663   : > { %4927 = vmax.xlane.f32.xlu0 %v4926_v32  ;;  %v8881_v14 = vpop.f32.mrf.mxu0 }
 0x664   : > { %v4883_v12 = vmul.f32 0.17677669, %v8881_v14  ;;  %v11339_v20 = vadd.f32 %v11275_v22, %v4880_v23  ;;  %v4938_v29 = vsel %vm1666_vm1, %v11328_v30, -inf }
 0x665   : > { %4930 = vmax.xlane.f32.xlu1 %v4929_v47  ;;  %v4770_v5 = vpop.f32.mrf.mxu0 }
 0x666   : > { %v11331_v31 = vadd.f32 %v11270_v50, %v4883_v12  ;;  %v4882_v37 = vmul.f32 0.17677669, %v4770_v5 }
 0x667   : > { %4924 = vmax.xlane.f32.xlu0 %v4923_v0  ;;  %v8888_v32 = vpop.f32.mrf.mxu1  ;;  %v4935_v0 = vsel %vm1666_vm1, %v11339_v20, -inf }
 0x668   : > { %v11334_v14 = vadd.f32 %v11275_v22, %v4882_v37  ;;  %v4885_v28 = vmul.f32 0.17677669, %v8888_v32  ;;  %v4944_v47 = vsel %vm1666_vm1, %v11331_v31, -inf  ;;  %v12700_v32 = vld [vmem:[#allocation37_spill] sm:$0xff] }
 0x669   : > { %4945 = vmax.xlane.f32.xlu1 %v4944_v47  ;;  %v4861_v59 = vpop.f32.mrf.mxu1  ;;  %v12701_v47 = vld [vmem:[#allocation34_spill] sm:$0xff] }
 0x66a   : > { %v4884_v35 = vmul.f32 0.17677669, %v4861_v59  ;;  %v11344_v12 = vadd.f32 %v11270_v50, %v4885_v28  ;;  %v4941_v37 = vsel %vm1666_vm1, %v11334_v14, -inf  ;;  %v12697_v28 = vld [vmem:[#allocation31_spill] sm:$0xff] }
 0x66b   : > { %4939 = vmax.xlane.f32.xlu0 %v4938_v29  ;;  %v12698_v50 = vld [vmem:[#allocation39_spill] sm:$0xff]  ;;  %v11369_v29 = vpop.permute.xlu1 %5255 }
 0x66c   : > { %v11349_v5 = vadd.f32 %v11275_v22, %v4884_v35  ;;  %v4950_v59 = vsel %vm1666_vm1, %v11344_v12, -inf  ;;  %v12699_v22 = vld [vmem:[#allocation41_spill] sm:$0xff]  ;;  %v12702_v35 = vld [vmem:[#allocation24_spill] sm:$0xff] }
 0x66d   : > { %4942 = vmax.xlane.f32.xlu1 %v4941_v37 }
 0x66e   : > { %v4947_v23 = vsel %vm1666_vm1, %v11349_v5, -inf }
 0x66f   : > { %4936 = vmax.xlane.f32.xlu0 %v4935_v0  ;;  %v11371_v37 = vpop.permute.xlu1 %5431 }
 0x671   : > { %4951 = vmax.xlane.f32.xlu1 %v4950_v59  ;;  %v11375_v59 = vpop.permute.xlu0 %5342 }
 0x673   : > { %4948 = vmax.xlane.f32.xlu0 %v4947_v23  ;;  %v11373_v0 = vpop.permute.xlu1 %5429 }
 0x677   : > { %v11377_v23 = vpop.permute.xlu1 %5605 }
 0x682   : > { %5959 = vrot.lane.b32.xlu1 %v12697_v28, %s9743_s15  ;;  %v11379_v28 = vpop.permute.xlu0 %5518 }
 0x686   : > { %6054 = vrot.lane.b32.xlu1 %v12698_v50, %s9743_s15  ;;  %v11381_v50 = vpop.permute.xlu1 %5603 }
 0x689   : > { %6056 = vrot.lane.b32.xlu0 %v12699_v22, %s9743_s15  ;;  %v11383_v22 = vpop.permute.xlu0 %5516 }
 0x68a   : > { %6050 = vrot.lane.b32.xlu1 %v12700_v32, %s9743_s15  ;;  %v11385_v32 = vpop.permute.xlu1 %5783 }
 0x68b   : > { %12703 = vst [vmem:[#allocation86_spill] sm:$0xff] %v11385_v32 }
 0x68d   : > { %5961 = vrot.lane.b32.xlu0 %v12701_v47, %s9743_s15  ;;  %v11387_v47 = vpop.permute.xlu0 %5692 }
 0x691   : > { %6147 = vrot.lane.b32.xlu0 %v12702_v35, %s9743_s15  ;;  %v11389_v35 = vpop.permute.xlu1 %5781  ;;  %v11391_v39 = vpop.permute.xlu0 %5690 }
 0x692   : > { %12704 = vst [vmem:[#allocation85_spill] sm:$0xff] %v11389_v35  ;;  %12705 = vst [vmem:[#allocation88_spill] sm:$0xff] %v11391_v39 }
 0x695   : > { %v11393_v43 = vpop.permute.xlu1 %5777  ;;  %v11395_v16 = vpop.permute.xlu0 %5874 }
 0x696   : > { %12706 = vst [vmem:[#allocation87_spill] sm:$0xff] %v11393_v43  ;;  %12707 = vst [vmem:[#allocation90_spill] sm:$0xff] %v11395_v16 }
 0x699   : > { %v11397_v51 = vpop.permute.xlu1 %5872  ;;  %v11399_v24 = vpop.permute.xlu0 %5779 }
 0x69a   : > { %12708 = vst [vmem:[#allocation89_spill] sm:$0xff] %v11397_v51  ;;  %12709 = vst [vmem:[#allocation91_spill] sm:$0xff] %v11399_v24 }
 0x69d   : > { %v11401_v18 = vpop.permute.xlu1 %5868  ;;  %v11403_v13 = vpop.permute.xlu0 %5965 }
 0x69e   : > { %12710 = vst [vmem:[#allocation92_spill] sm:$0xff] %v11401_v18  ;;  %12711 = vst [vmem:[#allocation94_spill] sm:$0xff] %v11403_v13 }
 0x6a1   : > { %v11405_v19 = vpop.permute.xlu1 %5963  ;;  %v11407_v7 = vpop.permute.xlu0 %5870 }
 0x6a2   : > { %12712 = vst [vmem:[#allocation95_spill] sm:$0xff] %v11405_v19  ;;  %12713 = vst [vmem:[#allocation93_spill] sm:$0xff] %v11407_v7 }
 0x6da   : > { %v4910_v10 = vpop.xlane.xlu1 %4909 }
 0x6db   : > { %v4954_v26 = vsub.f32 %v11278_v8, %v4910_v10 }
 0x6dc   : > { %v4907_v41 = vpop.xlane.xlu0 %4906 }
 0x6dd   : > { %v4971_v35 = vmul.f32 1.442695, %v4954_v26  ;;  %v4953_v43 = vsub.f32 %v11281_v57, %v4907_v41 }
 0x6df   : > { %9353 = vpow2.f32 %v4971_v35  ;;  %v4969_v16 = vmul.f32 1.442695, %v4953_v43 }
 0x6e0   : > { %v4916_v51 = vpop.xlane.xlu0 %4915 }
 0x6e1   : > { %9355 = vpow2.f32 %v4969_v16  ;;  %v4956_v24 = vsub.f32 %v11286_v33, %v4916_v51 }
 0x6e2   : > { %v4922_v18 = vpop.xlane.xlu1 %4921 }
 0x6e3   : > { %v4975_v39 = vmul.f32 1.442695, %v4956_v24  ;;  %v4958_v13 = vsub.f32 %v11294_v27, %v4922_v18 }
 0x6e4   : > { %v4913_v19 = vpop.xlane.xlu0 %4912 }
 0x6e5   : > { %9357 = vpow2.f32 %v4975_v39  ;;  %v4979_v7 = vmul.f32 1.442695, %v4958_v13  ;;  %v4955_v32 = vsub.f32 %v11291_v49, %v4913_v19 }
 0x6e7   : > { %9359 = vpow2.f32 %v4979_v7  ;;  %v4973_v10 = vmul.f32 1.442695, %v4955_v32 }
 0x6e8   : > { %v4919_v26 = vpop.xlane.xlu0 %4918 }
 0x6e9   : > { %9361 = vpow2.f32 %v4973_v10  ;;  %v4957_v41 = vsub.f32 %v11301_v53, %v4919_v26 }
 0x6ea   : > { %v4934_v43 = vpop.xlane.xlu1 %4933 }
 0x6eb   : > { %v4977_v8 = vmul.f32 1.442695, %v4957_v41  ;;  %v4962_v16 = vsub.f32 %v11309_v21, %v4934_v43 }
 0x6ec   : > { %v11416_v51 = vpop.eup %9353  ;;  %v4928_v24 = vpop.xlane.xlu0 %4927 }
 0x6ed   : > { %9363 = vpow2.f32 %v4977_v8  ;;  %v4987_v18 = vmul.f32 1.442695, %v4962_v16  ;;  %v4960_v39 = vsub.f32 %v11306_v17, %v4928_v24  ;;  %v5004_v19 = vsel %vm1666_vm1, %v11416_v51, 0.0 }
 0x6ee   : > { %v11421_v7 = vpop.eup %9355  ;;  %5005 = vadd.xlane.f32.xlu1 %v5004_v19  ;;  %v4931_v13 = vpop.xlane.xlu1 %4930 }
 0x6ef   : > { %9365 = vpow2.f32 %v4987_v18  ;;  %v4983_v57 = vmul.f32 1.442695, %v4960_v39  ;;  %v4961_v33 = vsub.f32 %v11314_v2, %v4931_v13  ;;  %v5001_v49 = vsel %vm1666_vm1, %v11421_v7, 0.0 }
 0x6f0   : > { %v4925_v27 = vpop.xlane.xlu0 %4924  ;;  %5002 = vadd.xlane.f32.xlu0 %v5001_v49 }
 0x6f1   : > { %9367 = vpow2.f32 %v4983_v57  ;;  %v4985_v53 = vmul.f32 1.442695, %v4961_v33  ;;  %v4959_v17 = vsub.f32 %v11319_v45, %v4925_v27 }
 0x6f2   : > { %v11427_v21 = vpop.eup %9357  ;;  %v4946_v32 = vpop.xlane.xlu1 %4945 }
 0x6f3   : > { %9369 = vpow2.f32 %v4985_v53  ;;  %v4981_v35 = vmul.f32 1.442695, %v4959_v17  ;;  %v4966_v10 = vsub.f32 %v11331_v31, %v4946_v32  ;;  %v5010_v26 = vsel %vm1666_vm1, %v11427_v21, 0.0 }
 0x6f4   : > { %v11432_v2 = vpop.eup %9359  ;;  %v4940_v41 = vpop.xlane.xlu0 %4939  ;;  %5011 = vadd.xlane.f32.xlu0 %v5010_v26 }
 0x6f5   : > { %9371 = vpow2.f32 %v4981_v35  ;;  %v4995_v43 = vmul.f32 1.442695, %v4966_v10  ;;  %v4964_v8 = vsub.f32 %v11328_v30, %v4940_v41  ;;  %v5016_v45 = vsel %vm1666_vm1, %v11432_v2, 0.0 }
 0x6f6   : > { %v11437_v16 = vpop.eup %9361  ;;  %5017 = vadd.xlane.f32.xlu1 %v5016_v45  ;;  %v4943_v24 = vpop.xlane.xlu1 %4942 }
 0x6f7   : > { %9373 = vpow2.f32 %v4995_v43  ;;  %v4991_v31 = vmul.f32 1.442695, %v4964_v8  ;;  %v4965_v18 = vsub.f32 %v11334_v14, %v4943_v24  ;;  %v5007_v39 = vsel %vm1666_vm1, %v11437_v16, 0.0 }
 0x6f8   : > { %v4937_v19 = vpop.xlane.xlu0 %4936  ;;  %5008 = vadd.xlane.f32.xlu0 %v5007_v39 }
 0x6f9   : > { %9375 = vpow2.f32 %v4991_v31  ;;  %v4993_v13 = vmul.f32 1.442695, %v4965_v18  ;;  %v4963_v30 = vsub.f32 %v11339_v20, %v4937_v19 }
 0x6fa   : > { %v11443_v57 = vpop.eup %9363  ;;  %v4952_v33 = vpop.xlane.xlu1 %4951 }
 0x6fb   : > { %9377 = vpow2.f32 %v4993_v13  ;;  %v4989_v49 = vmul.f32 1.442695, %v4963_v30  ;;  %v4968_v27 = vsub.f32 %v11344_v12, %v4952_v33  ;;  %v5013_v53 = vsel %vm1666_vm1, %v11443_v57, 0.0 }
 0x6fc   : > { %v11448_v14 = vpop.eup %9365  ;;  %v4949_v17 = vpop.xlane.xlu0 %4948  ;;  %5014 = vadd.xlane.f32.xlu1 %v5013_v53 }
 0x6fd   : > { %9379 = vpow2.f32 %v4989_v49  ;;  %v4999_v32 = vmul.f32 1.442695, %v4968_v27  ;;  %v4967_v35 = vsub.f32 %v11349_v5, %v4949_v17  ;;  %v5028_v12 = vsel %vm1666_vm1, %v11448_v14, 0.0 }
 0x6fe   : > { %v11451_v10 = vpop.eup %9367 }
 0x6ff   : > { %9381 = vpow2.f32 %v4999_v32  ;;  %v4997_v20 = vmul.f32 1.442695, %v4967_v35  ;;  %v5022_v26 = vsel %vm1666_vm1, %v11451_v10, 0.0 }
 0x700   : > { %v11457_v41 = vpop.eup %9369  ;;  %5023 = vadd.xlane.f32.xlu0 %v5022_v26  ;;  %5029 = vadd.xlane.f32.xlu1 %v5028_v12 }
 0x701   : > { %9383 = vpow2.f32 %v4997_v20  ;;  %v5025_v8 = vsel %vm1666_vm1, %v11457_v41, 0.0 }
 0x702   : > { %v11459_v43 = vpop.eup %9371 }
 0x703   : > { %v5019_v5 = vsel %vm1666_vm1, %v11459_v43, 0.0 }
 0x704   : > { %v11465_v45 = vpop.eup %9373  ;;  %5020 = vadd.xlane.f32.xlu0 %v5019_v5  ;;  %5026 = vadd.xlane.f32.xlu1 %v5025_v8 }
 0x705   : > { %v5040_v18 = vsel %vm1666_vm1, %v11465_v45, 0.0 }
 0x706   : > { %v11467_v24 = vpop.eup %9375 }
 0x707   : > { %v5034_v31 = vsel %vm1666_vm1, %v11467_v24, 0.0 }
 0x708   : > { %v11473_v39 = vpop.eup %9377  ;;  %5035 = vadd.xlane.f32.xlu0 %v5034_v31  ;;  %5041 = vadd.xlane.f32.xlu1 %v5040_v18 }
 0x709   : > { %v5037_v30 = vsel %vm1666_vm1, %v11473_v39, 0.0 }
 0x70a   : > { %v11475_v19 = vpop.eup %9379 }
 0x70b   : > { %v5031_v13 = vsel %vm1666_vm1, %v11475_v19, 0.0 }
 0x70c   : > { %v11481_v33 = vpop.eup %9381  ;;  %5032 = vadd.xlane.f32.xlu0 %v5031_v13  ;;  %5038 = vadd.xlane.f32.xlu1 %v5037_v30 }
 0x70d   : > { %v5046_v53 = vsel %vm1666_vm1, %v11481_v33, 0.0 }
 0x70e   : > { %v11483_v49 = vpop.eup %9383 }
 0x70f   : > { %v5043_v27 = vsel %vm1666_vm1, %v11483_v49, 0.0 }
 0x710   : > { %5044 = vadd.xlane.f32.xlu0 %v5043_v27  ;;  %5047 = vadd.xlane.f32.xlu1 %v5046_v53 }
 0x721   : > { %6145 = vrot.lane.b32.xlu1 %v10181_v3, %s9743_s15 }
 0x725   : > { %6141 = vrot.lane.b32.xlu1 %v10169_v1, %s9743_s15 }
 0x726   : > { %6052 = vrot.lane.b32.xlu0 %v10153_v61, %s9743_s15 }
 0x729   : > { %6236 = vrot.lane.b32.xlu1 %v10067_v40, %s9743_s15  ;;  %v12716_v40 = vld [vmem:[#allocation54_spill] sm:$0xff] }
 0x72a   : > { %6238 = vrot.lane.b32.xlu0 %v10087_v44, %s9743_s15  ;;  %v11543_v44 = vpop.permute.xlu0 %6056 }
 0x72d   : > { %6232 = vrot.lane.b32.xlu1 %v10059_v38, %s9743_s15  ;;  %v12715_v38 = vld [vmem:[#allocation56_spill] sm:$0xff] }
 0x72e   : > { %6143 = vrot.lane.b32.xlu0 %v10047_v34, %s9743_s15  ;;  %v12714_v34 = vld [vmem:[#allocation51_spill] sm:$0xff] }
 0x731   : > { %6327 = vrot.lane.b32.xlu1 %v10099_v48, %s9743_s15  ;;  %v11547_v48 = vpop.permute.xlu0 %5961 }
 0x732   : > { %6329 = vrot.lane.b32.xlu0 %v10119_v52, %s9743_s15 }
 0x735   : > { %6323 = vrot.lane.b32.xlu1 %v10093_v46, %s9743_s15 }
 0x736   : > { %6234 = vrot.lane.b32.xlu0 %v10075_v42, %s9743_s15  ;;  %v11541_v42 = vpop.permute.xlu1 %5959 }
 0x739   : > { %6418 = vrot.lane.b32.xlu1 %v10131_v56, %s9743_s15  ;;  %v11551_v56 = vpop.permute.xlu0 %6147 }
 0x73a   : > { %6420 = vrot.lane.b32.xlu0 %v10151_v60, %s9743_s15  ;;  %v11545_v46 = vpop.permute.xlu1 %6054 }
 0x73d   : > { %6416 = vrot.lane.b32.xlu1 %v12651_v58, %s9743_s15 }
 0x73e   : > { %6325 = vrot.lane.b32.xlu0 %v12652_v36, %s9743_s15  ;;  %v11549_v52 = vpop.permute.xlu1 %6050 }
 0x741   : > { %6716 = vrot.lane.b32.xlu1 %v12653_v4, %s9743_s15 }
 0x742   : > { %6414 = vrot.lane.b32.xlu0 %v12654_v62, %s9743_s15 }
 0x745   : > { %6803 = vrot.lane.b32.xlu1 %v12657_v55, %s9743_s15 }
 0x746   : > { %6718 = vrot.lane.b32.xlu0 %v12656_v54, %s9743_s15 }
 0x749   : > { %6892 = vrot.lane.b32.xlu1 %v10240_v11, %s9743_s15 }
 0x74a   : > { %6805 = vrot.lane.b32.xlu0 %v12655_v63, %s9743_s15 }
 0x74d   : > { %6890 = vrot.lane.b32.xlu1 %v10225_v9, %s9743_s15 }
 0x74e   : > { %6979 = vrot.lane.b32.xlu0 %v10261_v15, %s9743_s15 }
 0x751   : > { %6977 = vrot.lane.b32.xlu1 %v12714_v34, %s9743_s15 }
 0x752   : > { %7066 = vrot.lane.b32.xlu0 %v12715_v38, %s9743_s15 }
 0x755   : > { %7064 = vrot.lane.b32.xlu1 %v12716_v40, %s9743_s15 }
 0x777   : > { %v5006_v60 = vpop.xlane.xlu1 %5005 }
 0x778   : > { %9385 = vrcp.f32 %v5006_v60 }
 0x779   : > { %v5003_v61 = vpop.xlane.xlu0 %5002 }
 0x77a   : > { %9387 = vrcp.f32 %v5003_v61 }
 0x77d   : > { %v5012_v1 = vpop.xlane.xlu0 %5011 }
 0x77e   : > { %9389 = vrcp.f32 %v5012_v1 }
 0x77f   : > { %v5018_v3 = vpop.xlane.xlu1 %5017 }
 0x781   : > { %v5009_v9 = vpop.xlane.xlu0 %5008 }
 0x782   : > { %9391 = vrcp.f32 %v5009_v9  ;;  %v12720_v9 = vld [vmem:[#allocation87_spill] sm:$0xff] }
 0x783   : > { %9393 = vrcp.f32 %v5018_v3  ;;  %v12719_v3 = vld [vmem:[#allocation85_spill] sm:$0xff] }
 0x785   : > { %v5015_v11 = vpop.xlane.xlu1 %5014  ;;  %v9386_v15 = vpop.eup %9385 }
 0x786   : > { %9395 = vrcp.f32 %v5015_v11  ;;  %v5066_v63 = vmul.f32 %v9386_v15, %v11416_v51  ;;  %v12722_v11 = vld [vmem:[#allocation89_spill] sm:$0xff]  ;;  %v12723_v15 = vld [vmem:[#allocation92_spill] sm:$0xff] }
 0x787   : > { %v9388_v58 = vpop.eup %9387 }
 0x788   : > { %v5065_v36 = vmul.f32 %v9388_v58, %v11421_v7  ;;  %v12724_v58 = vld [vmem:[#allocation94_spill] sm:$0xff] }
 0x789   : > { %v5024_v4 = vpop.xlane.xlu0 %5023  ;;  %v5030_v62 = vpop.xlane.xlu1 %5029 }
 0x78a   : > { %8893 = vmatprep.mubr.msk.f32.mxu0 %vm1666_vm1, %v5065_v36  ;;  %9397 = vrcp.f32 %v5024_v4  ;;  %v12725_v36 = vld [vmem:[#allocation91_spill] sm:$0xff] }
 0x78b   : > { %8894 = vmatmul.mubr.msk.f32.vlgmr.msra.gmra.mxu0 %vm1666_vm1, %v5066_v63  ;;  %9399 = vrcp.f32 %v5030_v62  ;;  %v9390_v17 = vpop.eup %9389  ;;  %v12726_v63 = vld [vmem:[#allocation95_spill] sm:$0xff] }
 0x78c   : > { %8904 = vmatpush3.msra.mxu0 %v11232_v25  ;;  %v5068_v20 = vmul.f32 %v9390_v17, %v11427_v21 }
 0x78d   : > { %8905 = vmatprep.subr.mxu0 %v11369_v29  ;;  %v5021_v54 = vpop.xlane.xlu0 %5020  ;;  %v5027_v55 = vpop.xlane.xlu1 %5026 }
 0x78e   : > { %9401 = vrcp.f32 %v5021_v54  ;;  %8906 = vmatpush3.msra.mxu0 %v11369_v29  ;;  %v12727_v54 = vld [vmem:[#allocation93_spill] sm:$0xff] }
 0x78f   : > { %v9392_v7 = vpop.eup %9391  ;;  %9403 = vrcp.f32 %v5027_v55  ;;  %8917 = vmatprep.subr.mxu0 %v11371_v37 }
 0x790   : > { %v5067_v51 = vmul.f32 %v9392_v7, %v11437_v16  ;;  %v9394_v25 = vpop.eup %9393 }
 0x791   : > { %v5036_v32 = vpop.xlane.xlu0 %5035  ;;  %v5042_v35 = vpop.xlane.xlu1 %5041  ;;  %v5070_v5 = vmul.f32 %v9394_v25, %v11432_v2 }
 0x792   : > { %8900 = vmatprep.mubr.msk.f32.mxu1 %vm1666_vm1, %v5067_v51  ;;  %9405 = vrcp.f32 %v5036_v32 }
 0x793   : > { %v9396_v26 = vpop.eup %9395  ;;  %8901 = vmatmul.mubr.msk.f32.vlgmr.msra.gmra.mxu1 %vm1666_vm1, %v5068_v20  ;;  %9407 = vrcp.f32 %v5042_v35 }
 0x794   : > { %8911 = vmatpush3.msra.mxu1 %v11236_v6  ;;  %v5069_v29 = vmul.f32 %v9396_v26, %v11443_v57 }
 0x795   : > { %8912 = vmatprep.subr.mxu1 %v11375_v59  ;;  %v5033_v12 = vpop.xlane.xlu0 %5032  ;;  %v5039_v16 = vpop.xlane.xlu1 %5038 }
 0x796   : > { %9409 = vrcp.f32 %v5033_v12  ;;  %8913 = vmatpush3.msra.mxu1 %v11375_v59  ;;  %8907 = vmatprep.mubr.msk.f32.mxu0 %vm1666_vm1, %v5069_v29 }
 0x797   : > { %9411 = vrcp.f32 %v5039_v16  ;;  %8924 = vmatprep.subr.mxu1 %v11379_v28  ;;  %8908 = vmatmul.mubr.msk.f32.vlgmr.msra.gmra.mxu0 %vm1666_vm1, %v5070_v5  ;;  %v9398_v6 = vpop.eup %9397 }
 0x798   : > { %8918 = vmatpush3.msra.mxu0 %v11371_v37  ;;  %v9400_v8 = vpop.eup %9399  ;;  %v5072_v30 = vmul.f32 %v9398_v6, %v11451_v10 }
 0x799   : > { %8919 = vmatprep.subr.mxu0 %v11373_v0  ;;  %v5045_v21 = vpop.xlane.xlu0 %5044  ;;  %v5048_v57 = vpop.xlane.xlu1 %5047  ;;  %v5074_v27 = vmul.f32 %v9400_v8, %v11448_v14 }
 0x79a   : > { %9413 = vrcp.f32 %v5045_v21  ;;  %8920 = vmatpush3.msra.mxu0 %v11373_v0 }
 0x79b   : > { %v9402_v2 = vpop.eup %9401  ;;  %9415 = vrcp.f32 %v5048_v57  ;;  %8931 = vmatprep.subr.mxu0 %v11377_v23 }
 0x79c   : > { %v9404_v59 = vpop.eup %9403  ;;  %v5071_v31 = vmul.f32 %v9402_v2, %v11459_v43 }
 0x79d   : > { %v11578_v18 = vpop.permute.xlu0 %6052  ;;  %v11580_v13 = vpop.permute.xlu1 %6145  ;;  %v5073_v37 = vmul.f32 %v9404_v59, %v11457_v41 }
 0x79e   : > { %8914 = vmatprep.mubr.msk.f32.mxu1 %vm1666_vm1, %v5071_v31 }
 0x79f   : > { %8921 = vmatprep.mubr.msk.f32.mxu0 %vm1666_vm1, %v5073_v37  ;;  %8915 = vmatmul.mubr.msk.f32.vlgmr.msra.gmra.mxu1 %vm1666_vm1, %v5072_v30  ;;  %v9406_v0 = vpop.eup %9405 }
 0x7a0   : > { %8922 = vmatmul.mubr.msk.f32.vlgmr.msra.gmra.mxu0 %vm1666_vm1, %v5074_v27  ;;  %8925 = vmatpush3.msra.mxu1 %v11379_v28  ;;  %v9408_v43 = vpop.eup %9407  ;;  %v12717_v28 = vld [vmem:[#allocation86_spill] sm:$0xff]  ;;  %v5076_v60 = vmul.f32 %v9406_v0, %v11467_v24  ;;  %v12718_v24 = vld [vmem:[#allocation88_spill] sm:$0xff] }
 0x7a1   : > { %8932 = vmatpush3.msra.mxu0 %v11377_v23  ;;  %8926 = vmatprep.subr.mxu1 %v11383_v22  ;;  %v11592_v41 = vpop.permute.xlu0 %6238  ;;  %v6142_v10 = vpop.permute.xlu1 %6141  ;;  %v11733_v27 = vld [vmem:[%s10300_s19 + $0x30] sm:$0xff] }
 0x7a2   : > { %8933 = vmatprep.subr.mxu0 %v11381_v50  ;;  %8927 = vmatpush3.msra.mxu1 %v11383_v22  ;;  %v5078_v22 = vmul.f32 %v9408_v43, %v11465_v45 }
 0x7a3   : > { %v9410_v14 = vpop.eup %9409  ;;  %8934 = vmatpush3.msra.mxu0 %v11381_v50  ;;  %8938 = vmatprep.subr.mxu1 %v11387_v47 }
 0x7a4   : > { %v9412_v53 = vpop.eup %9411  ;;  %8945 = vmatprep.subr.msk.mxu0 %vm446_vm0, %v12717_v28  ;;  %v5075_v23 = vmul.f32 %v9410_v14, %v11475_v19 }
 0x7a5   : > { %v6144_v34 = vpop.permute.xlu0 %6143  ;;  %v6237_v38 = vpop.permute.xlu1 %6236  ;;  %v5077_v40 = vmul.f32 %v9412_v53, %v11473_v39 }
 0x7a6   : > { %8928 = vmatprep.mubr.msk.f32.mxu1 %vm1666_vm1, %v5075_v23 }
 0x7a7   : > { %v9414_v61 = vpop.eup %9413  ;;  %8935 = vmatprep.mubr.msk.f32.mxu0 %vm1666_vm1, %v5077_v40  ;;  %8929 = vmatmul.mubr.msk.f32.vlgmr.msra.gmra.mxu1 %vm1666_vm1, %v5076_v60 }
 0x7a8   : > { %v9416_v50 = vpop.eup %9415  ;;  %8936 = vmatmul.mubr.msk.f32.vlgmr.msra.gmra.mxu0 %vm1666_vm1, %v5078_v22  ;;  %8939 = vmatpush3.msra.mxu1 %v11387_v47  ;;  %v5079_v19 = vmul.f32 %v9414_v61, %v11483_v49  ;;  %v12721_v47 = vld [vmem:[#allocation90_spill] sm:$0xff] }
 0x7a9   : > { %8946 = vmatpush3.xpose.msk.msra.mxu0 %vm446_vm0, %v12717_v28  ;;  %8940 = vmatprep.subr.mxu1 %v12718_v24  ;;  %v6330_v39 = vpop.permute.xlu0 %6329  ;;  %v6233_v1 = vpop.permute.xlu1 %6232  ;;  %v5080_v45 = vmul.f32 %v9416_v50, %v11481_v33 }
 0x7aa   : > { %8947 = vmatprep.subr.msk.mxu0 %vm446_vm0, %v12719_v3  ;;  %8949 = vmatprep.mubr.msk.f32.mxu0 %vm446_vm0, %v12720_v9 }
 0x7ab   : > { %8941 = vmatpush3.msra.mxu1 %v12718_v24  ;;  %8942 = vmatprep.mubr.msk.f32.mxu1 %vm1666_vm1, %v5079_v19 }
 0x7ac   : > { %8952 = vmatprep.subr.msk.mxu1 %vm446_vm0, %v12721_v47  ;;  %8943 = vmatmul.mubr.msk.f32.vlgmr.msra.gmra.mxu1 %vm1666_vm1, %v5080_v45 }
 0x7ad   : > { %8948 = vmatpush3.xpose.msk.msra.mxu0 %vm446_vm0, %v12719_v3  ;;  %8953 = vmatpush3.xpose.msk.msra.mxu1 %vm446_vm0, %v12721_v47  ;;  %v6235_v33 = vpop.permute.xlu0 %6234  ;;  %v6328_v49 = vpop.permute.xlu1 %6327 }
 0x7ae   : > { %8954 = vmatprep.subr.msk.mxu1 %vm446_vm0, %v12722_v11  ;;  %8956 = vmatprep.mubr.msk.f32.mxu1 %vm446_vm0, %v12723_v15 }
 0x7af   : > { %8959 = vmatprep.subr.msk.mxu0 %vm446_vm0, %v12724_v58 }
 0x7b0   : > { %8950 = vmatmul.mubr.msk.f32.vlgmr.msra.gmra.mxu0 %vm446_vm0, %v12725_v36 }
 0x7b1   : > { %8955 = vmatpush3.xpose.msk.msra.mxu1 %vm446_vm0, %v12722_v11  ;;  %8960 = vmatpush3.xpose.msk.msra.mxu0 %vm446_vm0, %v12724_v58  ;;  %v6421_v4 = vpop.permute.xlu0 %6420  ;;  %v6324_v62 = vpop.permute.xlu1 %6323 }
 0x7b2   : > { %8963 = vmatprep.mubr.msk.f32.mxu0 %vm446_vm0, %v11541_v42  ;;  %8961 = vmatprep.subr.msk.mxu0 %vm446_vm0, %v12726_v63 }
 0x7b3   : > { %8966 = vmatprep.subr.msk.mxu1 %vm446_vm0, %v11543_v44 }
 0x7b4   : > { %8957 = vmatmul.mubr.msk.f32.vlgmr.msra.gmra.mxu1 %vm446_vm0, %v12727_v54 }
 0x7b5   : > { %8962 = vmatpush3.xpose.msk.msra.mxu0 %vm446_vm0, %v12726_v63  ;;  %8967 = vmatpush3.xpose.msk.msra.mxu1 %vm446_vm0, %v11543_v44  ;;  %v6419_v55 = vpop.permute.xlu1 %6418  ;;  %v6326_v42 = vpop.permute.xlu0 %6325 }
 0x7b6   : > { %8970 = vmatprep.mubr.msk.f32.mxu1 %vm446_vm0, %v11549_v52  ;;  %8968 = vmatprep.subr.msk.mxu1 %vm446_vm0, %v11545_v46 }
 0x7b7   : > { %8973 = vmatprep.subr.msk.mxu0 %vm446_vm0, %v11551_v56 }
 0x7b8   : > { %8964 = vmatmul.mubr.msk.f32.vlgmr.msra.gmra.mxu0 %vm446_vm0, %v11547_v48 }
 0x7b9   : > { %8969 = vmatpush3.xpose.msk.msra.mxu1 %vm446_vm0, %v11545_v46  ;;  %8974 = vmatpush3.xpose.msk.msra.mxu0 %vm446_vm0, %v11551_v56  ;;  %v6417_v44 = vpop.permute.xlu1 %6416  ;;  %v6415_v52 = vpop.permute.xlu0 %6414 }
 0x7ba   : > { %8977 = vmatprep.mubr.msk.f32.mxu0 %vm446_vm0, %v6142_v10  ;;  %8975 = vmatprep.subr.msk.mxu0 %vm446_vm0, %v11580_v13 }
 0x7bb   : > { %8980 = vmatprep.subr.msk.mxu1 %vm446_vm0, %v11592_v41 }
 0x7bc   : > { %8971 = vmatmul.mubr.msk.f32.vlgmr.msra.gmra.mxu1 %vm446_vm0, %v11578_v18  ;;  %v11728_v18 = vld [vmem:[%s10300_s19 + $0x38] sm:$0xff] }
 0x7bd   : > { %8976 = vmatpush3.xpose.msk.msra.mxu0 %vm446_vm0, %v11580_v13  ;;  %8981 = vmatpush3.xpose.msk.msra.mxu1 %vm446_vm0, %v11592_v41  ;;  %v6717_v46 = vpop.permute.xlu1 %6716  ;;  %v6719_v48 = vpop.permute.xlu0 %6718 }
 0x7be   : > { %8984 = vmatprep.mubr.msk.f32.mxu1 %vm446_vm0, %v6233_v1  ;;  %8982 = vmatprep.subr.msk.mxu1 %vm446_vm0, %v6237_v38 }
 0x7bf   : > { %8987 = vmatprep.subr.msk.mxu0 %vm446_vm0, %v6330_v39 }
 0x7c0   : > { %8978 = vmatmul.mubr.msk.f32.vlgmr.msra.gmra.mxu0 %vm446_vm0, %v6144_v34 }
 0x7c1   : > { %8983 = vmatpush3.xpose.msk.msra.mxu1 %vm446_vm0, %v6237_v38  ;;  %8988 = vmatpush3.xpose.msk.msra.mxu0 %vm446_vm0, %v6330_v39  ;;  %v6804_v56 = vpop.permute.xlu1 %6803  ;;  %v6806_v17 = vpop.permute.xlu0 %6805 }
 0x7c2   : > { %8991 = vmatprep.mubr.msk.f32.mxu0 %vm446_vm0, %v6324_v62  ;;  %8989 = vmatprep.subr.msk.mxu0 %vm446_vm0, %v6328_v49 }
 0x7c3   : > { %8994 = vmatprep.subr.msk.mxu1 %vm446_vm0, %v6421_v4 }
 0x7c4   : > { %8985 = vmatmul.mubr.msk.f32.vlgmr.msra.gmra.mxu1 %vm446_vm0, %v6235_v33 }
 0x7c5   : > { %8990 = vmatpush3.xpose.msk.msra.mxu0 %vm446_vm0, %v6328_v49  ;;  %8995 = vmatpush3.xpose.msk.msra.mxu1 %vm446_vm0, %v6421_v4  ;;  %v11690_v7 = vpop.permute.xlu1 %6892  ;;  %v11694_v51 = vpop.permute.xlu0 %6979 }
 0x7c6   : > { %8998 = vmatprep.mubr.msk.f32.mxu1 %vm446_vm0, %v6415_v52  ;;  %8996 = vmatprep.subr.msk.mxu1 %vm446_vm0, %v6419_v55 }
 0x7c7   : > { %9001 = vmatprep.subr.mxu0 %v6719_v48 }
 0x7c8   : > { %8992 = vmatmul.mubr.msk.f32.vlgmr.msra.gmra.mxu0 %vm446_vm0, %v6326_v42 }
 0x7c9   : > { %8997 = vmatpush3.xpose.msk.msra.mxu1 %vm446_vm0, %v6419_v55  ;;  %9002 = vmatpush3.msra.mxu0 %v6719_v48 }
 0x7ca   : > { %9003 = vmatprep.subr.mxu0 %v6717_v46  ;;  %9008 = vmatprep.subr.mxu1 %v6806_v17 }
 0x7cb   : > { %9004 = vmatpush3.msra.mxu0 %v6717_v46 }
 0x7cc   : > { %8999 = vmatmul.mubr.msk.f32.vlgmr.msra.gmra.mxu1 %vm446_vm0, %v6417_v44  ;;  %9015 = vmatprep.subr.mxu0 %v11690_v7 }
 0x7cd   : > { %9009 = vmatpush3.msra.mxu1 %v6806_v17 }
 0x7ce   : > { %9010 = vmatprep.subr.mxu1 %v6804_v56 }
 0x7cf   : > { %9011 = vmatpush3.msra.mxu1 %v6804_v56 }
 0x7d0   : > { %9022 = vmatprep.subr.mxu1 %v11694_v51 }
 0x84b   : > { %v11697_v32 = vpop.f32.mrf.mxu0 }
 0x84d   : > { %v11701_v20 = vpop.f32.mrf.mxu0 }
 0x853   : > { %v11699_v35 = vpop.f32.mrf.mxu1 }
 0x855   : > { %v11705_v26 = vpop.f32.mrf.mxu1 }
 0x857   : > { %v11703_v25 = vpop.f32.mrf.mxu0 }
 0x859   : > { %v11709_v12 = vpop.f32.mrf.mxu0 }
 0x85f   : > { %v11707_v29 = vpop.f32.mrf.mxu1 }
 0x860   : > { %v11711_v16 = vpop.f32.mrf.mxu0 }
 0x861   : > { %v11713_v5 = vpop.f32.mrf.mxu1 }
 0x862   : > { %v11717_v21 = vpop.f32.mrf.mxu0 }
 0x867   : > { %v11715_v6 = vpop.f32.mrf.mxu1 }
 0x868   : > { %v11719_v57 = vpop.f32.mrf.mxu0 }
 0x869   : > { %v11721_v8 = vpop.f32.mrf.mxu1 }
 0x86a   : > { %v11723_v2 = vpop.f32.mrf.mxu0 }
 0x86c   : > { %v11725_v59 = vpop.f32.mrf.mxu1 }
 0x86e   : > { %v11730_v37 = vpop.f32.mrf.mxu1 }
 0x870   : > { %v8951_v31 = vpop.f32.mrf.mxu0 }
 0x871   : > { %v6506_v13 = vmul.f32 0.17677669, %v8951_v31 }
 0x872   : > { %v5859_v30 = vpop.f32.mrf.mxu0 }
 0x873   : > { %v11736_v0 = vadd.f32 %v11728_v18, %v6506_v13  ;;  %v6505_v41 = vmul.f32 0.17677669, %v5859_v30 }
 0x874   : > { %v8958_v10 = vpop.f32.mrf.mxu1 }
 0x875   : > { %v11739_v43 = vadd.f32 %v11733_v27, %v6505_v41  ;;  %v6508_v14 = vmul.f32 0.17677669, %v8958_v10  ;;  %v6543_v53 = vsel %vm1666_vm1, %v11736_v0, -inf }
 0x876   : > { %6544 = vmax.xlane.f32.xlu1 %v6543_v53  ;;  %v5950_v28 = vpop.f32.mrf.mxu1 }
 0x877   : > { %v11744_v23 = vadd.f32 %v11728_v18, %v6508_v14  ;;  %v6507_v34 = vmul.f32 0.17677669, %v5950_v28  ;;  %v6540_v38 = vsel %vm1666_vm1, %v11739_v43, -inf }
 0x878   : > { %6541 = vmax.xlane.f32.xlu0 %v6540_v38  ;;  %v8965_v40 = vpop.f32.mrf.mxu0 }
 0x879   : > { %v6510_v60 = vmul.f32 0.17677669, %v8965_v40  ;;  %v11749_v61 = vadd.f32 %v11733_v27, %v6507_v34  ;;  %v6549_v24 = vsel %vm1666_vm1, %v11744_v23, -inf }
 0x87a   : > { %v6041_v22 = vpop.f32.mrf.mxu0 }
 0x87b   : > { %v11752_v50 = vadd.f32 %v11728_v18, %v6510_v60  ;;  %v6509_v19 = vmul.f32 0.17677669, %v6041_v22  ;;  %v6546_v49 = vsel %vm1666_vm1, %v11749_v61, -inf }
 0x87c   : > { %6550 = vmax.xlane.f32.xlu0 %v6549_v24  ;;  %v8972_v39 = vpop.f32.mrf.mxu1 }
 0x87d   : > { %v6512_v1 = vmul.f32 0.17677669, %v8972_v39  ;;  %v6555_v45 = vsel %vm1666_vm1, %v11752_v50, -inf  ;;  %v11759_v9 = vadd.f32 %v11733_v27, %v6509_v19 }
 0x87e   : > { %6556 = vmax.xlane.f32.xlu1 %v6555_v45  ;;  %v6132_v3 = vpop.f32.mrf.mxu1 }
 0x87f   : > { %v11762_v47 = vadd.f32 %v11728_v18, %v6512_v1  ;;  %v6511_v33 = vmul.f32 0.17677669, %v6132_v3  ;;  %v6552_v54 = vsel %vm1666_vm1, %v11759_v9, -inf }
 0x880   : > { %6547 = vmax.xlane.f32.xlu0 %v6546_v49  ;;  %v8979_v11 = vpop.f32.mrf.mxu0  ;;  %v12729_v49 = vld [vmem:[#allocation62_spill] sm:$0xff] }
 0x881   : > { %v6514_v15 = vmul.f32 0.17677669, %v8979_v11  ;;  %v6561_v58 = vsel %vm1666_vm1, %v11762_v47, -inf  ;;  %v11769_v4 = vadd.f32 %v11733_v27, %v6511_v33  ;;  %v12728_v33 = vld [vmem:[#allocation58_spill] sm:$0xff]  ;;  %v12730_v11 = vld [vmem:[#allocation60_spill] sm:$0xff] }
 0x882   : > { %6562 = vmax.xlane.f32.xlu1 %v6561_v58  ;;  %v6223_v36 = vpop.f32.mrf.mxu0 }
 0x883   : > { %v11772_v62 = vadd.f32 %v11728_v18, %v6514_v15  ;;  %v6513_v63 = vmul.f32 0.17677669, %v6223_v36  ;;  %v6558_v17 = vsel %vm1666_vm1, %v11769_v4, -inf  ;;  %v11823_v15 = vpop.permute.xlu1 %6890 }
 0x884   : > { %6553 = vmax.xlane.f32.xlu0 %v6552_v54  ;;  %v8986_v55 = vpop.f32.mrf.mxu1 }
 0x885   : > { %v6516_v42 = vmul.f32 0.17677669, %v8986_v55  ;;  %v6567_v44 = vsel %vm1666_vm1, %v11772_v62, -inf  ;;  %v11779_v46 = vadd.f32 %v11733_v27, %v6513_v63  ;;  %v11829_v63 = vpop.permute.xlu0 %7066 }
 0x886   : > { %6568 = vmax.xlane.f32.xlu1 %v6567_v44  ;;  %v6314_v52 = vpop.f32.mrf.mxu1 }
 0x887   : > { %v11782_v48 = vadd.f32 %v11728_v18, %v6516_v42  ;;  %v6515_v56 = vmul.f32 0.17677669, %v6314_v52  ;;  %v6564_v28 = vsel %vm1666_vm1, %v11779_v46, -inf  ;;  %v11825_v58 = vpop.permute.xlu1 %6977 }
 0x888   : > { %6559 = vmax.xlane.f32.xlu0 %v6558_v17  ;;  %v8993_v31 = vpop.f32.mrf.mxu0 }
 0x889   : > { %v6518_v13 = vmul.f32 0.17677669, %v8993_v31  ;;  %v6573_v30 = vsel %vm1666_vm1, %v11782_v48, -inf  ;;  %v11789_v10 = vadd.f32 %v11733_v27, %v6515_v56 }
 0x88a   : > { %6574 = vmax.xlane.f32.xlu1 %v6573_v30  ;;  %v6405_v41 = vpop.f32.mrf.mxu0 }
 0x88b   : > { %v11792_v14 = vadd.f32 %v11728_v18, %v6518_v13  ;;  %v6517_v53 = vmul.f32 0.17677669, %v6405_v41  ;;  %v6570_v39 = vsel %vm1666_vm1, %v11789_v10, -inf  ;;  %v11827_v36 = vpop.permute.xlu1 %7064 }
 0x88c   : > { %6565 = vmax.xlane.f32.xlu0 %v6564_v28  ;;  %v9000_v34 = vpop.f32.mrf.mxu1 }
 0x88d   : > { %v6520_v38 = vmul.f32 0.17677669, %v9000_v34  ;;  %v6579_v40 = vsel %vm1666_vm1, %v11792_v14, -inf  ;;  %v11799_v22 = vadd.f32 %v11733_v27, %v6517_v53 }
 0x88e   : > { %6580 = vmax.xlane.f32.xlu1 %v6579_v40  ;;  %v6496_v60 = vpop.f32.mrf.mxu1 }
 0x88f   : > { %v11802_v19 = vadd.f32 %v11728_v18, %v6520_v38  ;;  %v6519_v24 = vmul.f32 0.17677669, %v6496_v60  ;;  %v6576_v3 = vsel %vm1666_vm1, %v11799_v22, -inf }
 0x890   : > { %6571 = vmax.xlane.f32.xlu0 %v6570_v39 }
 0x891   : > { %v6585_v1 = vsel %vm1666_vm1, %v11802_v19, -inf  ;;  %v11809_v45 = vadd.f32 %v11733_v27, %v6519_v24  ;;  %v12731_v27 = vld [vmem:[#allocation64_spill] sm:$0xff] }
 0x892   : > { %6586 = vmax.xlane.f32.xlu1 %v6585_v1 }
 0x893   : > { %v6582_v18 = vsel %vm1666_vm1, %v11809_v45, -inf }
 0x894   : > { %6577 = vmax.xlane.f32.xlu0 %v6576_v3 }
 0x898   : > { %6583 = vmax.xlane.f32.xlu0 %v6582_v18 }
 0x8a3   : > { %7151 = vrot.lane.b32.xlu1 %v12728_v33, %s9743_s15 }
 0x8a7   : > { %7238 = vrot.lane.b32.xlu1 %v12729_v49, %s9743_s15 }
 0x8ae   : > { %7153 = vrot.lane.b32.xlu0 %v12730_v11, %s9743_s15 }
 0x8b2   : > { %7240 = vrot.lane.b32.xlu0 %v12731_v27, %s9743_s15 }
 0x8ff   : > { %v6545_v54 = vpop.xlane.xlu1 %6544 }
 0x900   : > { %v6589_v55 = vsub.f32 %v11736_v0, %v6545_v54 }
 0x901   : > { %v6542_v42 = vpop.xlane.xlu0 %6541 }
 0x902   : > { %v6606_v44 = vmul.f32 1.442695, %v6589_v55  ;;  %v6588_v52 = vsub.f32 %v11739_v43, %v6542_v42 }
 0x904   : > { %9417 = vpow2.f32 %v6606_v44  ;;  %v6604_v56 = vmul.f32 1.442695, %v6588_v52 }
 0x905   : > { %v6551_v17 = vpop.xlane.xlu0 %6550 }
 0x906   : > { %9419 = vpow2.f32 %v6604_v56  ;;  %v6591_v31 = vsub.f32 %v11744_v23, %v6551_v17 }
 0x907   : > { %v6557_v13 = vpop.xlane.xlu1 %6556 }
 0x908   : > { %v6610_v30 = vmul.f32 1.442695, %v6591_v31  ;;  %v6593_v41 = vsub.f32 %v11752_v50, %v6557_v13 }
 0x909   : > { %v6548_v53 = vpop.xlane.xlu0 %6547 }
 0x90a   : > { %9421 = vpow2.f32 %v6610_v30  ;;  %v6614_v28 = vmul.f32 1.442695, %v6593_v41  ;;  %v6590_v34 = vsub.f32 %v11749_v61, %v6548_v53 }
 0x90b   : > { %v6563_v0 = vpop.xlane.xlu1 %6562 }
 0x90c   : > { %9423 = vpow2.f32 %v6614_v28  ;;  %v6608_v38 = vmul.f32 1.442695, %v6590_v34  ;;  %v6595_v43 = vsub.f32 %v11762_v47, %v6563_v0 }
 0x90d   : > { %v6554_v40 = vpop.xlane.xlu0 %6553 }
 0x90e   : > { %9425 = vpow2.f32 %v6608_v38  ;;  %v6618_v60 = vmul.f32 1.442695, %v6595_v43  ;;  %v6592_v24 = vsub.f32 %v11759_v9, %v6554_v40 }
 0x90f   : > { %v6569_v23 = vpop.xlane.xlu1 %6568 }
 0x910   : > { %9427 = vpow2.f32 %v6618_v60  ;;  %v6612_v39 = vmul.f32 1.442695, %v6592_v24  ;;  %v6597_v50 = vsub.f32 %v11772_v62, %v6569_v23 }
 0x911   : > { %v11839_v1 = vpop.eup %9417  ;;  %v6560_v3 = vpop.xlane.xlu0 %6559 }
 0x912   : > { %9429 = vpow2.f32 %v6612_v39  ;;  %v6622_v61 = vmul.f32 1.442695, %v6597_v50  ;;  %v6594_v18 = vsub.f32 %v11769_v4, %v6560_v3  ;;  %v6639_v47 = vsel %vm1666_vm1, %v11839_v1, 0.0 }
 0x913   : > { %v11844_v33 = vpop.eup %9419  ;;  %6640 = vadd.xlane.f32.xlu1 %v6639_v47  ;;  %v6575_v49 = vpop.xlane.xlu1 %6574 }
 0x914   : > { %9431 = vpow2.f32 %v6622_v61  ;;  %v6616_v9 = vmul.f32 1.442695, %v6594_v18  ;;  %v6599_v11 = vsub.f32 %v11782_v48, %v6575_v49  ;;  %v6636_v62 = vsel %vm1666_vm1, %v11844_v33, 0.0 }
 0x915   : > { %v6566_v27 = vpop.xlane.xlu0 %6565  ;;  %6637 = vadd.xlane.f32.xlu0 %v6636_v62 }
 0x916   : > { %9433 = vpow2.f32 %v6616_v9  ;;  %v6626_v54 = vmul.f32 1.442695, %v6599_v11  ;;  %v6596_v4 = vsub.f32 %v11779_v46, %v6566_v27 }
 0x917   : > { %v11850_v55 = vpop.eup %9421  ;;  %v6581_v42 = vpop.xlane.xlu1 %6580 }
 0x918   : > { %9435 = vpow2.f32 %v6626_v54  ;;  %v6620_v44 = vmul.f32 1.442695, %v6596_v4  ;;  %v6601_v52 = vsub.f32 %v11792_v14, %v6581_v42  ;;  %v6645_v56 = vsel %vm1666_vm1, %v11850_v55, 0.0 }
 0x919   : > { %v11855_v48 = vpop.eup %9423  ;;  %v6572_v17 = vpop.xlane.xlu0 %6571  ;;  %6646 = vadd.xlane.f32.xlu1 %v6645_v56 }
 0x91a   : > { %9437 = vpow2.f32 %v6620_v44  ;;  %v6630_v31 = vmul.f32 1.442695, %v6601_v52  ;;  %v6598_v13 = vsub.f32 %v11789_v10, %v6572_v17  ;;  %v6651_v41 = vsel %vm1666_vm1, %v11855_v48, 0.0  ;;  %v12732_v17 = vld [vmem:[#allocation66_spill] sm:$0xff] }
 0x91b   : > { %v11858_v30 = vpop.eup %9425  ;;  %v6587_v46 = vpop.xlane.xlu1 %6586 }
 0x91c   : > { %9439 = vpow2.f32 %v6630_v31  ;;  %v6624_v53 = vmul.f32 1.442695, %v6598_v13  ;;  %v6603_v14 = vsub.f32 %v11802_v19, %v6587_v46  ;;  %v6642_v28 = vsel %vm1666_vm1, %v11858_v30, 0.0  ;;  %v12733_v31 = vld [vmem:[#allocation38_spill] sm:$0xff]  ;;  %v12734_v13 = vld [vmem:[#allocation68_spill] sm:$0xff] }
 0x91d   : > { %v11865_v34 = vpop.eup %9427  ;;  %v6578_v0 = vpop.xlane.xlu0 %6577  ;;  %6643 = vadd.xlane.f32.xlu0 %v6642_v28  ;;  %6652 = vadd.xlane.f32.xlu1 %v6651_v41  ;;  %v12735_v46 = vld [vmem:[#allocation40_spill] sm:$0xff] }
 0x91e   : > { %9441 = vpow2.f32 %v6624_v53  ;;  %v6600_v10 = vsub.f32 %v11799_v22, %v6578_v0  ;;  %v6634_v43 = vmul.f32 1.442695, %v6603_v14  ;;  %v6657_v19 = vsel %vm1666_vm1, %v11865_v34, 0.0  ;;  %v12736_v41 = vld [vmem:[#allocation32_spill] sm:$0xff]  ;;  %v12737_v53 = vld [vmem:[#allocation47_spill] sm:$0xff] }
 0x91f   : > { %v11868_v38 = vpop.eup %9429  ;;  %v12738_v14 = vld [vmem:[#allocation35_spill] sm:$0xff] }
 0x920   : > { %v6628_v40 = vmul.f32 1.442695, %v6600_v10  ;;  %v6648_v60 = vsel %vm1666_vm1, %v11868_v38, 0.0 }
 0x921   : > { %v11874_v24 = vpop.eup %9431  ;;  %6649 = vadd.xlane.f32.xlu0 %v6648_v60  ;;  %v6584_v23 = vpop.xlane.xlu0 %6583  ;;  %6658 = vadd.xlane.f32.xlu1 %v6657_v19 }
 0x922   : > { %9443 = vpow2.f32 %v6628_v40  ;;  %v6602_v39 = vsub.f32 %v11809_v45, %v6584_v23  ;;  %v6663_v61 = vsel %vm1666_vm1, %v11874_v24, 0.0 }
 0x923   : > { %v11877_v50 = vpop.eup %9433  ;;  %9445 = vpow2.f32 %v6634_v43 }
 0x924   : > { %v6632_v22 = vmul.f32 1.442695, %v6602_v39  ;;  %v6654_v3 = vsel %vm1666_vm1, %v11877_v50, 0.0 }
 0x925   : > { %v11883_v18 = vpop.eup %9435  ;;  %6655 = vadd.xlane.f32.xlu0 %v6654_v3  ;;  %6664 = vadd.xlane.f32.xlu1 %v6663_v61 }
 0x926   : > { %9447 = vpow2.f32 %v6632_v22  ;;  %v6669_v49 = vsel %vm1666_vm1, %v11883_v18, 0.0 }
 0x927   : > { %v11885_v47 = vpop.eup %9437 }
 0x928   : > { %v6660_v45 = vsel %vm1666_vm1, %v11885_v47, 0.0 }
 0x929   : > { %v11891_v9 = vpop.eup %9439  ;;  %6661 = vadd.xlane.f32.xlu0 %v6660_v45  ;;  %6670 = vadd.xlane.f32.xlu1 %v6669_v49 }
 0x92a   : > { %v6675_v27 = vsel %vm1666_vm1, %v11891_v9, 0.0 }
 0x92b   : > { %v11893_v11 = vpop.eup %9441 }
 0x92c   : > { %v6666_v62 = vsel %vm1666_vm1, %v11893_v11, 0.0 }
 0x92d   : > { %6667 = vadd.xlane.f32.xlu0 %v6666_v62  ;;  %6676 = vadd.xlane.f32.xlu1 %v6675_v27 }
 0x92f   : > { %v11899_v54 = vpop.eup %9443 }
 0x930   : > { %v6672_v4 = vsel %vm1666_vm1, %v11899_v54, 0.0  ;;  %v11903_v42 = vpop.eup %9445 }
 0x931   : > { %6673 = vadd.xlane.f32.xlu0 %v6672_v4  ;;  %v6681_v56 = vsel %vm1666_vm1, %v11903_v42, 0.0 }
 0x933   : > { %v11905_v44 = vpop.eup %9447 }
 0x934   : > { %v6678_v52 = vsel %vm1666_vm1, %v11905_v44, 0.0 }
 0x935   : > { %6679 = vadd.xlane.f32.xlu1 %v6678_v52  ;;  %6682 = vadd.xlane.f32.xlu0 %v6681_v56 }
 0x946   : > { %7325 = vrot.lane.b32.xlu1 %v12732_v17, %s9743_s15 }
 0x94a   : > { %7430 = vrot.lane.b32.xlu1 %v12733_v31, %s9743_s15 }
 0x94b   : > { %7327 = vrot.lane.b32.xlu0 %v12734_v13, %s9743_s15 }
 0x94e   : > { %7494 = vrot.lane.b32.xlu1 %v11697_v32, %s9742_s22  ;;  %v12739_v32 = vld [vmem:[#allocation45_spill] sm:$0xff] }
 0x94f   : > { %7428 = vrot.lane.b32.xlu0 %v12735_v46, %s9743_s15 }
 0x952   : > { %7434 = vrot.lane.b32.xlu1 %v12736_v41, %s9743_s15 }
 0x953   : > { %7492 = vrot.lane.b32.xlu0 %v11701_v20, %s9742_s22  ;;  %v12740_v20 = vld [vmem:[#allocation43_spill] sm:$0xff] }
 0x956   : > { %7498 = vrot.lane.b32.xlu1 %v11699_v35, %s9742_s22  ;;  %v12741_v35 = vld [vmem:[#allocation23_spill] sm:$0xff] }
 0x957   : > { %7432 = vrot.lane.b32.xlu0 %v12737_v53, %s9743_s15 }
 0x95a   : > { %7438 = vrot.lane.b32.xlu1 %v12738_v14, %s9743_s15 }
 0x95b   : > { %7496 = vrot.lane.b32.xlu0 %v11705_v26, %s9742_s22  ;;  %v12742_v26 = vld [vmem:[#allocation26_spill] sm:$0xff] }
 0x95e   : > { %7502 = vrot.lane.b32.xlu1 %v11703_v25, %s9742_s22  ;;  %v12743_v25 = vld [vmem:[#allocation22_spill] sm:$0xff] }
 0x95f   : > { %7436 = vrot.lane.b32.xlu0 %v12739_v32, %s9743_s15 }
 0x962   : > { %7442 = vrot.lane.b32.xlu1 %v12740_v20, %s9743_s15 }
 0x963   : > { %7500 = vrot.lane.b32.xlu0 %v11709_v12, %s9742_s22  ;;  %v12744_v12 = vld [vmem:[#allocation30_spill] sm:$0xff] }
 0x966   : > { %7506 = vrot.lane.b32.xlu1 %v11707_v29, %s9742_s22  ;;  %v12745_v29 = vld [vmem:[#allocation28_spill] sm:$0xff] }
 0x967   : > { %7440 = vrot.lane.b32.xlu0 %v12741_v35, %s9743_s15 }
 0x96a   : > { %7446 = vrot.lane.b32.xlu1 %v12742_v26, %s9743_s15 }
 0x96b   : > { %7504 = vrot.lane.b32.xlu0 %v11713_v5, %s9742_s22  ;;  %v12746_v5 = vld [vmem:[#allocation25_spill] sm:$0xff] }
 0x96e   : > { %7510 = vrot.lane.b32.xlu1 %v11711_v16, %s9742_s22  ;;  %v12747_v16 = vld [vmem:[#allocation36_spill] sm:$0xff] }
 0x96f   : > { %7444 = vrot.lane.b32.xlu0 %v12743_v25, %s9743_s15 }
 0x972   : > { %7450 = vrot.lane.b32.xlu1 %v12744_v12, %s9743_s15  ;;  %v7681_v12 = vld [vmem:[%s12436_s5 + $0x58] sm:$0xff] }
 0x973   : > { %7508 = vrot.lane.b32.xlu0 %v11717_v21, %s9742_s22  ;;  %v12748_v21 = vld [vmem:[#allocation27_spill] sm:$0xff] }
 0x976   : > { %7514 = vrot.lane.b32.xlu1 %v11715_v6, %s9742_s22  ;;  %v12749_v6 = vld [vmem:[#allocation29_spill] sm:$0xff] }
 0x977   : > { %7448 = vrot.lane.b32.xlu0 %v12745_v29, %s9743_s15  ;;  %v7680_v29 = vld [vmem:[%s12436_s5 + $0x50] sm:$0xff] }
 0x97a   : > { %7454 = vrot.lane.b32.xlu1 %v12746_v5, %s9743_s15  ;;  %v7679_v5 = vld [vmem:[%s12436_s5 + $0x48] sm:$0xff] }
 0x97b   : > { %7512 = vrot.lane.b32.xlu0 %v11721_v8, %s9742_s22  ;;  %v11979_v8 = vpop.permute.xlu1 %7151 }
 0x97e   : > { %7518 = vrot.lane.b32.xlu1 %v11719_v57, %s9742_s22  ;;  %v11981_v57 = vpop.permute.xlu0 %7153 }
 0x97f   : > { %7452 = vrot.lane.b32.xlu0 %v12747_v16, %s9743_s15  ;;  %v11983_v28 = vpop.permute.xlu1 %7238  ;;  %v7678_v16 = vld [vmem:[%s12436_s5 + $0x40] sm:$0xff] }
 0x982   : > { %7458 = vrot.lane.b32.xlu1 %v12748_v21, %s9743_s15  ;;  %v11985_v0 = vpop.permute.xlu0 %7240  ;;  %v7677_v21 = vld [vmem:[%s12436_s5 + $0x38] sm:$0xff] }
 0x983   : > { %7516 = vrot.lane.b32.xlu0 %v11723_v2, %s9742_s22 }
 0x986   : > { %7522 = vrot.lane.b32.xlu1 %v11725_v59, %s9742_s22 }
 0x987   : > { %7456 = vrot.lane.b32.xlu0 %v12749_v6, %s9743_s15  ;;  %v7676_v6 = vld [vmem:[%s12436_s5 + $0x30] sm:$0xff]  ;;  %s12307_s15 = scalar_lea.vmem [#allocation8], %s9927_s12  ;;  %s12782_s12 = sld [smem:[#allocation14_spill]] }
 0x988   : > { %s7903_s21 = sshll.u32 %s12307_s15, 4  ;;  %s12373_s21 = int_to_ptr.vmem [resolvable:$true] %s7903_s21 }
 0x989   : > { %s9627_s13 = scalar_lea.vmem %s12373_s21, 2048  ;;  %p9634_p5 = scmp.lt.s32.totalorder %s12373_s21, %s9632_s14 }
 0x98a   : > { %p9628_p4 = scmp.ne.s32.totalorder %s12373_s21, %s9627_s13  ;;  %p9635_p13 = scmp.lt.s32.totalorder %s9633_s20, %s9627_s13 }
 0x98b   : > { %7520 = vrot.lane.b32.xlu0 %v11730_v37, %s9742_s22 }
 0x98c   : > { %p9629_p8 = pnand %p9628_p4, %p9871_p12  ;;  %p9636_p0 = por %p9635_p13, %p9634_p5 }
 0x98d   : > { %s8320_s16 = sshll.u32 %s12782_s12, 4 }
 0x98e   : > { %s7900_s10 = sadd.s32 %s8320_s16, %s8313_s17  ;;  %p9630_p3 = pneg %p9629_p8 }
 0x98f   : > { %s8314_s3 = sshll.u32 %s7900_s10, 7 }
 0x990   : > { %s12371_s27 = scalar_lea.hbm %s12784_s29, %s8314_s3  ;;  %p9637_p2 = pnand %p9636_p0, %p9630_p3 }
 0x99c   : > { %v6641_v10 = vpop.xlane.xlu1 %6640 }
 0x99d   : > { %9449 = vrcp.f32 %v6641_v10  ;;  %v7671_v10 = vld [vmem:[%s12436_s5 + $0x8] sm:$0xff] }
 0x99e   : > { %v6638_v2 = vpop.xlane.xlu0 %6637 }
 0x99f   : > { %9451 = vrcp.f32 %v6638_v2  ;;  %v7670_v2 = vld [vmem:[%s12436_s5] sm:$0xff] }
 0x9a2   : > { %v6647_v43 = vpop.xlane.xlu1 %6646 }
 0x9a3   : > { %9453 = vrcp.f32 %v6647_v43 }
 0x9a6   : > { %v6644_v59 = vpop.xlane.xlu0 %6643  ;;  %v6653_v40 = vpop.xlane.xlu1 %6652 }
 0x9a7   : > { %9455 = vrcp.f32 %v6644_v59 }
 0x9a8   : > { %9457 = vrcp.f32 %v6653_v40 }
 0x9aa   : > { %v6650_v60 = vpop.xlane.xlu0 %6649  ;;  %v6659_v37 = vpop.xlane.xlu1 %6658 }
 0x9ab   : > { %v9450_v19 = vpop.eup %9449  ;;  %9459 = vrcp.f32 %v6650_v60 }
 0x9ac   : > { %v9452_v23 = vpop.eup %9451  ;;  %9461 = vrcp.f32 %v6659_v37  ;;  %v6701_v61 = vmul.f32 %v9450_v19, %v11839_v1 }
 0x9ad   : > { %v6700_v39 = vmul.f32 %v9452_v23, %v11844_v33 }
 0x9ae   : > { %v6656_v22 = vpop.xlane.xlu0 %6655  ;;  %v6665_v3 = vpop.xlane.xlu1 %6664 }
 0x9af   : > { %9463 = vrcp.f32 %v6656_v22  ;;  %9005 = vmatprep.mubr.msk.f32.mxu0 %vm1666_vm1, %v6700_v39 }
 0x9b0   : > { %9006 = vmatmul.mubr.msk.f32.vlgmr.msra.gmra.mxu0 %vm1666_vm1, %v6701_v61  ;;  %9465 = vrcp.f32 %v6665_v3  ;;  %v9454_v62 = vpop.eup %9453 }
 0x9b1   : > { %9016 = vmatpush3.msra.mxu0 %v11690_v7  ;;  %v6703_v4 = vmul.f32 %v9454_v62, %v11850_v55 }
 0x9b2   : > { %9017 = vmatprep.subr.mxu0 %v11823_v15  ;;  %v6662_v45 = vpop.xlane.xlu0 %6661  ;;  %v6671_v49 = vpop.xlane.xlu1 %6670 }
 0x9b3   : > { %9467 = vrcp.f32 %v6662_v45  ;;  %9018 = vmatpush3.msra.mxu0 %v11823_v15 }
 0x9b4   : > { %v9456_v33 = vpop.eup %9455  ;;  %9029 = vmatprep.subr.mxu0 %v11829_v63  ;;  %9469 = vrcp.f32 %v6671_v49 }
 0x9b5   : > { %v6702_v1 = vmul.f32 %v9456_v33, %v11858_v30  ;;  %v9458_v52 = vpop.eup %9457 }
 0x9b6   : > { %v6668_v27 = vpop.xlane.xlu0 %6667  ;;  %v6677_v7 = vpop.xlane.xlu1 %6676  ;;  %v6705_v17 = vmul.f32 %v9458_v52, %v11855_v48 }
 0x9b7   : > { %9471 = vrcp.f32 %v6668_v27  ;;  %9012 = vmatprep.mubr.msk.f32.mxu1 %vm1666_vm1, %v6702_v1 }
 0x9b8   : > { %v9460_v56 = vpop.eup %9459  ;;  %9013 = vmatmul.mubr.msk.f32.vlgmr.msra.gmra.mxu1 %vm1666_vm1, %v6703_v4  ;;  %9473 = vrcp.f32 %v6677_v7 }
 0x9b9   : > { %9023 = vmatpush3.msra.mxu1 %v11694_v51  ;;  %v6704_v15 = vmul.f32 %v9460_v56, %v11868_v38  ;;  %v9462_v31 = vpop.eup %9461 }
 0x9ba   : > { %9024 = vmatprep.subr.mxu1 %v11825_v58  ;;  %v6674_v30 = vpop.xlane.xlu0 %6673  ;;  %v6707_v48 = vmul.f32 %v9462_v31, %v11865_v34 }
 0x9bb   : > { %9475 = vrcp.f32 %v6674_v30  ;;  %9025 = vmatpush3.msra.mxu1 %v11825_v58  ;;  %9019 = vmatprep.mubr.msk.f32.mxu0 %vm1666_vm1, %v6704_v15 }
 0x9bc   : > { %v9464_v55 = vpop.eup %9463  ;;  %9036 = vmatprep.subr.mxu1 %v11981_v57  ;;  %9020 = vmatmul.mubr.msk.f32.vlgmr.msra.gmra.mxu0 %vm1666_vm1, %v6705_v17 }
 0x9bd   : > { %9030 = vmatpush3.msra.mxu0 %v11829_v63  ;;  %v6706_v51 = vmul.f32 %v9464_v55, %v11877_v50  ;;  %v9466_v46 = vpop.eup %9465 }
 0x9be   : > { %9031 = vmatprep.subr.mxu0 %v11827_v36  ;;  %v6683_v38 = vpop.xlane.xlu0 %6682  ;;  %v6680_v13 = vpop.xlane.xlu1 %6679  ;;  %v6709_v34 = vmul.f32 %v9466_v46, %v11874_v24 }
 0x9bf   : > { %9477 = vrcp.f32 %v6683_v38  ;;  %9032 = vmatpush3.msra.mxu0 %v11827_v36  ;;  %9026 = vmatprep.mubr.msk.f32.mxu1 %vm1666_vm1, %v6706_v51 }
 0x9c0   : > { %v9468_v58 = vpop.eup %9467  ;;  %9479 = vrcp.f32 %v6680_v13  ;;  %9043 = vmatprep.subr.mxu0 %v11985_v0  ;;  %9027 = vmatmul.mubr.msk.f32.vlgmr.msra.gmra.mxu1 %vm1666_vm1, %v6707_v48 }
 0x9c1   : > { %9037 = vmatpush3.msra.mxu1 %v11981_v57  ;;  %v6708_v63 = vmul.f32 %v9468_v58, %v11885_v47  ;;  %v9470_v41 = vpop.eup %9469  ;;  %v7674_v57 = vld [vmem:[%s12436_s5 + $0x20] sm:$0xff] }
 0x9c2   : > { %9038 = vmatprep.subr.mxu1 %v11979_v8  ;;  %v7328_v50 = vpop.permute.xlu0 %7327  ;;  %v6711_v47 = vmul.f32 %v9470_v41, %v11883_v18  ;;  %v7326_v32 = vpop.permute.xlu1 %7325  ;;  %v12750_v41 = vld [vmem:[#allocation42_spill] sm:$0xff] }
 0x9c3   : > { %9039 = vmatpush3.msra.mxu1 %v11979_v8  ;;  %9033 = vmatprep.mubr.msk.f32.mxu0 %vm1666_vm1, %v6708_v63  ;;  %v7675_v8 = vld [vmem:[%s12436_s5 + $0x28] sm:$0xff] }
 0x9c4   : > { %v9472_v36 = vpop.eup %9471  ;;  %9050 = vmatprep.subr.mxu1 %v7328_v50  ;;  %9034 = vmatmul.mubr.msk.f32.vlgmr.msra.gmra.mxu0 %vm1666_vm1, %v6709_v34  ;;  %v12140_v34 = vld [vmem:[%s12435_s4] ss:$0 sm:$0xff] }
 0x9c5   : > { %9044 = vmatpush3.msra.mxu0 %v11985_v0  ;;  %v6710_v53 = vmul.f32 %v9472_v36, %v11893_v11  ;;  %v9474_v14 = vpop.eup %9473  ;;  %v7672_v0 = vld [vmem:[%s12436_s5 + $0x10] sm:$0xff]  ;;  %v824_v36 = vadd.f32 %v12140_v34, %v12750_v41 }
 0x9c6   : > { %9045 = vmatprep.subr.mxu0 %v11983_v28  ;;  %v6713_v35 = vmul.f32 %v9474_v14, %v11891_v9  ;;  %v7684_v9 = vld [vmem:[%s12436_s5 + $0x70] sm:$0xff]  ;;  %v12093_v3 = vpop.permute.xlu1 %7430  ;;  %v12096_v45 = vpop.permute.xlu0 %7428 }
 0x9c7   : > { %9046 = vmatpush3.msra.mxu0 %v11983_v28  ;;  %9040 = vmatprep.mubr.msk.f32.mxu1 %vm1666_vm1, %v6710_v53  ;;  %v7673_v28 = vld [vmem:[%s12436_s5 + $0x18] sm:$0xff] }
 0x9c8   : > { %v9476_v24 = vpop.eup %9475  ;;  %9041 = vmatmul.mubr.msk.f32.vlgmr.msra.gmra.mxu1 %vm1666_vm1, %v6711_v47  ;;  %v12751_v47 = vld [vmem:[#allocation44_spill] sm:$0xff] }
 0x9c9   : > { %9051 = vmatpush3.msra.mxu1 %v7328_v50  ;;  %v6712_v20 = vmul.f32 %v9476_v24, %v11899_v54  ;;  %v7685_v54 = vld [vmem:[%s12436_s5 + $0x78] sm:$0xff]  ;;  %v825_v14 = vadd.f32 %v12140_v34, %v12751_v47 }
 0x9ca   : > { %9052 = vmatprep.subr.mxu1 %v7326_v32  ;;  %9057 = vmatprep.subr.mxu0 %v7685_v54  ;;  %v12100_v33 = vpop.permute.xlu1 %7494  ;;  %v12103_v27 = vpop.permute.xlu0 %7492 }
 0x9cb   : > { %9053 = vmatpush3.msra.mxu1 %v7326_v32  ;;  %9047 = vmatprep.mubr.msk.f32.mxu0 %vm1666_vm1, %v6712_v20  ;;  %v8095_v32 = vmul.f32 -1.442695, %v824_v36  ;;  %v8096_v20 = vmul.f32 -1.442695, %v825_v14  ;;  %v12761_v36 = vld [vmem:[#allocation61_spill] sm:$0xff] }
 0x9cc   : > { %v9478_v11 = vpop.eup %9477  ;;  %9048 = vmatmul.mubr.msk.f32.vlgmr.msra.gmra.mxu0 %vm1666_vm1, %v6713_v35  ;;  %v835_v47 = vadd.f32 %v12140_v34, %v12761_v36 }
 0x9cd   : > { %v9480_v18 = vpop.eup %9479  ;;  %v6715_v26 = vmul.f32 %v9478_v11, %v11903_v42  ;;  %9058 = vmatpush3.msra.mxu0 %v7685_v54  ;;  %v7683_v42 = vld [vmem:[%s12436_s5 + $0x68] sm:$0xff]  ;;  %9481 = vpow2.f32 %v8095_v32  ;;  %v12752_v11 = vld [vmem:[#allocation46_spill] sm:$0xff] }
 0x9ce   : > { %v6714_v25 = vmul.f32 %v9480_v18, %v11905_v44  ;;  %9059 = vmatprep.subr.mxu0 %v7684_v9  ;;  %v7682_v44 = vld [vmem:[%s12436_s5 + $0x60] sm:$0xff]  ;;  %v12107_v52 = vpop.permute.xlu1 %7434  ;;  %v12110_v56 = vpop.permute.xlu0 %7432  ;;  %v826_v18 = vadd.f32 %v12140_v34, %v12752_v11  ;;  %9483 = vpow2.f32 %v8096_v20  ;;  %v12762_v11 = vld [vmem:[#allocation63_spill] sm:$0xff] }
 0x9cf   : > { %9060 = vmatpush3.msra.mxu0 %v7684_v9 }
 0x9d0   : > { %9054 = vmatprep.mubr.msk.f32.mxu1 %vm1666_vm1, %v6714_v25  ;;  %9061 = vmatprep.subr.mxu0 %v7683_v42  ;;  %v12753_v25 = vld [vmem:[#allocation48_spill] sm:$0xff]  ;;  %v8097_v9 = vmul.f32 -1.442695, %v826_v18  ;;  %v836_v18 = vadd.f32 %v12140_v34, %v12762_v11 }
 0x9d1   : > { %9055 = vmatmul.mubr.msk.f32.vlgmr.msra.gmra.mxu1 %vm1666_vm1, %v6715_v26  ;;  %9062 = vmatpush3.msra.mxu0 %v7683_v42  ;;  %v827_v54 = vadd.f32 %v12140_v34, %v12753_v25 }
 0x9d2   : > { %9063 = vmatprep.subr.mxu0 %v7682_v44  ;;  %v12113_v30 = vpop.permute.xlu1 %7498  ;;  %v12115_v17 = vpop.permute.xlu0 %7496  ;;  %9485 = vpow2.f32 %v8097_v9  ;;  %v12763_v9 = vld [vmem:[#allocation65_spill] sm:$0xff] }
 0x9d3   : > { %9064 = vmatpush3.msra.mxu0 %v7682_v44  ;;  %v8098_v44 = vmul.f32 -1.442695, %v827_v54  ;;  %v8106_v54 = vmul.f32 -1.442695, %v835_v47 }
 0x9d4   : > { %9065 = vmatprep.subr.mxu0 %v7681_v12 }
 0x9d5   : > { %9066 = vmatpush3.msra.mxu0 %v7681_v12  ;;  %v12754_v12 = vld [vmem:[#allocation49_spill] sm:$0xff]  ;;  %9487 = vpow2.f32 %v8098_v44  ;;  %v837_v44 = vadd.f32 %v12140_v34, %v12763_v9 }
 0x9d6   : > { %9067 = vmatprep.subr.mxu0 %v7680_v29  ;;  %v12117_v31 = vpop.permute.xlu1 %7438  ;;  %v12119_v55 = vpop.permute.xlu0 %7436 }
 0x9d7   : > { %9068 = vmatpush3.msra.mxu0 %v7680_v29  ;;  %v828_v29 = vadd.f32 %v12140_v34, %v12754_v12 }
 0x9d8   : > { %9069 = vmatprep.subr.mxu0 %v7679_v5 }
 0x9d9   : > { %9070 = vmatpush3.msra.mxu0 %v7679_v5  ;;  %v12755_v5 = vld [vmem:[#allocation50_spill] sm:$0xff] }
 0x9da   : > { %9071 = vmatprep.subr.mxu0 %v7678_v16  ;;  %v12121_v51 = vpop.permute.xlu1 %7502  ;;  %v12123_v38 = vpop.permute.xlu0 %7500 }
 0x9db   : > { %9072 = vmatpush3.msra.mxu0 %v7678_v16  ;;  %v829_v16 = vadd.f32 %v12140_v34, %v12755_v5 }
 0x9dc   : > { %9073 = vmatprep.subr.mxu0 %v7677_v21 }
 0x9dd   : > { %9074 = vmatpush3.msra.mxu0 %v7677_v21 }
 0x9de   : > { %9075 = vmatprep.subr.mxu0 %v7676_v6  ;;  %v12125_v13 = vpop.permute.xlu1 %7442  ;;  %v12127_v48 = vpop.permute.xlu0 %7440 }
 0x9df   : > { %9076 = vmatpush3.msra.mxu0 %v7676_v6  ;;  %v8099_v6 = vmul.f32 -1.442695, %v828_v29 }
 0x9e0   : > { %9077 = vmatprep.subr.mxu0 %v7675_v8 }
 0x9e1   : > { %9078 = vmatpush3.msra.mxu0 %v7675_v8  ;;  %v8100_v8 = vmul.f32 -1.442695, %v829_v16  ;;  %9489 = vpow2.f32 %v8099_v6  ;;  %v8107_v6 = vmul.f32 -1.442695, %v836_v18 }
 0x9e2   : > { %9079 = vmatprep.subr.mxu0 %v7674_v57  ;;  %v12129_v46 = vpop.permute.xlu1 %7506  ;;  %v12131_v58 = vpop.permute.xlu0 %7504 }
 0x9e3   : > { %9080 = vmatpush3.msra.mxu0 %v7674_v57  ;;  %v12756_v57 = vld [vmem:[#allocation52_spill] sm:$0xff]  ;;  %9491 = vpow2.f32 %v8100_v8 }
 0x9e4   : > { %9081 = vmatprep.subr.mxu0 %v7673_v28 }
 0x9e5   : > { %9082 = vmatpush3.msra.mxu0 %v7673_v28  ;;  %v830_v28 = vadd.f32 %v12140_v34, %v12756_v57  ;;  %v8108_v57 = vmul.f32 -1.442695, %v837_v44 }
 0x9e6   : > { %9083 = vmatprep.subr.mxu0 %v7672_v0  ;;  %v12133_v63 = vpop.permute.xlu1 %7446  ;;  %v12135_v50 = vpop.permute.xlu0 %7444 }
 0x9e7   : > { %9084 = vmatpush3.msra.mxu0 %v7672_v0 }
 0x9e8   : > { %9085 = vmatprep.subr.mxu0 %v7671_v10 }
 0x9e9   : > { %9086 = vmatpush3.msra.mxu0 %v7671_v10  ;;  %v12757_v10 = vld [vmem:[#allocation53_spill] sm:$0xff] }
 0x9ea   : > { %9087 = vmatprep.subr.mxu0 %v7670_v2  ;;  %v12144_v53 = vpop.permute.xlu1 %7510  ;;  %v12148_v24 = vpop.permute.xlu0 %7508 }
 0x9eb   : > { %9088 = vmatpush3.msra.mxu0 %v7670_v2  ;;  %v831_v2 = vadd.f32 %v12140_v34, %v12757_v10 }
 0x9ee   : > { %v12150_v35 = vpop.permute.xlu1 %7450  ;;  %v12154_v26 = vpop.permute.xlu0 %7448 }
 0x9f2   : > { %v12158_v42 = vpop.permute.xlu1 %7514  ;;  %v12164_v21 = vpop.permute.xlu0 %7512 }
 0x9f6   : > { %v12168_v0 = vpop.permute.xlu1 %7454 }
 0xa70   : > { %v9007_v43 = vpop.f32.mrf.mxu0 }
 0xa71   : > { %7558 = vrot.lane.b32.xlu1 %v9007_v43, %s9741_s9  ;;  %v12172_v43 = vpop.permute.xlu0 %7452 }
 0xa72   : > { %v6794_v59 = vpop.f32.mrf.mxu0 }
 0xa73   : > { %7556 = vrot.lane.b32.xlu0 %v6794_v59, %s9741_s9  ;;  %v9482_v59 = vpop.eup %9481 }
 0xa78   : > { %v9014_v40 = vpop.f32.mrf.mxu1 }
 0xa79   : > { %7562 = vrot.lane.b32.xlu1 %v9014_v40, %s9741_s9  ;;  %v9484_v40 = vpop.eup %9483 }
 0xa7a   : > { %v6881_v60 = vpop.f32.mrf.mxu1  ;;  %v9486_v14 = vpop.eup %9485 }
 0xa7b   : > { %7560 = vrot.lane.b32.xlu0 %v6881_v60, %s9741_s9  ;;  %v8101_v60 = vmul.f32 -1.442695, %v830_v28  ;;  %v9488_v32 = vpop.eup %9487  ;;  %v890_v12 = vadd.f32 1.0, %v9486_v14  ;;  %v12764_v28 = vld [vmem:[#allocation67_spill] sm:$0xff] }
 0xa7c   : > { %v9021_v37 = vpop.f32.mrf.mxu0  ;;  %v891_v5 = vadd.f32 1.0, %v9488_v32  ;;  %v9490_v16 = vpop.eup %9489  ;;  %v838_v10 = vadd.f32 %v12140_v34, %v12764_v28  ;;  %v12769_v28 = vld [vmem:[#allocation70_spill] sm:$0xff] }
 0xa7d   : > { %7566 = vrot.lane.b32.xlu1 %v9021_v37, %s9741_s9  ;;  %v12758_v37 = vld [vmem:[#allocation55_spill] sm:$0xff]  ;;  %9493 = vpow2.f32 %v8101_v60  ;;  %v9492_v8 = vpop.eup %9491  ;;  %v892_v60 = vadd.f32 1.0, %v9490_v16 }
 0xa7e   : > { %v6968_v19 = vpop.f32.mrf.mxu0  ;;  %v12768_v16 = vld [vmem:[#allocation71_spill] sm:$0xff] }
 0xa7f   : > { %7564 = vrot.lane.b32.xlu0 %v6968_v19, %s9741_s9  ;;  %v832_v19 = vadd.f32 %v12140_v34, %v12758_v37  ;;  %v893_v37 = vadd.f32 1.0, %v9492_v8 }
 0xa80   : > { %v9028_v23 = vpop.f32.mrf.mxu1 }
 0xa81   : > { %7570 = vrot.lane.b32.xlu1 %v9028_v23, %s9741_s9  ;;  %v8102_v23 = vmul.f32 -1.442695, %v831_v2  ;;  %v12765_v2 = vld [vmem:[#allocation69_spill] sm:$0xff] }
 0xa82   : > { %v7055_v39 = vpop.f32.mrf.mxu1 }
 0xa83   : > { %7568 = vrot.lane.b32.xlu0 %v7055_v39, %s9741_s9  ;;  %v12759_v39 = vld [vmem:[#allocation57_spill] sm:$0xff]  ;;  %9495 = vpow2.f32 %v8102_v23 }
 0xa84   : > { %v9035_v22 = vpop.f32.mrf.mxu0 }
 0xa85   : > { %7574 = vrot.lane.b32.xlu1 %v9035_v22, %s9741_s9  ;;  %v833_v22 = vadd.f32 %v12140_v34, %v12759_v39  ;;  %v8109_v39 = vmul.f32 -1.442695, %v838_v10  ;;  %v7606_v10 = vsel %vm446_vm0, %v12769_v28, %v12110_v56  ;;  %v12770_v56 = vld [vmem:[#allocation72_spill] sm:$0xff] }
 0xa86   : > { %v7142_v61 = vpop.f32.mrf.mxu0  ;;  %v12774_v28 = vld [vmem:[#allocation76_spill] sm:$0xff] }
 0xa87   : > { %7572 = vrot.lane.b32.xlu0 %v7142_v61, %s9741_s9  ;;  %v888_v61 = vadd.f32 1.0, %v9482_v59  ;;  %v8104_v41 = vmul.f32 -1.442695, %v833_v22  ;;  %v839_v59 = vadd.f32 %v12140_v34, %v12765_v2 }
 0xa88   : > { %v9042_v49 = vpop.f32.mrf.mxu1 }
 0xa89   : > { %7578 = vrot.lane.b32.xlu1 %v9042_v49, %s9741_s9  ;;  %v12178_v49 = vpop.permute.xlu1 %7518  ;;  %9497 = vrcp.f32 %v888_v61  ;;  %v8110_v61 = vmul.f32 -1.442695, %v839_v59 }
 0xa8a   : > { %v7229_v62 = vpop.f32.mrf.mxu1  ;;  %v9494_v23 = vpop.eup %9493 }
 0xa8b   : > { %7576 = vrot.lane.b32.xlu0 %v7229_v62, %s9741_s9  ;;  %v889_v62 = vadd.f32 1.0, %v9484_v40  ;;  %v894_v14 = vadd.f32 1.0, %v9494_v23 }
 0xa8c   : > { %v9049_v1 = vpop.f32.mrf.mxu0 }
 0xa8d   : > { %7582 = vrot.lane.b32.xlu1 %v9049_v1, %s9741_s9  ;;  %v8103_v1 = vmul.f32 -1.442695, %v832_v19  ;;  %9499 = vrcp.f32 %v889_v62  ;;  %v12188_v25 = vpop.permute.xlu1 %7458  ;;  %v12766_v62 = vld [vmem:[#allocation33_spill] sm:$0xff] }
 0xa8e   : > { %v7316_v4 = vpop.f32.mrf.mxu0 }
 0xa8f   : > { %7580 = vrot.lane.b32.xlu0 %v7316_v4, %s9741_s9  ;;  %v12760_v4 = vld [vmem:[#allocation59_spill] sm:$0xff]  ;;  %9501 = vpow2.f32 %v8103_v1  ;;  %v7605_v1 = vsel %vm446_vm0, %v12766_v62, %v12093_v3 }
 0xa90   : > { %9503 = vpow2.f32 %v8104_v41  ;;  %v9496_v22 = vpop.eup %9495  ;;  %v7622_v36 = vsel %vm7620_vm2, %v7605_v1, %v12100_v33  ;;  %v7609_v1 = vsel %vm446_vm0, %v12770_v56, %v12117_v31 }
 0xa91   : > { %v9056_v7 = vpop.f32.mrf.mxu1  ;;  %v12198_v40 = vpop.permute.xlu1 %7522  ;;  %v895_v18 = vadd.f32 1.0, %v9496_v22 }
 0xa92   : > { %7586 = vrot.lane.b32.xlu1 %v9056_v7, %s9741_s9  ;;  %v834_v7 = vadd.f32 %v12140_v34, %v12760_v4 }
 0xa93   : > { %v7403_v15 = vpop.f32.mrf.mxu1 }
 0xa94   : > { %7584 = vrot.lane.b32.xlu0 %v7403_v15, %s9741_s9  ;;  %v12182_v15 = vpop.permute.xlu0 %7516  ;;  %v8105_v20 = vmul.f32 -1.442695, %v834_v7  ;;  %v12767_v7 = vld [vmem:[#allocation74_spill] sm:$0xff] }
 0xa95   : > { %v7604_v41 = vsel %vm446_vm0, %v12767_v7, %v12096_v45 }
 0xa96   : > { %9505 = vpow2.f32 %v8105_v20  ;;  %v9498_v4 = vpop.eup %9497  ;;  %v7621_v32 = vsel %vm7620_vm2, %v7604_v41, %v12103_v27 }
 0xa97   : > { %9507 = vpow2.f32 %v8106_v54 }
 0xa98   : > { %v12192_v29 = vpop.permute.xlu0 %7456  ;;  %9509 = vrcp.f32 %v890_v12 }
 0xa99   : > { %9511 = vrcp.f32 %v891_v5 }
 0xa9a   : > { %9513 = vpow2.f32 %v8107_v6  ;;  %v9500_v47 = vpop.eup %9499  ;;  %v7607_v6 = vsel %vm446_vm0, %v12768_v16, %v12107_v52 }
 0xa9b   : > { %9515 = vpow2.f32 %v8108_v57  ;;  %v7624_v2 = vsel %vm7620_vm2, %v7607_v6, %v12113_v30 }
 0xa9c   : > { %v12200_v19 = vpop.permute.xlu0 %7520  ;;  %9517 = vrcp.f32 %v892_v60  ;;  %v9502_v3 = vpop.eup %9501 }
 0xa9d   : > { %9519 = vrcp.f32 %v893_v37  ;;  %v9504_v9 = vpop.eup %9503  ;;  %v896_v33 = vadd.f32 1.0, %v9502_v3  ;;  %v7623_v37 = vsel %vm7620_vm2, %v7606_v10, %v12115_v17  ;;  %v7626_v17 = vsel %vm7620_vm2, %v7609_v1, %v12121_v51  ;;  %v12772_v51 = vld [vmem:[#allocation75_spill] sm:$0xff]  ;;  %v12777_v1 = vld [vmem:[#allocation81_spill] sm:$0xff] }
 0xa9e   : > { %9521 = vpow2.f32 %v8109_v39  ;;  %v897_v5 = vadd.f32 1.0, %v9504_v9 }
 0xa9f   : > { %9523 = vpow2.f32 %v8110_v61 }
 0xaa0   : > { %9525 = vrcp.f32 %v894_v14 }
 0xaa1   : > { %9527 = vrcp.f32 %v895_v18  ;;  %v7611_v18 = vsel %vm446_vm0, %v12772_v51, %v12125_v13 }
 0xaa2   : > { %9529 = vrcp.f32 %v896_v33  ;;  %v7628_v33 = vsel %vm7620_vm2, %v7611_v18, %v12129_v46  ;;  %v7613_v46 = vsel %vm446_vm0, %v12774_v28, %v12133_v63 }
 0xaa3   : > { %v9506_v12 = vpop.eup %9505  ;;  %9531 = vrcp.f32 %v897_v5 }
 0xaa4   : > { %v9508_v27 = vpop.eup %9507  ;;  %v898_v60 = vadd.f32 1.0, %v9506_v12 }
 0xaa5   : > { %v9510_v57 = vpop.eup %9509  ;;  %v899_v52 = vadd.f32 1.0, %v9508_v27 }
 0xaa6   : > { %v9512_v59 = vpop.eup %9511  ;;  %9533 = vrcp.f32 %v898_v60  ;;  %v7630_v60 = vsel %vm7620_vm2, %v7613_v46, %v12144_v53 }
 0xaa7   : > { %v9514_v22 = vpop.eup %9513  ;;  %9535 = vrcp.f32 %v899_v52 }
 0xaa8   : > { %v9516_v62 = vpop.eup %9515 }
 0xae3   : > { %v7559_v34 = vpop.permute.xlu1 %7558 }
 0xae4   : > { %v7639_v20 = vsel %vm7637_vm3, %v7622_v36, %v7559_v34  ;;  %v9518_v36 = vpop.eup %9517 }
 0xae5   : > { %v7557_v11 = vpop.permute.xlu0 %7556  ;;  %v7655_v44 = vmul.f32 %v9500_v47, %v7639_v20  ;;  %v900_v47 = vadd.f32 1.0, %v9514_v22  ;;  %v9520_v31 = vpop.eup %9519 }
 0xae6   : > { %v7638_v54 = vsel %vm7637_vm3, %v7621_v32, %v7557_v11  ;;  %v901_v11 = vadd.f32 1.0, %v9516_v62 }
 0xae7   : > { %v7654_v45 = vmul.f32 %v9498_v4, %v7638_v54  ;;  %v12771_v4 = vld [vmem:[#allocation73_spill] sm:$0xff]  ;;  %9537 = vrcp.f32 %v900_v47  ;;  %v12778_v47 = vld [vmem:[#allocation80_spill] sm:$0xff] }
 0xae8   : > { %v7608_v7 = vsel %vm446_vm0, %v12771_v4, %v12119_v55  ;;  %v9522_v55 = vpop.eup %9521  ;;  %9539 = vrcp.f32 %v901_v11 }
 0xae9   : > { %9089 = vmatprep.mubr.f32.mxu0 %v7654_v45  ;;  %v7625_v14 = vsel %vm7620_vm2, %v7608_v7, %v12123_v38  ;;  %v9524_v45 = vpop.eup %9523  ;;  %v12773_v38 = vld [vmem:[#allocation77_spill] sm:$0xff]  ;;  %v902_v6 = vadd.f32 1.0, %v9522_v55 }
 0xaea   : > { %9090 = vmatmul.mubr.f32.vlgmr.msra.gmra.mxu0 %v7655_v44  ;;  %v7610_v44 = vsel %vm446_vm0, %v12773_v38, %v12127_v48  ;;  %v9526_v13 = vpop.eup %9525  ;;  %v903_v48 = vadd.f32 1.0, %v9524_v45  ;;  %v12781_v38 = vld [vmem:[#allocation84_spill] sm:$0xff] }
 0xaeb   : > { %v7563_v8 = vpop.permute.xlu1 %7562  ;;  %v7627_v5 = vsel %vm7620_vm2, %v7610_v44, %v12131_v58  ;;  %v12775_v58 = vld [vmem:[#allocation78_spill] sm:$0xff]  ;;  %9541 = vrcp.f32 %v902_v6 }
 0xaec   : > { %v7641_v23 = vsel %vm7637_vm3, %v7624_v2, %v7563_v8  ;;  %9543 = vrcp.f32 %v903_v48 }
 0xaed   : > { %v7561_v39 = vpop.permute.xlu0 %7560  ;;  %v7657_v41 = vmul.f32 %v9512_v59, %v7641_v23  ;;  %v7612_v59 = vsel %vm446_vm0, %v12775_v58, %v12135_v50  ;;  %v12776_v50 = vld [vmem:[#allocation79_spill] sm:$0xff] }
 0xaee   : > { %v7640_v61 = vsel %vm7637_vm3, %v7623_v37, %v7561_v39  ;;  %v7629_v23 = vsel %vm7620_vm2, %v7612_v59, %v12148_v24  ;;  %v7615_v62 = vsel %vm446_vm0, %v12776_v50, %v12150_v35  ;;  %v7614_v24 = vsel %vm446_vm0, %v12777_v1, %v12154_v26  ;;  %v400_v59 = vld [vmem:[%s9931_s24 + $0x10] sm:$0xff] }
 0xaef   : > { %v7656_v30 = vmul.f32 %v9510_v57, %v7640_v61  ;;  %v7567_v34 = vpop.permute.xlu1 %7566  ;;  %v9528_v57 = vpop.eup %9527  ;;  %v7631_v4 = vsel %vm7620_vm2, %v7614_v24, %v12164_v21  ;;  %v7617_v26 = vsel %vm446_vm0, %v12778_v47, %v12168_v0  ;;  %v406_v47 = vld [vmem:[%s9931_s24 + $0x40] sm:$0xff] }
 0xaf0   : > { %v7643_v32 = vsel %vm7637_vm3, %v7626_v17, %v7567_v34  ;;  %v9530_v52 = vpop.eup %9529  ;;  %v7634_v21 = vsel %vm7620_vm2, %v7617_v26, %v12178_v49 }
 0xaf1   : > { %v7565_v20 = vpop.permute.xlu0 %7564  ;;  %9092 = vmatprep.mubr.f32.mxu0 %v7656_v30  ;;  %v7659_v12 = vmul.f32 %v9520_v31, %v7643_v32  ;;  %v9532_v61 = vpop.eup %9531  ;;  %v7632_v30 = vsel %vm7620_vm2, %v7615_v62, %v12158_v42  ;;  %v12779_v42 = vld [vmem:[#allocation82_spill] sm:$0xff] }
 0xaf2   : > { %v7642_v3 = vsel %vm7637_vm3, %v7625_v14, %v7565_v20  ;;  %9093 = vmatmul.mubr.f32.gmra.mxu0 %v7657_v41  ;;  %v9534_v41 = vpop.eup %9533  ;;  %v7616_v20 = vsel %vm446_vm0, %v12779_v42, %v12172_v43  ;;  %v409_v42 = vld [vmem:[%s9931_s24 + $0x58] sm:$0xff] }
 0xaf3   : > { %v7658_v54 = vmul.f32 %v9518_v36, %v7642_v3  ;;  %v7571_v9 = vpop.permute.xlu1 %7570  ;;  %v9536_v36 = vpop.eup %9535  ;;  %v7633_v11 = vsel %vm7620_vm2, %v7616_v20, %v12182_v15  ;;  %v7618_v15 = vsel %vm446_vm0, %v12781_v38, %v12192_v29 }
 0xaf4   : > { %v7645_v27 = vsel %vm7637_vm3, %v7628_v33, %v7571_v9  ;;  %v9538_v51 = vpop.eup %9537  ;;  %v12780_v9 = vld [vmem:[#allocation83_spill] sm:$0xff]  ;;  %v7635_v33 = vsel %vm7620_vm2, %v7618_v15, %v12200_v19  ;;  %v12302_v19 = vld [vmem:[%s12437_s6] ss:$0 sm:$0xff] }
 0xaf5   : > { %v7569_v16 = vpop.permute.xlu0 %7568  ;;  %9095 = vmatprep.mubr.f32.mxu0 %v7658_v54  ;;  %v7661_v37 = vmul.f32 %v9528_v57, %v7645_v27  ;;  %v9540_v18 = vpop.eup %9539  ;;  %v7619_v43 = vsel %vm446_vm0, %v12780_v9, %v12188_v25 }
 0xaf6   : > { %v7644_v8 = vsel %vm7637_vm3, %v7627_v5, %v7569_v16  ;;  %9096 = vmatmul.mubr.f32.gmra.mxu0 %v7659_v12  ;;  %v7636_v44 = vsel %vm7620_vm2, %v7619_v43, %v12198_v40  ;;  %v399_v40 = vld [vmem:[%s9931_s24 + $0x8] sm:$0xff]  ;;  %v410_v43 = vld [vmem:[%s9931_s24 + $0x60] sm:$0xff] }
 0xaf7   : > { %v7660_v10 = vmul.f32 %v9526_v13, %v7644_v8  ;;  %v7575_v2 = vpop.permute.xlu1 %7574  ;;  %v398_v8 = vld [vmem:[%s9931_s24] sm:$0xff] }
 0xaf8   : > { %v7647_v39 = vsel %vm7637_vm3, %v7630_v60, %v7575_v2  ;;  %v9542_v25 = vpop.eup %9541  ;;  %v401_v2 = vld [vmem:[%s9931_s24 + $0x18] sm:$0xff] }
 0xaf9   : > { %v7573_v22 = vpop.permute.xlu0 %7572  ;;  %9098 = vmatprep.mubr.f32.mxu0 %v7660_v10  ;;  %v7663_v34 = vmul.f32 %v9532_v61, %v7647_v39  ;;  %v9544_v16 = vpop.eup %9543 }
 0xafa   : > { %v7646_v63 = vsel %vm7637_vm3, %v7629_v23, %v7573_v22  ;;  %9099 = vmatmul.mubr.f32.gmra.mxu0 %v7661_v37  ;;  %v403_v23 = vld [vmem:[%s9931_s24 + $0x28] sm:$0xff] }
 0xafb   : > { %v7662_v53 = vmul.f32 %v9530_v52, %v7646_v63  ;;  %v7579_v56 = vpop.permute.xlu1 %7578  ;;  %v402_v63 = vld [vmem:[%s9931_s24 + $0x20] sm:$0xff] }
 0xafc   : > { %v7649_v7 = vsel %vm7637_vm3, %v7632_v30, %v7579_v56  ;;  %v404_v30 = vld [vmem:[%s9931_s24 + $0x30] sm:$0xff] }
 0xafd   : > { %v7577_v17 = vpop.permute.xlu0 %7576  ;;  %9101 = vmatprep.mubr.f32.mxu0 %v7662_v53  ;;  %v7665_v31 = vmul.f32 %v9536_v36, %v7649_v7  ;;  %v405_v53 = vld [vmem:[%s9931_s24 + $0x38] sm:$0xff] }
 0xafe   : > { %v7648_v35 = vsel %vm7637_vm3, %v7631_v4, %v7577_v17  ;;  %9102 = vmatmul.mubr.f32.gmra.mxu0 %v7663_v34  ;;  %v407_v17 = vld [vmem:[%s9931_s24 + $0x48] sm:$0xff] }
 0xaff   : > { %v7664_v14 = vmul.f32 %v9534_v41, %v7648_v35  ;;  %v7583_v32 = vpop.permute.xlu1 %7582 }
 0xb00   : > { %v7651_v3 = vsel %vm7637_vm3, %v7634_v21, %v7583_v32 }
 0xb01   : > { %v7581_v55 = vpop.permute.xlu0 %7580  ;;  %9104 = vmatprep.mubr.f32.mxu0 %v7664_v14  ;;  %v7667_v45 = vmul.f32 %v9540_v18, %v7651_v3 }
 0xb02   : > { %v7650_v0 = vsel %vm7637_vm3, %v7633_v11, %v7581_v55  ;;  %9105 = vmatmul.mubr.f32.gmra.mxu0 %v7665_v31  ;;  %v408_v11 = vld [vmem:[%s9931_s24 + $0x50] sm:$0xff] }
 0xb03   : > { %v7666_v54 = vmul.f32 %v9538_v51, %v7650_v0  ;;  %v411_v0 = vld [vmem:[%s9931_s24 + $0x68] sm:$0xff] }
 0xb04   : > { %v7587_v49 = vpop.permute.xlu1 %7586 }
 0xb05   : > { %9107 = vmatprep.mubr.f32.mxu0 %v7666_v54  ;;  %v7653_v12 = vsel %vm7637_vm3, %v7636_v44, %v7587_v49 }
 0xb06   : > { %v7585_v5 = vpop.permute.xlu0 %7584  ;;  %9108 = vmatmul.mubr.f32.gmra.mxu0 %v7667_v45  ;;  %v7669_v29 = vmul.f32 %v9544_v16, %v7653_v12 }
 0xb07   : > { %v7652_v27 = vsel %vm7637_vm3, %v7635_v33, %v7585_v5  ;;  %v413_v33 = vld [vmem:[%s9931_s24 + $0x78] sm:$0xff] }
 0xb08   : > { %v7668_v13 = vmul.f32 %v9542_v25, %v7652_v27  ;;  %v412_v25 = vld [vmem:[%s9931_s24 + $0x70] sm:$0xff]  ;;  %s7887_s24 = scalar_lea.sflag [#allocation4], %s9924_s30 }
 0xb0a   : > { %9110 = vmatprep.mubr.f32.mxu0 %v7668_v13 }
 0xb0b   : > { %9111 = vmatmul.mubr.f32.gmra.mxu0 %v7669_v29 }
 0xbaa   : > { %v9091_v6 = vpop.f32.mrf.mxu0 }
 0xbab   : > { %v7832_v57 = vadd.f32 %v9091_v6, %v399_v40 }
 0xbac   : > { %v7752_v48 = vpop.f32.mrf.mxu0 }
 0xbad   : > { %v7855_v28 = vadd.f32 %v12302_v19, %v7832_v57  ;;  %v7831_v46 = vadd.f32 %v7752_v48, %v398_v8 }
 0xbaf   : > { %7871 = vst.msk [vmem:[%s12307_s15 + $0x8] sm:$0xff] %vm446_vm0, %v7855_v28  ;;  %v7854_v10 = vadd.f32 %v12302_v19, %v7831_v46 }
 0xbb1   : > { %7870 = vst.msk [vmem:[%s12307_s15] sm:$0xff] %vm446_vm0, %v7854_v10 }
 0xbb2   : > { %v9094_v58 = vpop.f32.mrf.mxu0 }
 0xbb3   : > { %v7834_v60 = vadd.f32 %v9094_v58, %v401_v2 }
 0xbb4   : > { %v7762_v37 = vpop.f32.mrf.mxu0 }
 0xbb5   : > { %v7857_v39 = vadd.f32 %v12302_v19, %v7834_v60  ;;  %v7833_v22 = vadd.f32 %v7762_v37, %v400_v59 }
 0xbb6   : > { %v9097_v52 = vpop.f32.mrf.mxu0 }
 0xbb7   : > { %7873 = vst.msk [vmem:[%s12307_s15 + $0x18] sm:$0xff] %vm446_vm0, %v7857_v39  ;;  %v7856_v61 = vadd.f32 %v12302_v19, %v7833_v22  ;;  %v7836_v50 = vadd.f32 %v9097_v52, %v403_v23 }
 0xbb8   : > { %v7772_v62 = vpop.f32.mrf.mxu0 }
 0xbb9   : > { %7872 = vst.msk [vmem:[%s12307_s15 + $0x10] sm:$0xff] %vm446_vm0, %v7856_v61  ;;  %v7859_v56 = vadd.f32 %v12302_v19, %v7836_v50  ;;  %v7835_v1 = vadd.f32 %v7772_v62, %v402_v63 }
 0xbba   : > { %v9100_v24 = vpop.f32.mrf.mxu0 }
 0xbbb   : > { %7875 = vst.msk [vmem:[%s12307_s15 + $0x28] sm:$0xff] %vm446_vm0, %v7859_v56  ;;  %v7858_v34 = vadd.f32 %v12302_v19, %v7835_v1  ;;  %v7838_v4 = vadd.f32 %v9100_v24, %v405_v53 }
 0xbbc   : > { %v7782_v7 = vpop.f32.mrf.mxu0 }
 0xbbd   : > { %7874 = vst.msk [vmem:[%s12307_s15 + $0x20] sm:$0xff] %vm446_vm0, %v7858_v34  ;;  %v7861_v41 = vadd.f32 %v12302_v19, %v7838_v4  ;;  %v7837_v35 = vadd.f32 %v7782_v7, %v404_v30 }
 0xbbe   : > { %v9103_v36 = vpop.f32.mrf.mxu0 }
 0xbbf   : > { %7877 = vst.msk [vmem:[%s12307_s15 + $0x38] sm:$0xff] %vm446_vm0, %v7861_v41  ;;  %v7860_v26 = vadd.f32 %v12302_v19, %v7837_v35  ;;  %v7840_v14 = vadd.f32 %v9103_v36, %v407_v17 }
 0xbc0   : > { %v7792_v32 = vpop.f32.mrf.mxu0 }
 0xbc1   : > { %7876 = vst.msk [vmem:[%s12307_s15 + $0x30] sm:$0xff] %vm446_vm0, %v7860_v26  ;;  %v7863_v20 = vadd.f32 %v12302_v19, %v7840_v14  ;;  %v7839_v21 = vadd.f32 %v7792_v32, %v406_v47 }
 0xbc2   : > { %v9106_v31 = vpop.f32.mrf.mxu0 }
 0xbc3   : > { %7879 = vst.msk [vmem:[%s12307_s15 + $0x48] sm:$0xff] %vm446_vm0, %v7863_v20  ;;  %v7862_v3 = vadd.f32 %v12302_v19, %v7839_v21  ;;  %v7842_v55 = vadd.f32 %v9106_v31, %v409_v42 }
 0xbc4   : > { %v7802_v51 = vpop.f32.mrf.mxu0 }
 0xbc5   : > { %7878 = vst.msk [vmem:[%s12307_s15 + $0x40] sm:$0xff] %vm446_vm0, %v7862_v3  ;;  %v7865_v18 = vadd.f32 %v12302_v19, %v7842_v55  ;;  %v7841_v54 = vadd.f32 %v7802_v51, %v408_v11 }
 0xbc6   : > { %v9109_v9 = vpop.f32.mrf.mxu0 }
 0xbc7   : > { %7881 = vst.msk [vmem:[%s12307_s15 + $0x58] sm:$0xff] %vm446_vm0, %v7865_v18  ;;  %v7864_v45 = vadd.f32 %v12302_v19, %v7841_v54  ;;  %v7844_v49 = vadd.f32 %v9109_v9, %v411_v0 }
 0xbc8   : > { %v7812_v38 = vpop.f32.mrf.mxu0 }
 0xbc9   : > { %7880 = vst.msk [vmem:[%s12307_s15 + $0x50] sm:$0xff] %vm446_vm0, %v7864_v45  ;;  %v7867_v15 = vadd.f32 %v12302_v19, %v7844_v49  ;;  %v7843_v44 = vadd.f32 %v7812_v38, %v410_v43 }
 0xbcb   : > { %7883 = vst.msk [vmem:[%s12307_s15 + $0x68] sm:$0xff] %vm446_vm0, %v7867_v15  ;;  %v7866_v12 = vadd.f32 %v12302_v19, %v7843_v44  ;;  %v9112_v5 = vpop.f32.mrf.mxu0 }
 0xbcc   : > { %v7846_v27 = vadd.f32 %v9112_v5, %v413_v33 }
 0xbcd   : > { %7882 = vst.msk [vmem:[%s12307_s15 + $0x60] sm:$0xff] %vm446_vm0, %v7866_v12  ;;  %v7822_v16 = vpop.f32.mrf.mxu0 }
 0xbce   : > { %v7869_v13 = vadd.f32 %v12302_v19, %v7846_v27  ;;  %v7845_v29 = vadd.f32 %v7822_v16, %v412_v25 }
 0xbd0   : > { %7885 = vst.msk [vmem:[%s12307_s15 + $0x78] sm:$0xff] %vm446_vm0, %v7869_v13  ;;  %v7868_v40 = vadd.f32 %v12302_v19, %v7845_v29 }
 0xbd2   : > { %7884 = vst.msk [vmem:[%s12307_s15 + $0x70] sm:$0xff] %vm446_vm0, %v7868_v40 }
 0xbd3   : > { %9640 = shalt.err (!%p9637_p2)
}
 0xbd4   : > { %s9641_s9 = scalar_lea.hbm %s12371_s27, 2048  ;;  %s9645_s22 = scalar_lea.hbm %s12785_s0, 8192 }
 0xbd5   : > { %p9642_p6 = scmp.ne.s32.totalorder %s12371_s27, %s9641_s9  ;;  %p9646_p11 = scmp.lt.s32.totalorder %s12371_s27, %s12785_s0 }
 0xbd6   : > { %p9647_p10 = scmp.lt.s32.totalorder %s9645_s22, %s9641_s9 }
 0xbd7   : > { %p9643_p7 = pnand %p9642_p6, %p9871_p12 }
 0xbd8   : > { %p9648_p1 = por %p9647_p10, %p9646_p11 }
 0xbd9   : > { %p9644_p9 = pneg %p9643_p7 }
 0xbdb   : > { %p9649_p4 = pnand %p9648_p1, %p9644_p9 }
 0xbdd   : > { %9652 = shalt.err (!%p9649_p4)
}
 0xbde   : > { %s9745_s16 = smov 128   ;;  %s9746_s17 = smov 8  }
 0xbdf   : > { %9129 = dma.vmem_to_hbm [thread:$0]  (%p9871_p12), %s12373_s21, 2048, %s12371_s27, %s7887_s24, %s9745_s16, %s9745_s16, %s9746_s17  }
 0xbe0 PF: > { %s12786_s10 = sld [smem:[#allocation13_spill]]  ;;  %p9149_p8 = scmp.ge.s32.totalorder %s9731_s8, 2 }
 0xbe1   : > { %s12787_s3 = sld [smem:[#allocation17_spill]] }
 0xbe6   : > { %s7918_s7 = sand.u32 1, %s12786_s10  }
 0xbe7   : > { %p12788_p3 = scmp.ne.s32.totalorder %s12787_s3, 0  ;;  %s7919_s23 = scalar_lea.sflag [#allocation4], %s7918_s7 }
 0xbe9   : > { %p9143_p5 = pnand %p9149_p8, %p12788_p3 }
 0xbeb   : > { %p9144_p13 = pneg %p9143_p5 }
 0xbed   : > { %9698 = dma.done.wait (%p9144_p13), %s7919_s23, 2048  }
 0xbee   : > { %9700 = vsyncadd (%p9144_p13), %s7919_s23, 4294965248  ;;  %s26_s8 = sadd.s32 1, %s9731_s8   ;;  %s12789_s28 = sld [smem:[#allocation21_spill]] }
 0xbef   : > { %p23_p0 = scmp.ge.s32.totalorder %s26_s8, 6   ;;  %s12790_s27 = sld [smem:[#allocation15_spill]] }
 0xbf0   : > { %s12791_s30 = sld [smem:[#allocation16_spill]]  ;;  %s12794_s24 = smov %s9707_s25 }
 0xbf1   : > { %s12792_s29 = sld [smem:[#allocation18_spill]]  ;;  %s12795_s25 = smov %s9711_s26 }
 0xbf2   : > { %s12793_s21 = sld [smem:[#allocation20_spill]] }
 0xbf4   : > { %s12796_s26 = smov %s12789_s28  ;;  %25 = sbr.rel (!%p23_p0) target bundleno = 13 (0xd), region = 116 }
 0xbf6   : > { %s12797_s28 = smov %s12791_s30 }
 0xbf8   : > { %s12798_s30 = smov %s12793_s21 }
 0xbf9   :  { %7924 = vsyncpa [#allocation3], 1 }
 0xbfa   :  { %7926 = vsyncpa [#allocation3 + $0x1], 1 }
 0xbfb   :  { %7927 = vsyncpa [#allocation6], 1 }
 0xbfc   :  { %7929 = vsyncpa [#allocation6 + $0x1], 1 }
 0xbfd   :  { %7930 = vsyncpa [#allocation4], 1 }
 0xbfe   :  { %7932 = vsyncpa [#allocation4 + $0x1], 1 }

</bundles_post_ra>
